<compile_context>
chip_gen: v7x
topology: tpu7x:2x2x1
jax: 0.10.0
libtpu: 0.0.40
codegen_flags: <defaults>
</compile_context>

<pallas_src>
import math

import jax
import jax.numpy as jnp
from jax.experimental import pallas as pl
from jax.experimental.pallas import tpu as pltpu

# ---- problem sizes (small, consistent with the module) ----------------------
N = 16            # number of graph nodes
IN_F = 32         # in_features
HID_F = 16        # hidden_features
OUT_F = 32        # out_features
NUM_LAYERS = 3
HEADS = (4, 4, 4)
NEG_SLOPE = 0.2               # GATv2Conv leaky_relu default
RES_DIM = OUT_F * HEADS[-1]   # 128 -> lane-dense output
PAD = 128                     # uniform padded channel width (lanes)
HP = 8                        # padded head-column count for the score matmul

# per-layer (in_dim, out_channels, heads); last layer input = hidden*heads[-2]
LAYER_DIMS = (
    (IN_F, HID_F, HEADS[0]),
    (HID_F * HEADS[0], HID_F, HEADS[1]),
    (HID_F * HEADS[1], OUT_F, HEADS[2]),
)


# ---- the Pallas kernel: full forward pass in one invocation ------------------
def resgat_kernel(x_ref, adjb_ref, g_ref, w_ref, v_ref, att_ref, o_ref):
    # x_ref   : (N, 128)        padded node features
    # adjb_ref: (N*N, 8)        additive adjacency bias, row i*N+j = edge j->i
    # g_ref   : (N, N*N)        group-sum matrix  G[i, i*N+j] = 1
    # w_ref   : (7, 128, 128)   [wl0, wr0, wl1, wr1, wl2, wr2, wres] zero-padded
    # v_ref   : (3, 16, 128)    rows 0..7 expander, 8 bl, 9 br, 10 out-bias,
    #                           11 (layer 0 only) residual bias
    # att_ref : (3, 128, 8)     block-diagonal attention vectors per layer
    x = x_ref[...]                                       # (N, 128)
    adjb = adjb_ref[...]                                 # (N*N, HP)
    G = g_ref[...]                                       # (N, N*N)

    # residual branch: Linear(in_features, out_features * heads[-1])
    x_res = jnp.dot(x, w_ref[6], preferred_element_type=jnp.float32) + v_ref[0, 11:12, :]

    h = x
    for l in range(NUM_LAYERS):
        wl = w_ref[2 * l]                                # (128, 128)
        wr = w_ref[2 * l + 1]                            # (128, 128)
        exp_mat = v_ref[l, 0:8, :]                       # (8, 128) head -> channel expander
        bl = v_ref[l, 8:9, :]                            # (1, 128)
        br = v_ref[l, 9:10, :]
        bo = v_ref[l, 10:11, :]
        att_bd = att_ref[l]                              # (128, HP) block-diag att vectors

        # source / target projections (one matmul each, all heads at once)
        gl = jnp.dot(h, wl, preferred_element_type=jnp.float32) + bl   # (N, 128)
        gr = jnp.dot(h, wr, preferred_element_type=jnp.float32) + br   # (N, 128)

        # fused, lane-dense pairwise tensor + single leaky_relu pass
        t = gr[:, None, :] + gl[None, :, :]              # (N, N, 128), [i, j, :]
        s = jnp.where(t > 0, t, NEG_SLOPE * t)           # leaky_relu, one issue

        # per-head score reduction as ONE MXU matmul (off the XLU)
        e = jnp.dot(s.reshape(N * N, PAD), att_bd,
                    preferred_element_type=jnp.float32)  # (N*N, HP)

        # additive adjacency mask + softmax over sources j, all heads at once
        z = (e + adjb).reshape(N, N, HP)                 # (N, N, HP)
        m = jnp.max(z, axis=1, keepdims=True)            # (N, 1, HP)
        p = jnp.exp(z - m)                               # masked entries -> exactly 0
        d = jnp.sum(p, axis=1, keepdims=True)            # (N, 1, HP)  (>=1: self-loops)
        alpha = (p * pl.reciprocal(d, approx=True)).reshape(N * N, HP)

        # aggregation: expand head cols -> channel cols (MXU), weight by source
        # features, then group-sum over j (MXU).  No per-head loop, no concat.
        ae = jnp.dot(alpha, exp_mat, preferred_element_type=jnp.float32)   # (N*N, 128)
        msg = (ae.reshape(N, N, PAD) * gl[None, :, :]).reshape(N * N, PAD)
        out = jnp.dot(G, msg, preferred_element_type=jnp.float32) + bo     # (N, 128)

        h = jnp.where(out > 0, out, jnp.exp(jnp.minimum(out, 0.0)) - 1.0)  # ELU
        # TODO(synk): F.dropout(p=0.3) between layers is identity in eval mode.

    o_ref[...] = jnp.maximum(h + x_res, 0.0)             # relu(x + x_res)


# ---- wrapper -----------------------------------------------------------------
def edge_index_to_adj(edge_index, n):
    # adj[i, j] = 1 if there is an edge j -> i; add self-loops (PyG default).
    src, dst = edge_index[0], edge_index[1]
    adj = jnp.zeros((n, n), jnp.float32).at[dst, src].set(1.0)
    return jnp.maximum(adj, jnp.eye(n, dtype=jnp.float32))


def _pack_params(params):
    """Consolidate all layer weights into 3 pre-padded slabs (few DMAs)."""
    wres, bres, layers = params
    W = jnp.zeros((7, PAD, PAD), jnp.float32)
    V = jnp.zeros((NUM_LAYERS, 16, PAD), jnp.float32)
    ATT = jnp.zeros((NUM_LAYERS, PAD, HP), jnp.float32)
    for l, ((wl, wr, vecs), (i_dim, c, hds)) in enumerate(zip(layers, LAYER_DIMS)):
        hc = c * hds
        W = W.at[2 * l, :i_dim, :hc].set(wl)
        W = W.at[2 * l + 1, :i_dim, :hc].set(wr)
        V = V.at[l, 8, :hc].set(vecs[0])                 # bias_l
        V = V.at[l, 9, :hc].set(vecs[1])                 # bias_r
        V = V.at[l, 10, :hc].set(vecs[3])                # output bias
        att = vecs[2].reshape(hds, c)
        for hd in range(hds):
            ATT = ATT.at[l, hd * c:(hd + 1) * c, hd].set(att[hd])   # block-diag att
            V = V.at[l, hd, hd * c:(hd + 1) * c].set(1.0)           # expander row
    W = W.at[6, :IN_F, :RES_DIM].set(wres)               # residual weight
    V = V.at[0, 11, :RES_DIM].set(bres[0])               # residual bias (stashed)
    return W, V, ATT


@jax.jit
def resgatv2_forward(x, edge_index, params):
    W, V, ATT = _pack_params(params)

    adj = edge_index_to_adj(edge_index, N)
    # additive bias: 0 on edges (incl. self-loops), -1e30 elsewhere, flattened
    # to row order i*N + j so it adds directly onto the (N*N, HP) score matrix.
    adjb = jnp.where(adj > 0, 0.0, -1e30).astype(jnp.float32).reshape(N * N, 1)
    adjb = jnp.broadcast_to(adjb, (N * N, HP))

    # group-sum matrix: G[i, i*N + j] = 1  (sums messages over sources j)
    G = (jnp.arange(N * N)[None, :] // N == jnp.arange(N)[:, None]).astype(jnp.float32)

    x_pad = jnp.zeros((N, PAD), jnp.float32).at[:, :IN_F].set(x)

    inputs = [x_pad, adjb, G, W, V, ATT]

    # rough advisory cost estimate for XLA's scheduler
    flops = 2 * N * PAD * PAD
    flops += NUM_LAYERS * (2 * 2 * N * PAD * PAD          # gl, gr
                           + 2 * N * N * PAD * HP         # scores
                           + 2 * N * N * HP * PAD         # head expand
                           + 2 * N * N * N * PAD)         # group-sum aggregate
    transcendentals = NUM_LAYERS * (N * N * HP + N * PAD)
    bytes_accessed = sum(int(a.size) * 4 for a in inputs) + N * PAD * 4

    vmem = pltpu.MemorySpace.VMEM
    return pl.pallas_call(
        resgat_kernel,
        out_shape=jax.ShapeDtypeStruct((N, PAD), jnp.float32),
        in_specs=[pl.BlockSpec(memory_space=vmem)] * len(inputs),
        out_specs=pl.BlockSpec(memory_space=vmem),
        cost_estimate=pl.CostEstimate(flops=int(flops),
                                      transcendentals=int(transcendentals),
                                      bytes_accessed=int(bytes_accessed)),
    )(*inputs)


# ---- deterministic parameter init (synthetic; mirrors PyG GATv2Conv shapes) --
def init_params(key):
    keys = jax.random.split(key, 2 + 3 * NUM_LAYERS)
    ki = iter(keys)

    def unif(k, shape, fan_in):
        b = 1.0 / math.sqrt(fan_in)
        return jax.random.uniform(k, shape, jnp.float32, -b, b)

    layers = []
    for (i_dim, c, hds) in LAYER_DIMS:
        hc = c * hds
        wl = unif(next(ki), (i_dim, hc), i_dim)     # lin_l weight, pre-transposed (in, out)
        wr = unif(next(ki), (i_dim, hc), i_dim)     # lin_r weight, pre-transposed (in, out)
        vecs = unif(next(ki), (4, hc), i_dim)       # rows: [bias_l, bias_r, att(flat), bias]
        layers.append((wl, wr, vecs))
    wres = unif(next(ki), (IN_F, RES_DIM), IN_F)    # residual Linear, pre-transposed
    bres = unif(next(ki), (1, RES_DIM), IN_F)
    return wres, bres, layers


# ---- pure-JAX reference (mirrors PyG GATv2Conv + RESGATv2, eval mode) --------
def reference(x, edge_index, params):
    wres, bres, layers = params
    adj = edge_index_to_adj(edge_index, N)
    x_res = x @ wres + bres
    h = x
    for (wl, wr, vecs), (_, out_ch, heads) in zip(layers, LAYER_DIMS):
        hc = out_ch * heads
        gl = h @ wl + vecs[0]
        gr = h @ wr + vecs[1]
        att = vecs[2].reshape(heads, out_ch)
        bias = vecs[3]
        gl3 = gl.reshape(N, heads, out_ch)
        gr3 = gr.reshape(N, heads, out_ch)
        t = gr3[:, None, :, :] + gl3[None, :, :, :]            # (i, j, h, c)
        t = jnp.where(t > 0, t, NEG_SLOPE * t)
        e = jnp.einsum('ijhc,hc->hij', t, att)                 # (h, i, j)
        e = jnp.where(adj[None] > 0, e, -1e30)
        alpha = jax.nn.softmax(e, axis=-1) * adj[None]
        out = jnp.einsum('hij,jhc->ihc', alpha, gl3).reshape(N, hc) + bias
        h = jnp.where(out > 0, out, jnp.exp(jnp.minimum(out, 0.0)) - 1.0)   # elu
    return jnp.maximum(h + x_res, 0.0)


if __name__ == "__main__":
    key = jax.random.PRNGKey(0)
    kx, kp = jax.random.split(key)
    x = jax.random.normal(kx, (N, IN_F), dtype=jnp.float32)

    # deterministic small graph: ring (both directions) + skip-5 edges
    idx = jnp.arange(N, dtype=jnp.int32)
    src = jnp.concatenate([idx, idx, idx])
    dst = jnp.concatenate([(idx + 1) % N, (idx - 1) % N, (idx + 5) % N])
    edge_index = jnp.stack([src, dst]).astype(jnp.int32)       # (2, 48)

    params = init_params(kp)

    out = resgatv2_forward(x, edge_index, params)
    out = jax.block_until_ready(out)

    ref = reference(x, edge_index, params)
    err = float(jnp.max(jnp.abs(out - ref)))
    assert out.shape == (N, RES_DIM)
    assert err < 2e-2, f"max abs error too large: {err}"
    print("KERNEL_OK")
</pallas_src>

<mosaic_0001>
module attributes {stable_mosaic.version = 11 : i64} {
  func.func @resgat_kernel(%arg0: memref<16x128xf32, #tpu.memory_space<vmem>>, %arg1: memref<256x8xf32, #tpu.memory_space<vmem>>, %arg2: memref<16x256xf32, #tpu.memory_space<vmem>>, %arg3: memref<7x128x128xf32, #tpu.memory_space<vmem>>, %arg4: memref<3x16x128xf32, #tpu.memory_space<vmem>>, %arg5: memref<3x128x8xf32, #tpu.memory_space<vmem>>, %arg6: memref<16x128xf32, #tpu.memory_space<vmem>>) attributes {dimension_semantics = [], scalar_prefetch = 0 : i64, scratch_operands = 0 : i64, tpu.core_type = #tpu.core_type<tc>} {
    %c0 = arith.constant 0 : index
    %c0_0 = arith.constant 0 : index
    %0 = vector.load %arg0[%c0, %c0_0] : memref<16x128xf32, #tpu.memory_space<vmem>>, vector<16x128xf32>
    %c0_1 = arith.constant 0 : index
    %c0_2 = arith.constant 0 : index
    %1 = vector.load %arg1[%c0_1, %c0_2] : memref<256x8xf32, #tpu.memory_space<vmem>>, vector<256x8xf32>
    %c0_3 = arith.constant 0 : index
    %c0_4 = arith.constant 0 : index
    %2 = vector.load %arg2[%c0_3, %c0_4] : memref<16x256xf32, #tpu.memory_space<vmem>>, vector<16x256xf32>
    %c6 = arith.constant 6 : index
    %c0_5 = arith.constant 0 : index
    %c0_6 = arith.constant 0 : index
    %3 = vector.load %arg3[%c6, %c0_5, %c0_6] : memref<7x128x128xf32, #tpu.memory_space<vmem>>, vector<1x128x128xf32>
    %4 = vector.shape_cast %3 : vector<1x128x128xf32> to vector<128x128xf32>
    %cst = arith.constant dense<0.000000e+00> : vector<16x128xf32>
    %5 = tpu.matmul %0, %4, %cst {dimension_numbers = #tpu.dot_dimension_numbers<[1], [0], [0], [1], [0, 0, 1, 1], [], []>} : vector<16x128xf32>, vector<128x128xf32>, vector<16x128xf32> -> vector<16x128xf32>
    %c0_7 = arith.constant 0 : index
    %c11 = arith.constant 11 : index
    %c0_8 = arith.constant 0 : index
    %6 = vector.load %arg4[%c0_7, %c11, %c0_8] : memref<3x16x128xf32, #tpu.memory_space<vmem>>, vector<1x1x128xf32>
    %7 = vector.shape_cast %6 : vector<1x1x128xf32> to vector<1x128xf32>
    %8 = vector.broadcast %7 : vector<1x128xf32> to vector<16x128xf32>
    %9 = arith.addf %5, %8 : vector<16x128xf32>
    %c0_9 = arith.constant 0 : index
    %c0_10 = arith.constant 0 : index
    %c0_11 = arith.constant 0 : index
    %10 = vector.load %arg3[%c0_9, %c0_10, %c0_11] : memref<7x128x128xf32, #tpu.memory_space<vmem>>, vector<1x128x128xf32>
    %11 = vector.shape_cast %10 : vector<1x128x128xf32> to vector<128x128xf32>
    %c1 = arith.constant 1 : index
    %c0_12 = arith.constant 0 : index
    %c0_13 = arith.constant 0 : index
    %12 = vector.load %arg3[%c1, %c0_12, %c0_13] : memref<7x128x128xf32, #tpu.memory_space<vmem>>, vector<1x128x128xf32>
    %13 = vector.shape_cast %12 : vector<1x128x128xf32> to vector<128x128xf32>
    %c0_14 = arith.constant 0 : index
    %c0_15 = arith.constant 0 : index
    %c0_16 = arith.constant 0 : index
    %14 = vector.load %arg4[%c0_14, %c0_15, %c0_16] : memref<3x16x128xf32, #tpu.memory_space<vmem>>, vector<1x8x128xf32>
    %15 = vector.shape_cast %14 : vector<1x8x128xf32> to vector<8x128xf32>
    %c0_17 = arith.constant 0 : index
    %c8 = arith.constant 8 : index
    %c0_18 = arith.constant 0 : index
    %16 = vector.load %arg4[%c0_17, %c8, %c0_18] : memref<3x16x128xf32, #tpu.memory_space<vmem>>, vector<1x1x128xf32>
    %17 = vector.shape_cast %16 : vector<1x1x128xf32> to vector<1x128xf32>
    %c0_19 = arith.constant 0 : index
    %c9 = arith.constant 9 : index
    %c0_20 = arith.constant 0 : index
    %18 = vector.load %arg4[%c0_19, %c9, %c0_20] : memref<3x16x128xf32, #tpu.memory_space<vmem>>, vector<1x1x128xf32>
    %19 = vector.shape_cast %18 : vector<1x1x128xf32> to vector<1x128xf32>
    %c0_21 = arith.constant 0 : index
    %c10 = arith.constant 10 : index
    %c0_22 = arith.constant 0 : index
    %20 = vector.load %arg4[%c0_21, %c10, %c0_22] : memref<3x16x128xf32, #tpu.memory_space<vmem>>, vector<1x1x128xf32>
    %21 = vector.shape_cast %20 : vector<1x1x128xf32> to vector<1x128xf32>
    %c0_23 = arith.constant 0 : index
    %c0_24 = arith.constant 0 : index
    %c0_25 = arith.constant 0 : index
    %22 = vector.load %arg5[%c0_23, %c0_24, %c0_25] : memref<3x128x8xf32, #tpu.memory_space<vmem>>, vector<1x128x8xf32>
    %23 = vector.shape_cast %22 : vector<1x128x8xf32> to vector<128x8xf32>
    %cst_26 = arith.constant dense<0.000000e+00> : vector<16x128xf32>
    %24 = tpu.matmul %0, %11, %cst_26 {dimension_numbers = #tpu.dot_dimension_numbers<[1], [0], [0], [1], [0, 0, 1, 1], [], []>} : vector<16x128xf32>, vector<128x128xf32>, vector<16x128xf32> -> vector<16x128xf32>
    %25 = vector.broadcast %17 : vector<1x128xf32> to vector<16x128xf32>
    %26 = arith.addf %24, %25 : vector<16x128xf32>
    %cst_27 = arith.constant dense<0.000000e+00> : vector<16x128xf32>
    %27 = tpu.matmul %0, %13, %cst_27 {dimension_numbers = #tpu.dot_dimension_numbers<[1], [0], [0], [1], [0, 0, 1, 1], [], []>} : vector<16x128xf32>, vector<128x128xf32>, vector<16x128xf32> -> vector<16x128xf32>
    %28 = vector.broadcast %19 : vector<1x128xf32> to vector<16x128xf32>
    %29 = arith.addf %27, %28 : vector<16x128xf32>
    %30 = vector.shape_cast %29 : vector<16x128xf32> to vector<16x1x128xf32>
    %31 = vector.shape_cast %26 : vector<16x128xf32> to vector<1x16x128xf32>
    %32 = vector.broadcast %30 : vector<16x1x128xf32> to vector<16x16x128xf32>
    %33 = vector.broadcast %31 : vector<1x16x128xf32> to vector<16x16x128xf32>
    %34 = arith.addf %32, %33 : vector<16x16x128xf32>
    %cst_28 = arith.constant 0.000000e+00 : f32
    %35 = vector.broadcast %cst_28 : f32 to vector<16x16x128xf32>
    %36 = arith.cmpf ogt, %34, %35 : vector<16x16x128xf32>
    %cst_29 = arith.constant 2.000000e-01 : f32
    %37 = vector.broadcast %cst_29 : f32 to vector<16x16x128xf32>
    %38 = arith.mulf %37, %34 : vector<16x16x128xf32>
    %39 = arith.select %36, %34, %38 : vector<16x16x128xi1>, vector<16x16x128xf32>
    %40 = vector.shape_cast %39 : vector<16x16x128xf32> to vector<256x128xf32>
    %cst_30 = arith.constant dense<0.000000e+00> : vector<256x8xf32>
    %41 = tpu.matmul %40, %23, %cst_30 {dimension_numbers = #tpu.dot_dimension_numbers<[1], [0], [0], [1], [0, 0, 1, 1], [], []>} : vector<256x128xf32>, vector<128x8xf32>, vector<256x8xf32> -> vector<256x8xf32>
    %42 = arith.addf %41, %1 : vector<256x8xf32>
    %43 = vector.shape_cast %42 : vector<256x8xf32> to vector<16x16x8xf32>
    %cst_31 = arith.constant dense<0xFF800000> : vector<16x8xf32>
    %44 = vector.multi_reduction <maximumf>, %43, %cst_31 [1] : vector<16x16x8xf32> to vector<16x8xf32>
    %45 = vector.shape_cast %44 : vector<16x8xf32> to vector<16x1x8xf32>
    %46 = vector.broadcast %45 : vector<16x1x8xf32> to vector<16x16x8xf32>
    %47 = arith.subf %43, %46 : vector<16x16x8xf32>
    %48 = math.exp %47 : vector<16x16x8xf32>
    %cst_32 = arith.constant dense<0.000000e+00> : vector<16x8xf32>
    %49 = vector.multi_reduction <add>, %48, %cst_32 [1] : vector<16x16x8xf32> to vector<16x8xf32>
    %50 = vector.shape_cast %49 : vector<16x8xf32> to vector<16x1x8xf32>
    %51 = tpu.reciprocal %50 {approx = true} : vector<16x1x8xf32> -> vector<16x1x8xf32>
    %52 = vector.broadcast %51 : vector<16x1x8xf32> to vector<16x16x8xf32>
    %53 = arith.mulf %48, %52 : vector<16x16x8xf32>
    %54 = vector.shape_cast %53 : vector<16x16x8xf32> to vector<256x8xf32>
    %cst_33 = arith.constant dense<0.000000e+00> : vector<256x128xf32>
    %55 = tpu.matmul %54, %15, %cst_33 {dimension_numbers = #tpu.dot_dimension_numbers<[1], [0], [0], [1], [0, 0, 1, 1], [], []>} : vector<256x8xf32>, vector<8x128xf32>, vector<256x128xf32> -> vector<256x128xf32>
    %56 = vector.shape_cast %55 : vector<256x128xf32> to vector<16x16x128xf32>
    %57 = vector.shape_cast %26 : vector<16x128xf32> to vector<1x16x128xf32>
    %58 = vector.broadcast %57 : vector<1x16x128xf32> to vector<16x16x128xf32>
    %59 = arith.mulf %56, %58 : vector<16x16x128xf32>
    %60 = vector.shape_cast %59 : vector<16x16x128xf32> to vector<256x128xf32>
    %cst_34 = arith.constant dense<0.000000e+00> : vector<16x128xf32>
    %61 = tpu.matmul %2, %60, %cst_34 {dimension_numbers = #tpu.dot_dimension_numbers<[1], [0], [0], [1], [0, 0, 1, 1], [], []>} : vector<16x256xf32>, vector<256x128xf32>, vector<16x128xf32> -> vector<16x128xf32>
    %62 = vector.broadcast %21 : vector<1x128xf32> to vector<16x128xf32>
    %63 = arith.addf %61, %62 : vector<16x128xf32>
    %cst_35 = arith.constant 0.000000e+00 : f32
    %64 = vector.broadcast %cst_35 : f32 to vector<16x128xf32>
    %65 = arith.cmpf ogt, %63, %64 : vector<16x128xf32>
    %cst_36 = arith.constant 0.000000e+00 : f32
    %66 = vector.broadcast %cst_36 : f32 to vector<16x128xf32>
    %67 = arith.minimumf %63, %66 : vector<16x128xf32>
    %68 = math.exp %67 : vector<16x128xf32>
    %cst_37 = arith.constant 1.000000e+00 : f32
    %69 = vector.broadcast %cst_37 : f32 to vector<16x128xf32>
    %70 = arith.subf %68, %69 : vector<16x128xf32>
    %71 = arith.select %65, %63, %70 : vector<16x128xi1>, vector<16x128xf32>
    %c2 = arith.constant 2 : index
    %c0_38 = arith.constant 0 : index
    %c0_39 = arith.constant 0 : index
    %72 = vector.load %arg3[%c2, %c0_38, %c0_39] : memref<7x128x128xf32, #tpu.memory_space<vmem>>, vector<1x128x128xf32>
    %73 = vector.shape_cast %72 : vector<1x128x128xf32> to vector<128x128xf32>
    %c3 = arith.constant 3 : index
    %c0_40 = arith.constant 0 : index
    %c0_41 = arith.constant 0 : index
    %74 = vector.load %arg3[%c3, %c0_40, %c0_41] : memref<7x128x128xf32, #tpu.memory_space<vmem>>, vector<1x128x128xf32>
    %75 = vector.shape_cast %74 : vector<1x128x128xf32> to vector<128x128xf32>
    %c1_42 = arith.constant 1 : index
    %c0_43 = arith.constant 0 : index
    %c0_44 = arith.constant 0 : index
    %76 = vector.load %arg4[%c1_42, %c0_43, %c0_44] : memref<3x16x128xf32, #tpu.memory_space<vmem>>, vector<1x8x128xf32>
    %77 = vector.shape_cast %76 : vector<1x8x128xf32> to vector<8x128xf32>
    %c1_45 = arith.constant 1 : index
    %c8_46 = arith.constant 8 : index
    %c0_47 = arith.constant 0 : index
    %78 = vector.load %arg4[%c1_45, %c8_46, %c0_47] : memref<3x16x128xf32, #tpu.memory_space<vmem>>, vector<1x1x128xf32>
    %79 = vector.shape_cast %78 : vector<1x1x128xf32> to vector<1x128xf32>
    %c1_48 = arith.constant 1 : index
    %c9_49 = arith.constant 9 : index
    %c0_50 = arith.constant 0 : index
    %80 = vector.load %arg4[%c1_48, %c9_49, %c0_50] : memref<3x16x128xf32, #tpu.memory_space<vmem>>, vector<1x1x128xf32>
    %81 = vector.shape_cast %80 : vector<1x1x128xf32> to vector<1x128xf32>
    %c1_51 = arith.constant 1 : index
    %c10_52 = arith.constant 10 : index
    %c0_53 = arith.constant 0 : index
    %82 = vector.load %arg4[%c1_51, %c10_52, %c0_53] : memref<3x16x128xf32, #tpu.memory_space<vmem>>, vector<1x1x128xf32>
    %83 = vector.shape_cast %82 : vector<1x1x128xf32> to vector<1x128xf32>
    %c1_54 = arith.constant 1 : index
    %c0_55 = arith.constant 0 : index
    %c0_56 = arith.constant 0 : index
    %84 = vector.load %arg5[%c1_54, %c0_55, %c0_56] : memref<3x128x8xf32, #tpu.memory_space<vmem>>, vector<1x128x8xf32>
    %85 = vector.shape_cast %84 : vector<1x128x8xf32> to vector<128x8xf32>
    %cst_57 = arith.constant dense<0.000000e+00> : vector<16x128xf32>
    %86 = tpu.matmul %71, %73, %cst_57 {dimension_numbers = #tpu.dot_dimension_numbers<[1], [0], [0], [1], [0, 0, 1, 1], [], []>} : vector<16x128xf32>, vector<128x128xf32>, vector<16x128xf32> -> vector<16x128xf32>
    %87 = vector.broadcast %79 : vector<1x128xf32> to vector<16x128xf32>
    %88 = arith.addf %86, %87 : vector<16x128xf32>
    %cst_58 = arith.constant dense<0.000000e+00> : vector<16x128xf32>
    %89 = tpu.matmul %71, %75, %cst_58 {dimension_numbers = #tpu.dot_dimension_numbers<[1], [0], [0], [1], [0, 0, 1, 1], [], []>} : vector<16x128xf32>, vector<128x128xf32>, vector<16x128xf32> -> vector<16x128xf32>
    %90 = vector.broadcast %81 : vector<1x128xf32> to vector<16x128xf32>
    %91 = arith.addf %89, %90 : vector<16x128xf32>
    %92 = vector.shape_cast %91 : vector<16x128xf32> to vector<16x1x128xf32>
    %93 = vector.shape_cast %88 : vector<16x128xf32> to vector<1x16x128xf32>
    %94 = vector.broadcast %92 : vector<16x1x128xf32> to vector<16x16x128xf32>
    %95 = vector.broadcast %93 : vector<1x16x128xf32> to vector<16x16x128xf32>
    %96 = arith.addf %94, %95 : vector<16x16x128xf32>
    %cst_59 = arith.constant 0.000000e+00 : f32
    %97 = vector.broadcast %cst_59 : f32 to vector<16x16x128xf32>
    %98 = arith.cmpf ogt, %96, %97 : vector<16x16x128xf32>
    %cst_60 = arith.constant 2.000000e-01 : f32
    %99 = vector.broadcast %cst_60 : f32 to vector<16x16x128xf32>
    %100 = arith.mulf %99, %96 : vector<16x16x128xf32>
    %101 = arith.select %98, %96, %100 : vector<16x16x128xi1>, vector<16x16x128xf32>
    %102 = vector.shape_cast %101 : vector<16x16x128xf32> to vector<256x128xf32>
    %cst_61 = arith.constant dense<0.000000e+00> : vector<256x8xf32>
    %103 = tpu.matmul %102, %85, %cst_61 {dimension_numbers = #tpu.dot_dimension_numbers<[1], [0], [0], [1], [0, 0, 1, 1], [], []>} : vector<256x128xf32>, vector<128x8xf32>, vector<256x8xf32> -> vector<256x8xf32>
    %104 = arith.addf %103, %1 : vector<256x8xf32>
    %105 = vector.shape_cast %104 : vector<256x8xf32> to vector<16x16x8xf32>
    %cst_62 = arith.constant dense<0xFF800000> : vector<16x8xf32>
    %106 = vector.multi_reduction <maximumf>, %105, %cst_62 [1] : vector<16x16x8xf32> to vector<16x8xf32>
    %107 = vector.shape_cast %106 : vector<16x8xf32> to vector<16x1x8xf32>
    %108 = vector.broadcast %107 : vector<16x1x8xf32> to vector<16x16x8xf32>
    %109 = arith.subf %105, %108 : vector<16x16x8xf32>
    %110 = math.exp %109 : vector<16x16x8xf32>
    %cst_63 = arith.constant dense<0.000000e+00> : vector<16x8xf32>
    %111 = vector.multi_reduction <add>, %110, %cst_63 [1] : vector<16x16x8xf32> to vector<16x8xf32>
    %112 = vector.shape_cast %111 : vector<16x8xf32> to vector<16x1x8xf32>
    %113 = tpu.reciprocal %112 {approx = true} : vector<16x1x8xf32> -> vector<16x1x8xf32>
    %114 = vector.broadcast %113 : vector<16x1x8xf32> to vector<16x16x8xf32>
    %115 = arith.mulf %110, %114 : vector<16x16x8xf32>
    %116 = vector.shape_cast %115 : vector<16x16x8xf32> to vector<256x8xf32>
    %cst_64 = arith.constant dense<0.000000e+00> : vector<256x128xf32>
    %117 = tpu.matmul %116, %77, %cst_64 {dimension_numbers = #tpu.dot_dimension_numbers<[1], [0], [0], [1], [0, 0, 1, 1], [], []>} : vector<256x8xf32>, vector<8x128xf32>, vector<256x128xf32> -> vector<256x128xf32>
    %118 = vector.shape_cast %117 : vector<256x128xf32> to vector<16x16x128xf32>
    %119 = vector.shape_cast %88 : vector<16x128xf32> to vector<1x16x128xf32>
    %120 = vector.broadcast %119 : vector<1x16x128xf32> to vector<16x16x128xf32>
    %121 = arith.mulf %118, %120 : vector<16x16x128xf32>
    %122 = vector.shape_cast %121 : vector<16x16x128xf32> to vector<256x128xf32>
    %cst_65 = arith.constant dense<0.000000e+00> : vector<16x128xf32>
    %123 = tpu.matmul %2, %122, %cst_65 {dimension_numbers = #tpu.dot_dimension_numbers<[1], [0], [0], [1], [0, 0, 1, 1], [], []>} : vector<16x256xf32>, vector<256x128xf32>, vector<16x128xf32> -> vector<16x128xf32>
    %124 = vector.broadcast %83 : vector<1x128xf32> to vector<16x128xf32>
    %125 = arith.addf %123, %124 : vector<16x128xf32>
    %cst_66 = arith.constant 0.000000e+00 : f32
    %126 = vector.broadcast %cst_66 : f32 to vector<16x128xf32>
    %127 = arith.cmpf ogt, %125, %126 : vector<16x128xf32>
    %cst_67 = arith.constant 0.000000e+00 : f32
    %128 = vector.broadcast %cst_67 : f32 to vector<16x128xf32>
    %129 = arith.minimumf %125, %128 : vector<16x128xf32>
    %130 = math.exp %129 : vector<16x128xf32>
    %cst_68 = arith.constant 1.000000e+00 : f32
    %131 = vector.broadcast %cst_68 : f32 to vector<16x128xf32>
    %132 = arith.subf %130, %131 : vector<16x128xf32>
    %133 = arith.select %127, %125, %132 : vector<16x128xi1>, vector<16x128xf32>
    %c4 = arith.constant 4 : index
    %c0_69 = arith.constant 0 : index
    %c0_70 = arith.constant 0 : index
    %134 = vector.load %arg3[%c4, %c0_69, %c0_70] : memref<7x128x128xf32, #tpu.memory_space<vmem>>, vector<1x128x128xf32>
    %135 = vector.shape_cast %134 : vector<1x128x128xf32> to vector<128x128xf32>
    %c5 = arith.constant 5 : index
    %c0_71 = arith.constant 0 : index
    %c0_72 = arith.constant 0 : index
    %136 = vector.load %arg3[%c5, %c0_71, %c0_72] : memref<7x128x128xf32, #tpu.memory_space<vmem>>, vector<1x128x128xf32>
    %137 = vector.shape_cast %136 : vector<1x128x128xf32> to vector<128x128xf32>
    %c2_73 = arith.constant 2 : index
    %c0_74 = arith.constant 0 : index
    %c0_75 = arith.constant 0 : index
    %138 = vector.load %arg4[%c2_73, %c0_74, %c0_75] : memref<3x16x128xf32, #tpu.memory_space<vmem>>, vector<1x8x128xf32>
    %139 = vector.shape_cast %138 : vector<1x8x128xf32> to vector<8x128xf32>
    %c2_76 = arith.constant 2 : index
    %c8_77 = arith.constant 8 : index
    %c0_78 = arith.constant 0 : index
    %140 = vector.load %arg4[%c2_76, %c8_77, %c0_78] : memref<3x16x128xf32, #tpu.memory_space<vmem>>, vector<1x1x128xf32>
    %141 = vector.shape_cast %140 : vector<1x1x128xf32> to vector<1x128xf32>
    %c2_79 = arith.constant 2 : index
    %c9_80 = arith.constant 9 : index
    %c0_81 = arith.constant 0 : index
    %142 = vector.load %arg4[%c2_79, %c9_80, %c0_81] : memref<3x16x128xf32, #tpu.memory_space<vmem>>, vector<1x1x128xf32>
    %143 = vector.shape_cast %142 : vector<1x1x128xf32> to vector<1x128xf32>
    %c2_82 = arith.constant 2 : index
    %c10_83 = arith.constant 10 : index
    %c0_84 = arith.constant 0 : index
    %144 = vector.load %arg4[%c2_82, %c10_83, %c0_84] : memref<3x16x128xf32, #tpu.memory_space<vmem>>, vector<1x1x128xf32>
    %145 = vector.shape_cast %144 : vector<1x1x128xf32> to vector<1x128xf32>
    %c2_85 = arith.constant 2 : index
    %c0_86 = arith.constant 0 : index
    %c0_87 = arith.constant 0 : index
    %146 = vector.load %arg5[%c2_85, %c0_86, %c0_87] : memref<3x128x8xf32, #tpu.memory_space<vmem>>, vector<1x128x8xf32>
    %147 = vector.shape_cast %146 : vector<1x128x8xf32> to vector<128x8xf32>
    %cst_88 = arith.constant dense<0.000000e+00> : vector<16x128xf32>
    %148 = tpu.matmul %133, %135, %cst_88 {dimension_numbers = #tpu.dot_dimension_numbers<[1], [0], [0], [1], [0, 0, 1, 1], [], []>} : vector<16x128xf32>, vector<128x128xf32>, vector<16x128xf32> -> vector<16x128xf32>
    %149 = vector.broadcast %141 : vector<1x128xf32> to vector<16x128xf32>
    %150 = arith.addf %148, %149 : vector<16x128xf32>
    %cst_89 = arith.constant dense<0.000000e+00> : vector<16x128xf32>
    %151 = tpu.matmul %133, %137, %cst_89 {dimension_numbers = #tpu.dot_dimension_numbers<[1], [0], [0], [1], [0, 0, 1, 1], [], []>} : vector<16x128xf32>, vector<128x128xf32>, vector<16x128xf32> -> vector<16x128xf32>
    %152 = vector.broadcast %143 : vector<1x128xf32> to vector<16x128xf32>
    %153 = arith.addf %151, %152 : vector<16x128xf32>
    %154 = vector.shape_cast %153 : vector<16x128xf32> to vector<16x1x128xf32>
    %155 = vector.shape_cast %150 : vector<16x128xf32> to vector<1x16x128xf32>
    %156 = vector.broadcast %154 : vector<16x1x128xf32> to vector<16x16x128xf32>
    %157 = vector.broadcast %155 : vector<1x16x128xf32> to vector<16x16x128xf32>
    %158 = arith.addf %156, %157 : vector<16x16x128xf32>
    %cst_90 = arith.constant 0.000000e+00 : f32
    %159 = vector.broadcast %cst_90 : f32 to vector<16x16x128xf32>
    %160 = arith.cmpf ogt, %158, %159 : vector<16x16x128xf32>
    %cst_91 = arith.constant 2.000000e-01 : f32
    %161 = vector.broadcast %cst_91 : f32 to vector<16x16x128xf32>
    %162 = arith.mulf %161, %158 : vector<16x16x128xf32>
    %163 = arith.select %160, %158, %162 : vector<16x16x128xi1>, vector<16x16x128xf32>
    %164 = vector.shape_cast %163 : vector<16x16x128xf32> to vector<256x128xf32>
    %cst_92 = arith.constant dense<0.000000e+00> : vector<256x8xf32>
    %165 = tpu.matmul %164, %147, %cst_92 {dimension_numbers = #tpu.dot_dimension_numbers<[1], [0], [0], [1], [0, 0, 1, 1], [], []>} : vector<256x128xf32>, vector<128x8xf32>, vector<256x8xf32> -> vector<256x8xf32>
    %166 = arith.addf %165, %1 : vector<256x8xf32>
    %167 = vector.shape_cast %166 : vector<256x8xf32> to vector<16x16x8xf32>
    %cst_93 = arith.constant dense<0xFF800000> : vector<16x8xf32>
    %168 = vector.multi_reduction <maximumf>, %167, %cst_93 [1] : vector<16x16x8xf32> to vector<16x8xf32>
    %169 = vector.shape_cast %168 : vector<16x8xf32> to vector<16x1x8xf32>
    %170 = vector.broadcast %169 : vector<16x1x8xf32> to vector<16x16x8xf32>
    %171 = arith.subf %167, %170 : vector<16x16x8xf32>
    %172 = math.exp %171 : vector<16x16x8xf32>
    %cst_94 = arith.constant dense<0.000000e+00> : vector<16x8xf32>
    %173 = vector.multi_reduction <add>, %172, %cst_94 [1] : vector<16x16x8xf32> to vector<16x8xf32>
    %174 = vector.shape_cast %173 : vector<16x8xf32> to vector<16x1x8xf32>
    %175 = tpu.reciprocal %174 {approx = true} : vector<16x1x8xf32> -> vector<16x1x8xf32>
    %176 = vector.broadcast %175 : vector<16x1x8xf32> to vector<16x16x8xf32>
    %177 = arith.mulf %172, %176 : vector<16x16x8xf32>
    %178 = vector.shape_cast %177 : vector<16x16x8xf32> to vector<256x8xf32>
    %cst_95 = arith.constant dense<0.000000e+00> : vector<256x128xf32>
    %179 = tpu.matmul %178, %139, %cst_95 {dimension_numbers = #tpu.dot_dimension_numbers<[1], [0], [0], [1], [0, 0, 1, 1], [], []>} : vector<256x8xf32>, vector<8x128xf32>, vector<256x128xf32> -> vector<256x128xf32>
    %180 = vector.shape_cast %179 : vector<256x128xf32> to vector<16x16x128xf32>
    %181 = vector.shape_cast %150 : vector<16x128xf32> to vector<1x16x128xf32>
    %182 = vector.broadcast %181 : vector<1x16x128xf32> to vector<16x16x128xf32>
    %183 = arith.mulf %180, %182 : vector<16x16x128xf32>
    %184 = vector.shape_cast %183 : vector<16x16x128xf32> to vector<256x128xf32>
    %cst_96 = arith.constant dense<0.000000e+00> : vector<16x128xf32>
    %185 = tpu.matmul %2, %184, %cst_96 {dimension_numbers = #tpu.dot_dimension_numbers<[1], [0], [0], [1], [0, 0, 1, 1], [], []>} : vector<16x256xf32>, vector<256x128xf32>, vector<16x128xf32> -> vector<16x128xf32>
    %186 = vector.broadcast %145 : vector<1x128xf32> to vector<16x128xf32>
    %187 = arith.addf %185, %186 : vector<16x128xf32>
    %cst_97 = arith.constant 0.000000e+00 : f32
    %188 = vector.broadcast %cst_97 : f32 to vector<16x128xf32>
    %189 = arith.cmpf ogt, %187, %188 : vector<16x128xf32>
    %cst_98 = arith.constant 0.000000e+00 : f32
    %190 = vector.broadcast %cst_98 : f32 to vector<16x128xf32>
    %191 = arith.minimumf %187, %190 : vector<16x128xf32>
    %192 = math.exp %191 : vector<16x128xf32>
    %cst_99 = arith.constant 1.000000e+00 : f32
    %193 = vector.broadcast %cst_99 : f32 to vector<16x128xf32>
    %194 = arith.subf %192, %193 : vector<16x128xf32>
    %195 = arith.select %189, %187, %194 : vector<16x128xi1>, vector<16x128xf32>
    %196 = arith.addf %195, %9 : vector<16x128xf32>
    %cst_100 = arith.constant 0.000000e+00 : f32
    %197 = vector.broadcast %cst_100 : f32 to vector<16x128xf32>
    %198 = arith.maximumf %196, %197 : vector<16x128xf32>
    %c0_101 = arith.constant 0 : index
    %c0_102 = arith.constant 0 : index
    %199 = vector.load %arg6[%c0_101, %c0_102] : memref<16x128xf32, #tpu.memory_space<vmem>>, vector<16x128xf32>
    tpu.vector_store %arg6[%c0_101, %c0_102], %198 {strides = array<i32>} : memref<16x128xf32, #tpu.memory_space<vmem>>, vector<16x128xf32>,
    return
  }
}

</mosaic_0001>

<bundles_post_ra>
// kernel: squeeze.30
= control target key start
LH: loop header
LB: loop body
LE: loop exit
PB: predicated region body
PF: predicated region fallthrough
CT: control target
= control target key end

     0   :  { %s37_s8 = smov 80   ;;  %vm7_vm0 = vcmask 130048   ;;  %s38_s9 = smov 96   ;;  %s55_s0 = inlined_call_operand.vmem [shape: f32[64], index: 0, kind: input, shape index: {}]   ;;  %s56_s1 = inlined_call_operand.vmem [shape: f32[4,16], index: 1, kind: output, shape index: {}]  }
   0x1   :  { %v4_v0 = vld [vmem:[%s55_s0] sm:$0x1]  ;;  %s36_s0 = smov 112  }
   0x2   :  { %5 = vst [vmem:[#allocation1] sm:$0x1] %v4_v0 }
   0x9   :  { %v9_v1 = vld [vmem:[#allocation1] sm:$0x1]  }
   0xa   :  { %v21_v2 = vld [vmem:[#allocation1] sm:$0x1]   ;;  %10 = vrot.lane.b32.xlu0 %v9_v1, %s36_s0 }
   0xb   :  { %22 = vrot.lane.b32.xlu1 %v21_v2, %s37_s8  ;;  %v6_v3 = vld [vmem:[#allocation1] sm:$0x1]  }
   0xc   :  { %v15_v4 = vld [vmem:[#allocation1] sm:$0x1]   ;;  %8 = vst.msk [vmem:[#allocation0] sm:$0x1] %vm7_vm0, %v6_v3  }
   0xe   :  { %16 = vrot.lane.b32.xlu0 %v15_v4, %s38_s9 }
  0x7c   :  { %v11_v5 = vpop.permute.xlu0 %10  }
  0x7d   :  { %v23_v6 = vpop.permute.xlu1 %22   ;;  %14 = vst.msk [vmem:[#allocation0 + $0x1] sm:$0x1] %vm7_vm0, %v11_v5  }
  0x7e   :  { %26 = vst.msk [vmem:[#allocation0 + $0x3] sm:$0x1] %vm7_vm0, %v23_v6  }
  0x80   :  { %v17_v7 = vpop.permute.xlu0 %16  }
  0x81   :  { %20 = vst.msk [vmem:[#allocation0 + $0x2] sm:$0x1] %vm7_vm0, %v17_v7  }
  0x88   :  { %v30_v8 = vld [vmem:[#allocation0] sm:$0xf] }
  0x89   :  { %32 = vst [vmem:[%s56_s1] sm:$0xf] %v30_v8 }

// kernel: squeeze.46
= control target key start
LH: loop header
LB: loop body
LE: loop exit
PB: predicated region body
PF: predicated region fallthrough
CT: control target
= control target key end

     0   :  { %s37_s8 = smov 32   ;;  %vm7_vm0 = vcmask 261120   ;;  %s38_s9 = smov 64   ;;  %s55_s0 = inlined_call_operand.vmem [shape: f32[128], index: 0, kind: input, shape index: {}]   ;;  %s56_s1 = inlined_call_operand.vmem [shape: f32[4,32], index: 1, kind: output, shape index: {}]  }
   0x1   :  { %v4_v0 = vld [vmem:[%s55_s0] sm:$0x1]  ;;  %s36_s0 = smov 96  }
   0x2   :  { %5 = vst [vmem:[#allocation1] sm:$0x1] %v4_v0 }
   0x9   :  { %v9_v1 = vld [vmem:[#allocation1] sm:$0x1]  }
   0xa   :  { %v21_v2 = vld [vmem:[#allocation1] sm:$0x1]   ;;  %10 = vrot.lane.b32.xlu0 %v9_v1, %s36_s0 }
   0xb   :  { %22 = vrot.lane.b32.xlu1 %v21_v2, %s37_s8  ;;  %v6_v3 = vld [vmem:[#allocation1] sm:$0x1]  }
   0xc   :  { %v15_v4 = vld [vmem:[#allocation1] sm:$0x1]   ;;  %8 = vst.msk [vmem:[#allocation0] sm:$0x1] %vm7_vm0, %v6_v3  }
   0xe   :  { %16 = vrot.lane.b32.xlu0 %v15_v4, %s38_s9 }
  0x7c   :  { %v11_v5 = vpop.permute.xlu0 %10  }
  0x7d   :  { %v23_v6 = vpop.permute.xlu1 %22   ;;  %14 = vst.msk [vmem:[#allocation0 + $0x1] sm:$0x1] %vm7_vm0, %v11_v5  }
  0x7e   :  { %26 = vst.msk [vmem:[#allocation0 + $0x3] sm:$0x1] %vm7_vm0, %v23_v6  }
  0x80   :  { %v17_v7 = vpop.permute.xlu0 %16  }
  0x81   :  { %20 = vst.msk [vmem:[#allocation0 + $0x2] sm:$0x1] %vm7_vm0, %v17_v7  }
  0x88   :  { %v30_v8 = vld [vmem:[#allocation0] sm:$0xf] }
  0x89   :  { %32 = vst [vmem:[%s56_s1] sm:$0xf] %v30_v8 }

// kernel: resgatv2_forward.1
= control target key start
LH: loop header
LB: loop body
LE: loop exit
PB: predicated region body
PF: predicated region fallthrough
CT: control target
= control target key end

     0   :  { %s9723_s0 = inlined_call_operand.vmem [shape: f32[16,128], index: 0, kind: input, shape index: {}]   ;;  %s9724_s1 = inlined_call_operand.vmem [shape: f32[256,8], index: 1, kind: input, shape index: {}]   ;;  %s9725_s2 = inlined_call_operand.vmem [shape: f32[16,256], index: 2, kind: input, shape index: {}]   ;;  %s9726_s3 = inlined_call_operand.vmem [shape: f32[7,128,128], index: 3, kind: input, shape index: {}]   ;;  %s9727_s4 = inlined_call_operand.vmem [shape: f32[3,16,128], index: 4, kind: input, shape index: {}]   ;;  %s9728_s5 = inlined_call_operand.vmem [shape: f32[3,128,8], index: 5, kind: input, shape index: {}]   ;;  %s9729_s6 = inlined_call_operand.hbm [shape: f32[16,128], index: 6, kind: output, shape index: {}]  }
   0x1   :  { %v5048_v0 = vld [vmem:[%s9726_s3 + $0x300] sm:$0xff]  ;;  %v5049_v1 = vld [vmem:[%s9726_s3 + $0x308] sm:$0xff]  ;;  %v5050_v2 = vld [vmem:[%s9726_s3 + $0x310] sm:$0xff] }
   0x2   :  { %v6414_v3 = vpack.c.bf16 %v5049_v1, %v5048_v0  ;;  %v5051_v4 = vld [vmem:[%s9726_s3 + $0x318] sm:$0xff]  ;;  %v5052_v6 = vld [vmem:[%s9726_s3 + $0x320] sm:$0xff]  ;;  %v5053_v7 = vld [vmem:[%s9726_s3 + $0x328] sm:$0xff] }
   0x3   :  { %v6418_v5 = vpack.c.bf16 %v5051_v4, %v5050_v2  ;;  %v6422_v8 = vpack.c.bf16 %v5053_v7, %v5052_v6  ;;  %v7289_v9 = vld [vmem:[%s9723_s0] sm:$0xff]  ;;  %v5054_v10 = vld [vmem:[%s9726_s3 + $0x330] sm:$0xff]  ;;  %v5055_v11 = vld [vmem:[%s9726_s3 + $0x338] sm:$0xff] }
   0x4   :  { %6415 = vmatprep.subr.bf16.mxu0 %v6414_v3  ;;  %5811 = vmatprep.mubr.f32.mxu0 %v7289_v9  ;;  %v159_v12 = vld [vmem:[%s9726_s3] sm:$0xff]  ;;  %v160_v13 = vld [vmem:[%s9726_s3 + $0x8] sm:$0xff]  ;;  %v161_v15 = vld [vmem:[%s9726_s3 + $0x10] sm:$0xff]  ;;  %v6426_v16 = vpack.c.bf16 %v5055_v11, %v5054_v10 }
   0x5   :  { %6417 = vmatpush3.bf16.msra.mxu0 %v6414_v3  ;;  %5846 = vmatprep.mubr.f32.mxu1 %v7289_v9  ;;  %v6446_v14 = vpack.c.bf16 %v160_v13, %v159_v12  ;;  %v5056_v17 = vld [vmem:[%s9726_s3 + $0x340] sm:$0xff]  ;;  %v162_v18 = vld [vmem:[%s9726_s3 + $0x18] sm:$0xff]  ;;  %v5057_v19 = vld [vmem:[%s9726_s3 + $0x348] sm:$0xff] }
   0x6   :  { %6419 = vmatprep.subr.bf16.mxu0 %v6418_v5  ;;  %v6450_v20 = vpack.c.bf16 %v162_v18, %v161_v15  ;;  %v163_v21 = vld [vmem:[%s9726_s3 + $0x20] sm:$0xff]  ;;  %v164_v22 = vld [vmem:[%s9726_s3 + $0x28] sm:$0xff]  ;;  %v6430_v24 = vpack.c.bf16 %v5057_v19, %v5056_v17  ;;  %v165_v25 = vld [vmem:[%s9726_s3 + $0x30] sm:$0xff] }
   0x7   :  { %6447 = vmatprep.subr.bf16.mxu1 %v6446_v14  ;;  %v6454_v23 = vpack.c.bf16 %v164_v22, %v163_v21  ;;  %v166_v26 = vld [vmem:[%s9726_s3 + $0x38] sm:$0xff]  ;;  %v5058_v27 = vld [vmem:[%s9726_s3 + $0x350] sm:$0xff] }
   0x8   :  { %6449 = vmatpush3.bf16.msra.mxu1 %v6446_v14  ;;  %v5059_v28 = vld [vmem:[%s9726_s3 + $0x358] sm:$0xff]  ;;  %v6458_v29 = vpack.c.bf16 %v166_v26, %v165_v25 }
   0x9   :  { %6421 = vmatpush3.bf16.msra.mxu0 %v6418_v5  ;;  %6451 = vmatprep.subr.bf16.mxu1 %v6450_v20 }
   0xa   :  { %6423 = vmatprep.subr.bf16.mxu0 %v6422_v8 }
   0xc   :  { %6453 = vmatpush3.bf16.msra.mxu1 %v6450_v20 }
   0xd   :  { %6425 = vmatpush3.bf16.msra.mxu0 %v6422_v8  ;;  %6455 = vmatprep.subr.bf16.mxu1 %v6454_v23 }
   0xe   :  { %6427 = vmatprep.subr.bf16.mxu0 %v6426_v16 }
  0x11   :  { %6429 = vmatpush3.bf16.msra.mxu0 %v6426_v16 }
  0x12   :  { %11 = vsyncpa [#allocation3], 0  ;;  %6431 = vmatprep.subr.bf16.mxu0 %v6430_v24  ;;  %v6434_v30 = vpack.c.bf16 %v5059_v28, %v5058_v27  ;;  %v167_v31 = vld [vmem:[%s9726_s3 + $0x40] sm:$0xff]  ;;  %v168_v32 = vld [vmem:[%s9726_s3 + $0x48] sm:$0xff]  ;;  %6457 = vmatpush3.bf16.msra.mxu1 %v6454_v23  ;;  %s7230_s28 = smov [#allocation2]  }
  0x13   :  { %v5060_v33 = vld [vmem:[%s9726_s3 + $0x360] sm:$0xff]  ;;  %v5061_v34 = vld [vmem:[%s9726_s3 + $0x368] sm:$0xff]  ;;  %6459 = vmatprep.subr.bf16.mxu1 %v6458_v29  ;;  %v6462_v35 = vpack.c.bf16 %v168_v32, %v167_v31  ;;  %v169_v37 = vld [vmem:[%s9726_s3 + $0x50] sm:$0xff] }
  0x14   :  { %v6438_v36 = vpack.c.bf16 %v5061_v34, %v5060_v33  ;;  %v170_v38 = vld [vmem:[%s9726_s3 + $0x58] sm:$0xff]  ;;  %v5062_v39 = vld [vmem:[%s9726_s3 + $0x370] sm:$0xff]  ;;  %v171_v43 = vld [vmem:[%s9726_s3 + $0x60] sm:$0xff] }
  0x15   :  { %6433 = vmatpush3.bf16.msra.mxu0 %v6430_v24  ;;  %v5063_v40 = vld [vmem:[%s9726_s3 + $0x378] sm:$0xff]  ;;  %v6466_v41 = vpack.c.bf16 %v170_v38, %v169_v37  ;;  %v172_v44 = vld [vmem:[%s9726_s3 + $0x68] sm:$0xff]  ;;  %v5065_v45 = vld [vmem:[%s9726_s3 + $0x80] sm:$0xff]  ;;  %v7229_v38 = vmov 1966171168  }
  0x16   :  { %6435 = vmatprep.subr.bf16.mxu0 %v6434_v30  ;;  %6461 = vmatpush3.bf16.msra.mxu1 %v6458_v29  ;;  %v6442_v42 = vpack.c.bf16 %v5063_v40, %v5062_v39  ;;  %v5066_v46 = vld [vmem:[%s9726_s3 + $0x88] sm:$0xff]  ;;  %v6470_v47 = vpack.c.bf16 %v172_v44, %v171_v43  ;;  %v5067_v49 = vld [vmem:[%s9726_s3 + $0x90] sm:$0xff]  ;;  %v5068_v50 = vld [vmem:[%s9726_s3 + $0x98] sm:$0xff]  ;;  %v374_v39 = vunpack.c.l.s4 %v7229_v38  ;;  %v376_v40 = vlaneseq }
  0x17   :  { %6463 = vmatprep.subr.bf16.mxu1 %v6462_v35  ;;  %v6478_v48 = vpack.c.bf16 %v5066_v46, %v5065_v45  ;;  %v173_v51 = vld [vmem:[%s9726_s3 + $0x70] sm:$0xff]  ;;  %v174_v52 = vld [vmem:[%s9726_s3 + $0x78] sm:$0xff]  ;;  %v25_v53 = vld [vmem:[%s9723_s0 + $0x8] sm:$0xff]  ;;  %v6482_v54 = vpack.c.bf16 %v5068_v50, %v5067_v49  ;;  %s5037_s0 = sshll.u32 %s7230_s28, 4  ;;  %s5038_s0 = int_to_ptr.vmem [resolvable:$true] %s5037_s0 }
  0x18   :  { %v6474_v55 = vpack.c.bf16 %v174_v52, %v173_v51  ;;  %v5069_v56 = vld [vmem:[%s9726_s3 + $0xa0] sm:$0xff]  ;;  %v5070_v57 = vld [vmem:[%s9726_s3 + $0xa8] sm:$0xff]  ;;  %v5071_v59 = vld [vmem:[%s9726_s3 + $0xb0] sm:$0xff]  ;;  %p7210_p1 = scmp.lt.s32.totalorder %s5038_s0, %s5038_s0 }
  0x19   :  { %6437 = vmatpush3.bf16.msra.mxu0 %v6434_v30  ;;  %v6486_v58 = vpack.c.bf16 %v5070_v57, %v5069_v56  ;;  %v5072_v60 = vld [vmem:[%s9726_s3 + $0xb8] sm:$0xff]  ;;  %v5073_v62 = vld [vmem:[%s9726_s3 + $0xc0] sm:$0xff]  ;;  %v5074_v63 = vld [vmem:[%s9726_s3 + $0xc8] sm:$0xff] }
  0x1a   :  { %6439 = vmatprep.subr.bf16.mxu0 %v6438_v36  ;;  %6465 = vmatpush3.bf16.msra.mxu1 %v6462_v35  ;;  %v6490_v61 = vpack.c.bf16 %v5072_v60, %v5071_v59  ;;  %v6494_v0 = vpack.c.bf16 %v5074_v63, %v5073_v62  ;;  %v5075_v1 = vld [vmem:[%s9726_s3 + $0xd0] sm:$0xff]  ;;  %v5076_v2 = vld [vmem:[%s9726_s3 + $0xd8] sm:$0xff]  ;;  %v5077_v4 = vld [vmem:[%s9726_s3 + $0xe0] sm:$0xff] }
  0x1b   :  { %6467 = vmatprep.subr.bf16.mxu1 %v6466_v41  ;;  %v6498_v3 = vpack.c.bf16 %v5076_v2, %v5075_v1  ;;  %v5078_v5 = vld [vmem:[%s9726_s3 + $0xe8] sm:$0xff]  ;;  %v5079_v7 = vld [vmem:[%s9726_s3 + $0xf0] sm:$0xff]  ;;  %v5080_v8 = vld [vmem:[%s9726_s3 + $0xf8] sm:$0xff] }
  0x1c   :  { %v6502_v6 = vpack.c.bf16 %v5078_v5, %v5077_v4  ;;  %v196_v10 = vld [vmem:[%s9728_s5] sm:$0xff]  ;;  %v197_v11 = vld [vmem:[%s9728_s5 + $0x8] sm:$0xff]  ;;  %v198_v12 = vld [vmem:[%s9728_s5 + $0x10] sm:$0xff] }
  0x1d   :  { %6441 = vmatpush3.bf16.msra.mxu0 %v6438_v36  ;;  %v6510_v13 = vpack.c.bf16 %v197_v11, %v196_v10  ;;  %v199_v14 = vld [vmem:[%s9728_s5 + $0x18] sm:$0xff]  ;;  %v200_v16 = vld [vmem:[%s9728_s5 + $0x20] sm:$0xff]  ;;  %v201_v17 = vld [vmem:[%s9728_s5 + $0x28] sm:$0xff] }
  0x1e   :  { %6443 = vmatprep.subr.bf16.mxu0 %v6442_v42  ;;  %6469 = vmatpush3.bf16.msra.mxu1 %v6466_v41  ;;  %v6514_v15 = vpack.c.bf16 %v199_v14, %v198_v12  ;;  %v6518_v18 = vpack.c.bf16 %v201_v17, %v200_v16  ;;  %v202_v19 = vld [vmem:[%s9728_s5 + $0x30] sm:$0xff]  ;;  %v203_v20 = vld [vmem:[%s9728_s5 + $0x38] sm:$0xff]  ;;  %v204_v22 = vld [vmem:[%s9728_s5 + $0x40] sm:$0xff]  ;;  %v375_v41 = vunpack.c.0.s8 %v374_v39 }
  0x1f   :  { %6471 = vmatprep.subr.bf16.mxu1 %v6470_v47  ;;  %v6522_v21 = vpack.c.bf16 %v203_v20, %v202_v19  ;;  %v205_v23 = vld [vmem:[%s9728_s5 + $0x48] sm:$0xff]  ;;  %v206_v25 = vld [vmem:[%s9728_s5 + $0x50] sm:$0xff]  ;;  %v207_v26 = vld [vmem:[%s9728_s5 + $0x58] sm:$0xff] }
  0x20   :  { %v6526_v24 = vpack.c.bf16 %v205_v23, %v204_v22  ;;  %v6530_v27 = vpack.c.bf16 %v207_v26, %v206_v25  ;;  %v208_v28 = vld [vmem:[%s9728_s5 + $0x60] sm:$0xff]  ;;  %v209_v29 = vld [vmem:[%s9728_s5 + $0x68] sm:$0xff]  ;;  %v210_v31 = vld [vmem:[%s9728_s5 + $0x70] sm:$0xff] }
  0x21   :  { %6445 = vmatpush3.bf16.msra.mxu0 %v6442_v42  ;;  %v6534_v30 = vpack.c.bf16 %v209_v29, %v208_v28  ;;  %v211_v32 = vld [vmem:[%s9728_s5 + $0x78] sm:$0xff]  ;;  %v377_v42 = vshrl.u32 %v376_v40, 7  ;;  %v5082_v43 = vld [vmem:[%s9727_s4 + $0x9] ss:$0 sm:$0xff]  ;;  %v5081_v50 = vld [vmem:[%s9727_s4 + $0x8] ss:$0 sm:$0xff] }
  0x22   :  { %6479 = vmatprep.subr.bf16.mxu0 %v6478_v48  ;;  %6473 = vmatpush3.bf16.msra.mxu1 %v6470_v47  ;;  %v6538_v33 = vpack.c.bf16 %v211_v32, %v210_v31 }
  0x23   :  { %6475 = vmatprep.subr.bf16.mxu1 %v6474_v55  ;;  %v7478_v45 = vsub.s32 %v375_v41, %v377_v42  ;;  %v7484_v51 = vsub.s32 0, %v377_v42 }
  0x24   :  { %5812 = vmatmul.mubr.f32.vlgmr.msra.gmra.mrb[0].mxu0 %v25_v53 }
  0x25   :  { %6481 = vmatpush3.bf16.msra.mxu0 %v6478_v48  ;;  %5881 = vmatprep.mubr.f32.mxu0 %v7289_v9  ;;  %v6506_v9 = vpack.c.bf16 %v5080_v8, %v5079_v7  ;;  %9748 = vst [vmem:[#allocation7_spill] sm:$0xff] %v7478_v45  ;;  %9749 = vst [vmem:[#allocation8_spill] sm:$0xff] %v7484_v51 }
  0x26   :  { %6483 = vmatprep.subr.bf16.mxu0 %v6482_v54  ;;  %6477 = vmatpush3.bf16.msra.mxu1 %v6474_v55 }
  0x27   :  { %6511 = vmatprep.subr.bf16.mxu1 %v6510_v13 }
  0x29   :  { %6485 = vmatpush3.bf16.msra.mxu0 %v6482_v54  ;;  %5847 = vmatmul.mubr.f32.vlgmr.msra.gmra.mrb[0].mxu1 %v25_v53 }
  0x2a   :  { %6487 = vmatprep.subr.bf16.mxu0 %v6486_v58  ;;  %6513 = vmatpush3.bf16.msra.mxu1 %v6510_v13 }
  0x2b   :  { %6515 = vmatprep.subr.bf16.mxu1 %v6514_v15 }
  0x2d   :  { %6489 = vmatpush3.bf16.msra.mxu0 %v6486_v58 }
  0x2e   :  { %6491 = vmatprep.subr.bf16.mxu0 %v6490_v61  ;;  %6517 = vmatpush3.bf16.msra.mxu1 %v6514_v15 }
  0x2f   :  { %6519 = vmatprep.subr.bf16.mxu1 %v6518_v18 }
  0x31   :  { %6493 = vmatpush3.bf16.msra.mxu0 %v6490_v61 }
  0x32   :  { %6495 = vmatprep.subr.bf16.mxu0 %v6494_v0  ;;  %6521 = vmatpush3.bf16.msra.mxu1 %v6518_v18 }
  0x33   :  { %6523 = vmatprep.subr.bf16.mxu1 %v6522_v21 }
  0x35   :  { %6497 = vmatpush3.bf16.msra.mxu0 %v6494_v0 }
  0x36   :  { %6499 = vmatprep.subr.bf16.mxu0 %v6498_v3  ;;  %6525 = vmatpush3.bf16.msra.mxu1 %v6522_v21 }
  0x37   :  { %6527 = vmatprep.subr.bf16.mxu1 %v6526_v24 }
  0x39   :  { %6501 = vmatpush3.bf16.msra.mxu0 %v6498_v3 }
  0x3a   :  { %6503 = vmatprep.subr.bf16.mxu0 %v6502_v6  ;;  %6529 = vmatpush3.bf16.msra.mxu1 %v6526_v24 }
  0x3b   :  { %6531 = vmatprep.subr.bf16.mxu1 %v6530_v27 }
  0x3d   :  { %6505 = vmatpush3.bf16.msra.mxu0 %v6502_v6 }
  0x3e   :  { %6507 = vmatprep.subr.bf16.mxu0 %v6506_v9  ;;  %6533 = vmatpush3.bf16.msra.mxu1 %v6530_v27 }
  0x3f   :  { %6535 = vmatprep.subr.bf16.mxu1 %v6534_v30 }
  0x41   :  { %6509 = vmatpush3.bf16.msra.mxu0 %v6506_v9 }
  0x42   :  { %6537 = vmatpush3.bf16.msra.mxu1 %v6534_v30 }
  0x43   :  { %6539 = vmatprep.subr.bf16.mxu1 %v6538_v33 }
  0x44   :  { %5882 = vmatmul.mubr.f32.vlgmr.msra.gmra.mrb[2].mxu0 %v25_v53 }
  0x46   :  { %6541 = vmatpush3.bf16.msra.mxu1 %v6538_v33 }
  0xf7   :  { %v7471_v34 = vpop.f32.mrb[0].mxu0 }
  0xf8   :  { %9746 = vst [vmem:[#allocation5_spill] sm:$0xff] %v7471_v34  ;;  %v7473_v35 = vpop.f32.mrb[1].mxu0 }
  0xf9   :  { %9747 = vst [vmem:[#allocation6_spill] sm:$0xff] %v7473_v35 }
  0xfc   :  { %v5848_v36 = vpop.f32.mrb[0].mxu1 }
  0xfd   :  { %v282_v37 = vpop.f32.mrb[1].mxu1  ;;  %v7489_v56 = vadd.f32 %v5848_v36, %v5081_v50 }
  0xfe   :  { %v7491_v57 = vadd.f32 %v5081_v50, %v282_v37 }
 0x100   :  { %9750 = vst [vmem:[#allocation9_spill] sm:$0xff] %v7491_v57 }
 0x117   :  { %v5883_v44 = vpop.f32.mrb[2].mxu0 }
 0x118   :  { %v361_v46 = vpop.f32.mrb[3].mxu0  ;;  %v7507_v19 = vadd.f32 %v5883_v44, %v5082_v43 }
 0x119   :  { %v362_v47 = vadd.f32 %v5082_v43, %v361_v46 }
 0x11a   :  { %v428_v28 = vrot.slane %v7507_v19, %v7478_v45 }
 0x11b   :  { %v372_v48 = vcombine.high %v362_v47, %v362_v47  ;;  %v379_v49 = vrot.slane %v362_v47, %v7478_v45 }
 0x11c   :  { %v436_v39 = vcombine.high %v428_v28, %v428_v28  ;;  %v444_v40 = vrot.slane %v428_v28, %v7478_v45 }
 0x11d   :  { %v387_v52 = vcombine.high %v379_v49, %v379_v49  ;;  %v395_v53 = vrot.slane %v379_v49, %v7478_v45  ;;  %v386_v54 = vrot.slane %v372_v48, %v7478_v45 }
 0x11e   :  { %v505_v49 = vrot.slane %v444_v40, %v7484_v51  ;;  %v458_v50 = vrot.slane %v436_v39, %v7478_v45 }
 0x11f   :  { %v409_v55 = vrot.slane %v387_v52, %v7478_v45  ;;  %v417_v58 = vcombine.high %v395_v53, %v395_v53  ;;  %v473_v60 = vrot.slane %v395_v53, %v7484_v51  ;;  %v388_v63 = vcombine.high %v386_v54, %v386_v54 }
 0x120   :  { %v402_v0 = vrot.slane %v386_v54, %v7478_v45 }
 0x121   :  { %v419_v59 = vcombine.high %v409_v55, %v409_v55  ;;  %v477_v61 = vrot.slane %v409_v55, %v7484_v51  ;;  %v481_v62 = vrot.slane %v417_v58, %v7484_v51  ;;  %v550_v1 = vadd.f32 %v473_v60, %v7491_v57 }
 0x122   :  { %v551_v2 = vadd.f32 %v473_v60, %v7489_v56  ;;  %v416_v13 = vrot.slane %v388_v63, %v7478_v45  ;;  %v489_v18 = vrot.slane %v402_v0, %v7484_v51  ;;  %v418_v24 = vcombine.high %v402_v0, %v402_v0 }
 0x123   :  { %v552_v3 = vadd.f32 %v477_v61, %v7491_v57  ;;  %v553_v4 = vadd.f32 %v477_v61, %v7489_v56  ;;  %v554_v5 = vadd.f32 %v481_v62, %v7491_v57  ;;  %v485_v6 = vrot.slane %v419_v59, %v7484_v51 }
 0x124   :  { %vm582_vm0 = vcmp.gt.f32.partialorder %v550_v1, 0.0  ;;  %v614_v7 = vmul.f32 0.2, %v550_v1  ;;  %vm583_vm1 = vcmp.gt.f32.partialorder %v551_v2, 0.0  ;;  %v615_v8 = vmul.f32 0.2, %v551_v2 }
 0x125   :  { %vm584_vm2 = vcmp.gt.f32.partialorder %v552_v3, 0.0  ;;  %v616_v9 = vmul.f32 0.2, %v552_v3  ;;  %v555_v12 = vadd.f32 %v481_v62, %v7489_v56  ;;  %v617_v15 = vmul.f32 0.2, %v553_v4 }
 0x126   :  { %v646_v10 = vsel %vm582_vm0, %v550_v1, %v614_v7  ;;  %v647_v11 = vsel %vm583_vm1, %v551_v2, %v615_v8  ;;  %vm585_vm3 = vcmp.gt.f32.partialorder %v553_v4, 0.0  ;;  %v618_v16 = vmul.f32 0.2, %v554_v5 }
 0x127   :  { %5916 = vmatprep.mubr.f32.mxu1 %v646_v10  ;;  %v648_v14 = vsel %vm584_vm2, %v552_v3, %v616_v9  ;;  %v556_v17 = vadd.f32 %v485_v6, %v7491_v57  ;;  %vm586_vm4 = vcmp.gt.f32.partialorder %v554_v5, 0.0  ;;  %v619_v20 = vmul.f32 0.2, %v555_v12 }
 0x128   :  { %5917 = vmatmul.mubr.f32.vlgmr.msra.gmra.mrb[2].mxu1 %v647_v11  ;;  %v649_v21 = vsel %vm585_vm3, %v553_v4, %v617_v15  ;;  %vm587_vm5 = vcmp.gt.f32.partialorder %v555_v12, 0.0  ;;  %v557_v22 = vadd.f32 %v485_v6, %v7489_v56  ;;  %v493_v23 = vrot.slane %v416_v13, %v7484_v51 }
 0x129   :  { %5919 = vmatprep.mubr.f32.mxu1 %v648_v14  ;;  %v650_v25 = vsel %vm586_vm4, %v554_v5, %v618_v16  ;;  %v620_v26 = vmul.f32 0.2, %v556_v17  ;;  %v558_v27 = vadd.f32 %v489_v18, %v7491_v57  ;;  %vm588_vm6 = vcmp.gt.f32.partialorder %v556_v17, 0.0 }
 0x12a   :  { %v651_v29 = vsel %vm587_vm5, %v555_v12, %v619_v20  ;;  %vm589_vm7 = vcmp.gt.f32.partialorder %v557_v22, 0.0  ;;  %v621_v30 = vmul.f32 0.2, %v557_v22  ;;  %v559_v31 = vadd.f32 %v489_v18, %v7489_v56 }
 0x12b   :  { %v560_v32 = vadd.f32 %v493_v23, %v7491_v57  ;;  %v652_v33 = vsel %vm588_vm6, %v556_v17, %v620_v26  ;;  %v622_v36 = vmul.f32 0.2, %v558_v27  ;;  %v497_v37 = vrot.slane %v418_v24, %v7484_v51 }
 0x12c   :  { %5920 = vmatmul.mubr.f32.gmra.mrb[4].mxu1 %v649_v21  ;;  %v420_v38 = vcombine.high %v416_v13, %v416_v13  ;;  %vm590_vm8 = vcmp.gt.f32.partialorder %v558_v27, 0.0  ;;  %v653_v41 = vsel %vm589_vm7, %v557_v22, %v621_v30  ;;  %vm591_vm9 = vcmp.gt.f32.partialorder %v559_v31, 0.0 }
 0x12d   :  { %5922 = vmatprep.mubr.f32.mxu1 %v650_v25  ;;  %v623_v42 = vmul.f32 0.2, %v559_v31  ;;  %v561_v43 = vadd.f32 %v493_v23, %v7489_v56  ;;  %v654_v44 = vsel %vm590_vm8, %v558_v27, %v622_v36  ;;  %v624_v46 = vmul.f32 0.2, %v560_v32 }
 0x12e   :  { %v562_v47 = vadd.f32 %v497_v37, %v7491_v57  ;;  %v501_v48 = vrot.slane %v420_v38, %v7484_v51  ;;  %vm592_vm10 = vcmp.gt.f32.partialorder %v560_v32, 0.0  ;;  %v563_v54 = vadd.f32 %v497_v37, %v7489_v56 }
 0x12f   :  { %v655_v52 = vsel %vm591_vm9, %v559_v31, %v623_v42  ;;  %v625_v53 = vmul.f32 0.2, %v561_v43  ;;  %v656_v55 = vsel %vm592_vm10, %v560_v32, %v624_v46  ;;  %vm593_vm11 = vcmp.gt.f32.partialorder %v561_v43, 0.0 }
 0x130   :  { %5923 = vmatmul.mubr.f32.gmra.mrb[6].mxu1 %v651_v29  ;;  %v626_v58 = vmul.f32 0.2, %v562_v47  ;;  %v564_v59 = vadd.f32 %v501_v48, %v7491_v57  ;;  %vm594_vm12 = vcmp.gt.f32.partialorder %v562_v47, 0.0  ;;  %v421_v60 = vcombine.high %v7507_v19, %v7507_v19 }
 0x131   :  { %5925 = vmatprep.mubr.f32.mxu1 %v652_v33  ;;  %v566_v61 = vadd.f32 %v505_v49, %v7491_v57  ;;  %v466_v62 = vcombine.high %v444_v40, %v444_v40  ;;  %v657_v63 = vsel %vm593_vm11, %v561_v43, %v625_v53  ;;  %v627_v0 = vmul.f32 0.2, %v563_v54 }
 0x132   :  { %v565_v1 = vadd.f32 %v501_v48, %v7489_v56  ;;  %v658_v2 = vsel %vm594_vm12, %v562_v47, %v626_v58  ;;  %vm595_vm13 = vcmp.gt.f32.partialorder %v563_v54, 0.0  ;;  %v628_v3 = vmul.f32 0.2, %v564_v59 }
 0x133   :  { %v509_v4 = vrot.slane %v458_v50, %v7484_v51  ;;  %vm596_vm14 = vcmp.gt.f32.partialorder %v564_v59, 0.0  ;;  %v435_v5 = vrot.slane %v421_v60, %v7478_v45  ;;  %v468_v6 = vcombine.high %v458_v50, %v458_v50 }
 0x134   :  { %5926 = vmatmul.mubr.f32.gmra.mrb[8].mxu1 %v653_v41  ;;  %vm598_vm15 = vcmp.gt.f32.partialorder %v566_v61, 0.0  ;;  %v659_v7 = vsel %vm595_vm13, %v563_v54, %v627_v0  ;;  %v629_v8 = vmul.f32 0.2, %v565_v1  ;;  %v630_v9 = vmul.f32 0.2, %v566_v61 }
 0x135   :  { %5928 = vmatprep.mubr.f32.mxu1 %v654_v44  ;;  %v567_v10 = vadd.f32 %v505_v49, %v7489_v56  ;;  %v660_v11 = vsel %vm596_vm14, %v564_v59, %v628_v3  ;;  %vm597_vm0 = vcmp.gt.f32.partialorder %v565_v1, 0.0  ;;  %v568_v12 = vadd.f32 %v509_v4, %v7491_v57 }
 0x136   :  { %v513_v13 = vrot.slane %v466_v62, %v7484_v51  ;;  %v437_v14 = vcombine.high %v435_v5, %v435_v5  ;;  %v451_v15 = vrot.slane %v435_v5, %v7478_v45  ;;  %v661_v16 = vsel %vm597_vm0, %v565_v1, %v629_v8 }
 0x137   :  { %v662_v17 = vsel %vm598_vm15, %v566_v61, %v630_v9  ;;  %v631_v18 = vmul.f32 0.2, %v567_v10  ;;  %v569_v19 = vadd.f32 %v509_v4, %v7489_v56  ;;  %vm599_vm1 = vcmp.gt.f32.partialorder %v567_v10, 0.0 }
 0x138   :  { %5929 = vmatmul.mubr.f32.gmra.mrb[10].mxu1 %v655_v52  ;;  %v632_v20 = vmul.f32 0.2, %v568_v12  ;;  %v570_v21 = vadd.f32 %v513_v13, %v7491_v57  ;;  %v517_v22 = vrot.slane %v468_v6, %v7484_v51  ;;  %vm600_vm2 = vcmp.gt.f32.partialorder %v568_v12, 0.0 }
 0x139   :  { %5931 = vmatprep.mubr.f32.mxu1 %v656_v55  ;;  %v465_v23 = vrot.slane %v437_v14, %v7478_v45  ;;  %v663_v24 = vsel %vm599_vm1, %v567_v10, %v631_v18  ;;  %v633_v25 = vmul.f32 0.2, %v569_v19  ;;  %v571_v26 = vadd.f32 %v513_v13, %v7489_v56  ;;  %v26_v13 = vld [vmem:[%s9724_s1] sm:$0xff]  ;;  %v29_v18 = vld [vmem:[%s9724_s1 + $0x18] sm:$0xff] }
 0x13a   :  { %v521_v27 = vrot.slane %v451_v15, %v7484_v51  ;;  %v664_v28 = vsel %vm600_vm2, %v568_v12, %v632_v20  ;;  %vm601_vm3 = vcmp.gt.f32.partialorder %v569_v19, 0.0  ;;  %v634_v29 = vmul.f32 0.2, %v570_v21  ;;  %v27_v12 = vld [vmem:[%s9724_s1 + $0x8] sm:$0xff]  ;;  %v28_v20 = vld [vmem:[%s9724_s1 + $0x10] sm:$0xff] }
 0x13b   :  { %v572_v30 = vadd.f32 %v517_v22, %v7491_v57  ;;  %vm602_vm4 = vcmp.gt.f32.partialorder %v570_v21, 0.0  ;;  %v467_v31 = vcombine.high %v451_v15, %v451_v15  ;;  %v665_v32 = vsel %vm601_vm3, %v569_v19, %v633_v25 }
 0x13c   :  { %5932 = vmatmul.mubr.f32.gmra.mrb[12].mxu1 %v657_v63  ;;  %v635_v33 = vmul.f32 0.2, %v571_v26  ;;  %v573_v36 = vadd.f32 %v517_v22, %v7489_v56  ;;  %v574_v37 = vadd.f32 %v521_v27, %v7491_v57  ;;  %v666_v38 = vsel %vm602_vm4, %v570_v21, %v634_v29 }
 0x13d   :  { %5934 = vmatprep.mubr.f32.mxu1 %v658_v2  ;;  %vm603_vm5 = vcmp.gt.f32.partialorder %v571_v26, 0.0  ;;  %v636_v39 = vmul.f32 0.2, %v572_v30  ;;  %v525_v40 = vrot.slane %v465_v23, %v7484_v51  ;;  %vm604_vm6 = vcmp.gt.f32.partialorder %v572_v30, 0.0 }
 0x13e   :  { %v575_v41 = vadd.f32 %v521_v27, %v7489_v56  ;;  %v667_v42 = vsel %vm603_vm5, %v571_v26, %v635_v33  ;;  %vm605_vm7 = vcmp.gt.f32.partialorder %v573_v36, 0.0  ;;  %v637_v43 = vmul.f32 0.2, %v573_v36  ;;  %v31_v27 = vld [vmem:[%s9724_s1 + $0x28] sm:$0xff] }
 0x13f   :  { %v638_v44 = vmul.f32 0.2, %v574_v37  ;;  %v668_v46 = vsel %vm604_vm6, %v572_v30, %v636_v39  ;;  %v576_v47 = vadd.f32 %v525_v40, %v7491_v57  ;;  %v529_v48 = vrot.slane %v467_v31, %v7484_v51  ;;  %v30_v30 = vld [vmem:[%s9724_s1 + $0x20] sm:$0xff] }
 0x140   :  { %5935 = vmatmul.mubr.f32.gmra.mrb[14].mxu1 %v659_v7  ;;  %v469_v49 = vcombine.high %v465_v23, %v465_v23  ;;  %vm606_vm8 = vcmp.gt.f32.partialorder %v574_v37, 0.0  ;;  %v669_v50 = vsel %vm605_vm7, %v573_v36, %v637_v43  ;;  %vm607_vm9 = vcmp.gt.f32.partialorder %v575_v41, 0.0 }
 0x141   :  { %5937 = vmatprep.mubr.f32.mxu1 %v660_v11  ;;  %v639_v52 = vmul.f32 0.2, %v575_v41  ;;  %v577_v53 = vadd.f32 %v525_v40, %v7489_v56  ;;  %v670_v54 = vsel %vm606_vm8, %v574_v37, %v638_v44  ;;  %v640_v55 = vmul.f32 0.2, %v576_v47  ;;  %v192_v11 = vld [vmem:[%s9727_s4] sm:$0xff]  ;;  %v33_v40 = vld [vmem:[%s9724_s1 + $0x38] sm:$0xff] }
 0x142   :  { %v578_v58 = vadd.f32 %v529_v48, %v7491_v57  ;;  %v533_v59 = vrot.slane %v469_v49, %v7484_v51  ;;  %vm608_vm10 = vcmp.gt.f32.partialorder %v576_v47, 0.0  ;;  %v579_v62 = vadd.f32 %v529_v48, %v7489_v56  ;;  %5964 = vmatprep.subr.mxu0 %v192_v11  ;;  %v32_v44 = vld [vmem:[%s9724_s1 + $0x30] sm:$0xff] }
 0x143   :  { %v671_v60 = vsel %vm607_vm9, %v575_v41, %v639_v52  ;;  %v641_v61 = vmul.f32 0.2, %v577_v53  ;;  %v672_v63 = vsel %vm608_vm10, %v576_v47, %v640_v55  ;;  %vm609_vm11 = vcmp.gt.f32.partialorder %v577_v53, 0.0  ;;  %5965 = vmatpush3.msra.mxu0 %v192_v11 }
 0x144   :  { %5938 = vmatmul.mubr.f32.gmra.mrb[16].mxu1 %v661_v16  ;;  %v642_v0 = vmul.f32 0.2, %v578_v58  ;;  %v580_v1 = vadd.f32 %v533_v59, %v7491_v57  ;;  %vm610_vm12 = vcmp.gt.f32.partialorder %v578_v58, 0.0  ;;  %v643_v3 = vmul.f32 0.2, %v579_v62 }
 0x145   :  { %5940 = vmatprep.mubr.f32.mxu1 %v662_v17  ;;  %v673_v2 = vsel %vm609_vm11, %v577_v53, %v641_v61  ;;  %v581_v4 = vadd.f32 %v533_v59, %v7489_v56  ;;  %vm611_vm13 = vcmp.gt.f32.partialorder %v579_v62, 0.0  ;;  %vm903_vm0 = vcmask 64512   ;;  %v35_v61 = vld [vmem:[%s9724_s1 + $0x48] sm:$0xff] }
 0x146   :  { %v674_v5 = vsel %vm610_vm12, %v578_v58, %v642_v0  ;;  %v644_v6 = vmul.f32 0.2, %v580_v1  ;;  %vm612_vm14 = vcmp.gt.f32.partialorder %v580_v1, 0.0  ;;  %v675_v7 = vsel %vm611_vm13, %v579_v62, %v643_v3  ;;  %v34_v62 = vld [vmem:[%s9724_s1 + $0x40] sm:$0xff] }
 0x147   :  { %v645_v8 = vmul.f32 0.2, %v581_v4  ;;  %vm613_vm15 = vcmp.gt.f32.partialorder %v581_v4, 0.0 }
 0x148   :  { %5941 = vmatmul.mubr.f32.gmra.mrb[18].mxu1 %v663_v24  ;;  %v676_v9 = vsel %vm612_vm14, %v580_v1, %v644_v6 }
 0x149   :  { %5943 = vmatprep.mubr.f32.mxu1 %v664_v28  ;;  %v677_v10 = vsel %vm613_vm15, %v581_v4, %v645_v8 }
 0x14c   :  { %5944 = vmatmul.mubr.f32.gmra.mrb[20].mxu1 %v665_v32 }
 0x14d   :  { %5946 = vmatprep.mubr.f32.mxu1 %v666_v38 }
 0x150   :  { %5947 = vmatmul.mubr.f32.gmra.mrb[22].mxu1 %v667_v42 }
 0x151   :  { %5949 = vmatprep.mubr.f32.mxu1 %v668_v46 }
 0x154   :  { %5950 = vmatmul.mubr.f32.gmra.mrb[24].mxu1 %v669_v50 }
 0x155   :  { %5952 = vmatprep.mubr.f32.mxu1 %v670_v54 }
 0x158   :  { %5953 = vmatmul.mubr.f32.gmra.mrb[26].mxu1 %v671_v60 }
 0x159   :  { %5955 = vmatprep.mubr.f32.mxu1 %v672_v63 }
 0x15c   :  { %5956 = vmatmul.mubr.f32.gmra.mrb[28].mxu1 %v673_v2 }
 0x15d   :  { %5958 = vmatprep.mubr.f32.mxu1 %v674_v5 }
 0x160   :  { %5959 = vmatmul.mubr.f32.gmra.mrb[30].mxu1 %v675_v7 }
 0x161   :  { %5961 = vmatprep.mubr.f32.mxu1 %v676_v9 }
 0x164   :  { %5962 = vmatmul.mubr.f32.gmra.mrb[32].mxu1 %v677_v10 }
 0x1fb   :  { %v5918_v14 = vpop.f32.mrb[2].mxu1 }
 0x1fc   :  { %v750_v15 = vadd.f32 %v5918_v14, %v27_v12  ;;  %v744_v16 = vpop.f32.mrb[3].mxu1  ;;  %v37_v12 = vld [vmem:[%s9724_s1 + $0x58] sm:$0xff] }
 0x1fd   :  { %v745_v17 = vadd.f32 %v744_v16, %v26_v13  ;;  %v36_v13 = vld [vmem:[%s9724_s1 + $0x50] sm:$0xff] }
 0x1fe   :  { %v905_v19 = vsel %vm903_vm0, %v750_v15, -inf }
 0x1ff   :  { %v904_v21 = vsel %vm903_vm0, %v745_v17, -inf  ;;  %v5921_v22 = vpop.f32.mrb[4].mxu1 }
 0x200   :  { %v906_v23 = vmax.f32 %v904_v21, %v905_v19  ;;  %v7571_v24 = vadd.f32 %v5921_v22, %v29_v18  ;;  %v754_v25 = vpop.f32.mrb[5].mxu1 }
 0x201   :  { %v7573_v26 = vadd.f32 %v754_v25, %v28_v20 }
 0x202   :  { %v907_v28 = vrot.slane %v906_v23, 4  ;;  %v914_v29 = vsel %vm903_vm0, %v7571_v24, -inf }
 0x203   :  { %v913_v31 = vsel %vm903_vm0, %v7573_v26, -inf  ;;  %v5924_v32 = vpop.f32.mrb[6].mxu1 }
 0x204   :  { %v908_v33 = vmax.f32 %v906_v23, %v907_v28  ;;  %v915_v36 = vmax.f32 %v913_v31, %v914_v29  ;;  %v7585_v37 = vadd.f32 %v5924_v32, %v31_v27  ;;  %v764_v38 = vpop.f32.mrb[7].mxu1  ;;  %v39_v32 = vld [vmem:[%s9724_s1 + $0x68] sm:$0xff] }
 0x205   :  { %v7587_v39 = vadd.f32 %v764_v38, %v30_v30 }
 0x206   :  { %v909_v41 = vrot.slane %v908_v33, 2  ;;  %v916_v42 = vrot.slane %v915_v36, 4  ;;  %v923_v43 = vsel %vm903_vm0, %v7585_v37, -inf }
 0x207   :  { %v922_v46 = vsel %vm903_vm0, %v7587_v39, -inf  ;;  %v5927_v47 = vpop.f32.mrb[8].mxu1 }
 0x208   :  { %v910_v48 = vmax.f32 %v908_v33, %v909_v41  ;;  %v917_v49 = vmax.f32 %v915_v36, %v916_v42  ;;  %v924_v50 = vmax.f32 %v922_v46, %v923_v43  ;;  %v7599_v52 = vadd.f32 %v5927_v47, %v33_v40  ;;  %v774_v53 = vpop.f32.mrb[9].mxu1  ;;  %v38_v41 = vld [vmem:[%s9724_s1 + $0x60] sm:$0xff] }
 0x209   :  { %v7601_v54 = vadd.f32 %v774_v53, %v32_v44 }
 0x20a   :  { %v911_v55 = vrot.slane %v910_v48, 1  ;;  %v918_v58 = vrot.slane %v917_v49, 2  ;;  %v925_v59 = vrot.slane %v924_v50, 4  ;;  %v932_v60 = vsel %vm903_vm0, %v7599_v52, -inf }
 0x20b   :  { %v931_v63 = vsel %vm903_vm0, %v7601_v54, -inf  ;;  %v5930_v0 = vpop.f32.mrb[10].mxu1 }
 0x20c   :  { %v912_v1 = vmax.f32 %v910_v48, %v911_v55  ;;  %v919_v2 = vmax.f32 %v917_v49, %v918_v58  ;;  %v926_v3 = vmax.f32 %v924_v50, %v925_v59  ;;  %v933_v4 = vmax.f32 %v931_v63, %v932_v60  ;;  %v784_v5 = vpop.f32.mrb[11].mxu1  ;;  %v40_v63 = vld [vmem:[%s9724_s1 + $0x70] sm:$0xff] }
 0x20d   :  { %v7613_v6 = vadd.f32 %v5930_v0, %v35_v61  ;;  %v7615_v7 = vadd.f32 %v784_v5, %v34_v62  ;;  %v41_v61 = vld [vmem:[%s9724_s1 + $0x78] sm:$0xff] }
 0x20e   :  { %v1048_v8 = vsub.f32 %v745_v17, %v912_v1  ;;  %v1049_v9 = vsub.f32 %v750_v15, %v912_v1  ;;  %v920_v10 = vrot.slane %v919_v2, 1  ;;  %v927_v11 = vrot.slane %v926_v3, 2 }
 0x20f   :  { %v934_v14 = vrot.slane %v933_v4, 4  ;;  %v941_v16 = vsel %vm903_vm0, %v7613_v6, -inf  ;;  %v940_v18 = vsel %vm903_vm0, %v7615_v7, -inf  ;;  %v5933_v19 = vpop.f32.mrb[12].mxu1 }
 0x210   :  { %v1080_v17 = vmul.f32 1.442695, %v1048_v8  ;;  %v1082_v15 = vmul.f32 1.442695, %v1049_v9  ;;  %v921_v20 = vmax.f32 %v919_v2, %v920_v10  ;;  %v928_v21 = vmax.f32 %v926_v3, %v927_v11  ;;  %v794_v22 = vpop.f32.mrb[13].mxu1 }
 0x211   :  { %v935_v23 = vmax.f32 %v933_v4, %v934_v14  ;;  %v942_v25 = vmax.f32 %v940_v18, %v941_v16  ;;  %v7627_v27 = vadd.f32 %v5933_v19, %v37_v12  ;;  %v7629_v28 = vadd.f32 %v794_v22, %v36_v13 }
 0x212   :  { %6834 = vpow2.f32 %v1080_v17  ;;  %v1050_v29 = vsub.f32 %v7573_v26, %v921_v20  ;;  %v1051_v30 = vsub.f32 %v7571_v24, %v921_v20  ;;  %v929_v31 = vrot.slane %v928_v21, 1 }
 0x213   :  { %6836 = vpow2.f32 %v1082_v15  ;;  %v936_v33 = vrot.slane %v935_v23, 2  ;;  %v943_v36 = vrot.slane %v942_v25, 4  ;;  %v950_v38 = vsel %vm903_vm0, %v7627_v27, -inf  ;;  %v5936_v40 = vpop.f32.mrb[14].mxu1 }
 0x214   :  { %v1084_v42 = vmul.f32 1.442695, %v1050_v29  ;;  %v1086_v26 = vmul.f32 1.442695, %v1051_v30  ;;  %v930_v43 = vmax.f32 %v928_v21, %v929_v31  ;;  %v949_v24 = vsel %vm903_vm0, %v7629_v28, -inf  ;;  %v804_v44 = vpop.f32.mrb[15].mxu1 }
 0x215   :  { %v937_v46 = vmax.f32 %v935_v23, %v936_v33  ;;  %v944_v47 = vmax.f32 %v942_v25, %v943_v36  ;;  %v951_v48 = vmax.f32 %v949_v24, %v950_v38  ;;  %v7643_v49 = vadd.f32 %v5936_v40, %v39_v32 }
 0x216   :  { %6838 = vpow2.f32 %v1084_v42  ;;  %v1052_v50 = vsub.f32 %v7587_v39, %v930_v43  ;;  %v1053_v53 = vsub.f32 %v7585_v37, %v930_v43  ;;  %v7647_v55 = vadd.f32 %v804_v44, %v38_v41  ;;  %v43_v43 = vld [vmem:[%s9724_s1 + $0x88] sm:$0xff] }
 0x217   :  { %6840 = vpow2.f32 %v1086_v26  ;;  %v938_v58 = vrot.slane %v937_v46, 1  ;;  %v945_v59 = vrot.slane %v944_v47, 2  ;;  %v952_v60 = vrot.slane %v951_v48, 4  ;;  %v5939_v62 = vpop.f32.mrb[16].mxu1 }
 0x218   :  { %v1088_v0 = vmul.f32 1.442695, %v1052_v50  ;;  %v1090_v1 = vmul.f32 1.442695, %v1053_v53  ;;  %v959_v37 = vsel %vm903_vm0, %v7643_v49, -inf  ;;  %v958_v39 = vsel %vm903_vm0, %v7647_v55, -inf }
 0x219   :  { %v939_v2 = vmax.f32 %v937_v46, %v938_v58  ;;  %v946_v3 = vmax.f32 %v944_v47, %v945_v59  ;;  %v953_v4 = vmax.f32 %v951_v48, %v952_v60  ;;  %v960_v5 = vmax.f32 %v958_v39, %v959_v37  ;;  %v814_v8 = vpop.f32.mrb[17].mxu1 }
 0x21a   :  { %6842 = vpow2.f32 %v1088_v0  ;;  %v7659_v9 = vadd.f32 %v5939_v62, %v41_v61  ;;  %v7661_v10 = vadd.f32 %v814_v8, %v40_v63 }
 0x21b   :  { %6844 = vpow2.f32 %v1090_v1  ;;  %v1054_v11 = vsub.f32 %v7601_v54, %v939_v2  ;;  %v1055_v12 = vsub.f32 %v7599_v52, %v939_v2  ;;  %v947_v13 = vrot.slane %v946_v3, 1  ;;  %v5942_v14 = vpop.f32.mrb[18].mxu1 }
 0x21c   :  { %v7665_v16 = vpop.eup %6834  ;;  %v954_v18 = vrot.slane %v953_v4, 2  ;;  %v961_v19 = vrot.slane %v960_v5, 4  ;;  %v968_v17 = vsel %vm903_vm0, %v7659_v9, -inf  ;;  %v967_v15 = vsel %vm903_vm0, %v7661_v10, -inf  ;;  %v7671_v20 = vpop.f32.mrb[19].mxu1 }
 0x21d   :  { %v7673_v21 = vpop.eup %6836  ;;  %v1144_v54 = vsel %vm903_vm0, %v7665_v16, 0.0  ;;  %v1092_v52 = vmul.f32 1.442695, %v1054_v11  ;;  %v1094_v22 = vmul.f32 1.442695, %v1055_v12  ;;  %v948_v23 = vmax.f32 %v946_v3, %v947_v13 }
 0x21e   :  { %v1145_v25 = vsel %vm903_vm0, %v7673_v21, 0.0  ;;  %v955_v29 = vmax.f32 %v953_v4, %v954_v18  ;;  %v962_v30 = vmax.f32 %v960_v5, %v961_v19  ;;  %v969_v31 = vmax.f32 %v967_v15, %v968_v17  ;;  %v42_v17 = vld [vmem:[%s9724_s1 + $0x80] sm:$0xff] }
 0x21f   :  { %v1146_v32 = vadd.f32 %v1145_v25, %v1144_v54  ;;  %6846 = vpow2.f32 %v1092_v52  ;;  %v1056_v33 = vsub.f32 %v7615_v7, %v948_v23  ;;  %v1057_v36 = vsub.f32 %v7613_v6, %v948_v23  ;;  %v7681_v38 = vpop.f32.mrb[20].mxu1 }
 0x220   :  { %v7683_v40 = vpop.eup %6838  ;;  %6848 = vpow2.f32 %v1094_v22  ;;  %v956_v41 = vrot.slane %v955_v29, 1  ;;  %v963_v42 = vrot.slane %v962_v30, 2  ;;  %v970_v26 = vrot.slane %v969_v31, 4  ;;  %v7688_v24 = vpop.f32.mrb[21].mxu1 }
 0x221   :  { %v7690_v44 = vpop.eup %6840  ;;  %v1147_v46 = vrot.slane %v1146_v32, 4  ;;  %v1153_v6 = vsel %vm903_vm0, %v7683_v40, 0.0  ;;  %v1096_v7 = vmul.f32 1.442695, %v1056_v33  ;;  %v1098_v47 = vmul.f32 1.442695, %v1057_v36 }
 0x222   :  { %v1154_v48 = vsel %vm903_vm0, %v7690_v44, 0.0  ;;  %v957_v50 = vmax.f32 %v955_v29, %v956_v41  ;;  %v964_v53 = vmax.f32 %v962_v30, %v963_v42  ;;  %v971_v58 = vmax.f32 %v969_v31, %v970_v26 }
 0x223   :  { %v1148_v59 = vadd.f32 %v1147_v46, %v1146_v32  ;;  %v1155_v60 = vadd.f32 %v1154_v48, %v1153_v6  ;;  %6850 = vpow2.f32 %v1096_v7  ;;  %v7696_v61 = vadd.f32 %v5942_v14, %v43_v43  ;;  %v7698_v62 = vpop.f32.mrb[22].mxu1  ;;  %v45_v32 = vld [vmem:[%s9724_s1 + $0x98] sm:$0xff] }
 0x224   :  { %v7700_v63 = vpop.eup %6842  ;;  %6852 = vpow2.f32 %v1098_v47  ;;  %v1058_v0 = vsub.f32 %v7629_v28, %v957_v50  ;;  %v1059_v1 = vsub.f32 %v7627_v27, %v957_v50  ;;  %v965_v37 = vrot.slane %v964_v53, 1  ;;  %v7704_v39 = vpop.f32.mrb[23].mxu1 }
 0x225   :  { %v7706_v2 = vpop.eup %6844  ;;  %v1149_v3 = vrot.slane %v1148_v59, 2  ;;  %v1156_v4 = vrot.slane %v1155_v60, 4  ;;  %v1162_v5 = vsel %vm903_vm0, %v7700_v63, 0.0  ;;  %v972_v8 = vrot.slane %v971_v58, 2 }
 0x226   :  { %v1163_v11 = vsel %vm903_vm0, %v7706_v2, 0.0  ;;  %v1100_v12 = vmul.f32 1.442695, %v1058_v0  ;;  %v1102_v13 = vmul.f32 1.442695, %v1059_v1  ;;  %v966_v14 = vmax.f32 %v964_v53, %v965_v37 }
 0x227   :  { %v7712_v28 = vadd.f32 %v1149_v3, %v1148_v59  ;;  %v1157_v27 = vadd.f32 %v1156_v4, %v1155_v60  ;;  %v1164_v18 = vadd.f32 %v1163_v11, %v1162_v5  ;;  %v973_v19 = vmax.f32 %v971_v58, %v972_v8  ;;  %v5951_v15 = vpop.f32.mrb[24].mxu1  ;;  %v44_v60 = vld [vmem:[%s9724_s1 + $0x90] sm:$0xff]  ;;  %v49_v4 = vld [vmem:[%s9724_s1 + $0xb8] sm:$0xff] }
 0x228   :  { %6854 = vpow2.f32 %v1100_v12  ;;  %v1060_v54 = vsub.f32 %v7647_v55, %v966_v14  ;;  %v1061_v52 = vsub.f32 %v7643_v49, %v966_v14  ;;  %v977_v22 = vsel %vm903_vm0, %v7696_v61, -inf  ;;  %v7721_v23 = vpop.f32.mrb[25].mxu1 }
 0x229   :  { %v7723_v25 = vpop.eup %6846  ;;  %v1158_v29 = vrot.slane %v1157_v27, 2  ;;  %v1165_v30 = vrot.slane %v1164_v18, 4  ;;  %6856 = vpow2.f32 %v1102_v13  ;;  %v974_v31 = vrot.slane %v973_v19, 1 }
 0x22a   :  { %v7728_v33 = vpop.eup %6848  ;;  %v1171_v49 = vsel %vm903_vm0, %v7723_v25, 0.0  ;;  %v1104_v55 = vmul.f32 1.442695, %v1060_v54  ;;  %v1106_v36 = vmul.f32 1.442695, %v1061_v52  ;;  %v7733_v41 = vadd.f32 %v7671_v20, %v42_v17 }
 0x22b   :  { %v7735_v42 = vadd.f32 %v1158_v29, %v1157_v27  ;;  %v1166_v26 = vadd.f32 %v1165_v30, %v1164_v18  ;;  %v1172_v43 = vsel %vm903_vm0, %v7728_v33, 0.0  ;;  %v975_v46 = vmax.f32 %v973_v19, %v974_v31  ;;  %v5954_v6 = vpop.f32.mrb[26].mxu1 }
 0x22c   :  { %v1173_v7 = vadd.f32 %v1172_v43, %v1171_v49  ;;  %6858 = vpow2.f32 %v1104_v55  ;;  %v976_v47 = vsel %vm903_vm0, %v7733_v41, -inf  ;;  %v7742_v48 = vadd.f32 %v7681_v38, %v45_v32  ;;  %v7744_v50 = vpop.f32.mrb[27].mxu1 }
 0x22d   :  { %v7746_v20 = vpop.eup %6850  ;;  %v1167_v53 = vrot.slane %v1166_v26, 2  ;;  %6860 = vpow2.f32 %v1106_v36  ;;  %v1062_v58 = vsub.f32 %v7661_v10, %v975_v46  ;;  %v1063_v59 = vsub.f32 %v7659_v9, %v975_v46  ;;  %v47_v10 = vld [vmem:[%s9724_s1 + $0xa8] sm:$0xff]  ;;  %v46_v9 = vld [vmem:[%s9724_s1 + $0xa0] sm:$0xff] }
 0x22e   :  { %v7753_v0 = vpop.eup %6852  ;;  %v1174_v1 = vrot.slane %v1173_v7, 4  ;;  %v1180_v38 = vsel %vm903_vm0, %v7746_v20, 0.0  ;;  %v978_v37 = vmax.f32 %v976_v47, %v977_v22  ;;  %v986_v3 = vsel %vm903_vm0, %v7742_v48, -inf  ;;  %v51_v36 = vld [vmem:[%s9724_s1 + $0xc8] sm:$0xff] }
 0x22f   :  { %v7768_v5 = vadd.f32 %v1167_v53, %v1166_v26  ;;  %v1181_v8 = vsel %vm903_vm0, %v7753_v0, 0.0  ;;  %v1108_v11 = vmul.f32 1.442695, %v1062_v58  ;;  %v1110_v12 = vmul.f32 1.442695, %v1063_v59  ;;  %v7772_v13 = vpop.f32.mrb[28].mxu1 }
 0x230   :  { %v1175_v14 = vadd.f32 %v1174_v1, %v1173_v7  ;;  %v1182_v27 = vadd.f32 %v1181_v8, %v1180_v38  ;;  %v979_v18 = vrot.slane %v978_v37, 4  ;;  %v7775_v19 = vadd.f32 %v7688_v24, %v44_v60  ;;  %v7777_v17 = vpop.f32.mrb[29].mxu1  ;;  %v48_v24 = vld [vmem:[%s9724_s1 + $0xb0] sm:$0xff] }
 0x231   :  { %6862 = vpow2.f32 %v1108_v11  ;;  %v7780_v54 = vadd.f32 %v7698_v62, %v47_v10  ;;  %v7783_v52 = vadd.f32 %v7704_v39, %v46_v9  ;;  %v7785_v22 = vadd.f32 %v5951_v15, %v49_v4 }
 0x232   :  { %v7787_v29 = vpop.eup %6854  ;;  %v1176_v30 = vrot.slane %v1175_v14, 2  ;;  %v1183_v31 = vrot.slane %v1182_v27, 4  ;;  %6864 = vpow2.f32 %v1110_v12  ;;  %v980_v32 = vmax.f32 %v978_v37, %v979_v18 }
 0x233   :  { %v7792_v49 = vpop.eup %6856  ;;  %v1189_v62 = vsel %vm903_vm0, %v7787_v29, 0.0  ;;  %v985_v39 = vsel %vm903_vm0, %v7775_v19, -inf  ;;  %v995_v15 = vsel %vm903_vm0, %v7780_v54, -inf  ;;  %v994_v55 = vsel %vm903_vm0, %v7783_v52, -inf  ;;  %v7805_v26 = vpop.f32.mrb[30].mxu1 }
 0x234   :  { %v7807_v43 = vadd.f32 %v1176_v30, %v1175_v14  ;;  %v1184_v46 = vadd.f32 %v1183_v31, %v1182_v27  ;;  %v1190_v7 = vsel %vm903_vm0, %v7792_v49, 0.0  ;;  %v981_v47 = vrot.slane %v980_v32, 2  ;;  %v7811_v53 = vpop.f32.mrb[31].mxu1  ;;  %v50_v27 = vld [vmem:[%s9724_s1 + $0xc0] sm:$0xff] }
 0x235   :  { %v1191_v58 = vadd.f32 %v1190_v7, %v1189_v62  ;;  %v987_v59 = vmax.f32 %v985_v39, %v986_v3  ;;  %v996_v60 = vmax.f32 %v994_v55, %v995_v15  ;;  %v1004_v1 = vsel %vm903_vm0, %v7785_v22, -inf }
 0x236   :  { %v7815_v38 = vpop.eup %6858  ;;  %v1185_v37 = vrot.slane %v1184_v46, 2  ;;  %v982_v10 = vmax.f32 %v980_v32, %v981_v47  ;;  %v7818_v9 = vadd.f32 %v7721_v23, %v48_v24  ;;  %v7820_v4 = vadd.f32 %v5954_v6, %v51_v36 }
 0x237   :  { %v7822_v8 = vpop.eup %6860  ;;  %v1192_v11 = vrot.slane %v1191_v58, 4  ;;  %v1198_v12 = vsel %vm903_vm0, %v7815_v38, 0.0  ;;  %v988_v3 = vrot.slane %v987_v59, 4  ;;  %v997_v14 = vrot.slane %v996_v60, 4  ;;  %v7829_v18 = vpop.f32.mrb[32].mxu1 }
 0x238   :  { %v7831_v30 = vadd.f32 %v1185_v37, %v1184_v46  ;;  %v1199_v23 = vsel %vm903_vm0, %v7822_v8, 0.0  ;;  %v983_v6 = vrot.slane %v982_v10, 1  ;;  %v1003_v31 = vsel %vm903_vm0, %v7818_v9, -inf  ;;  %v7837_v32 = vpop.f32.mrb[33].mxu1 }
 0x239   :  { %v1193_v24 = vadd.f32 %v1192_v11, %v1191_v58  ;;  %v1200_v62 = vadd.f32 %v1199_v23, %v1198_v12  ;;  %v989_v39 = vmax.f32 %v987_v59, %v988_v3  ;;  %v998_v15 = vmax.f32 %v996_v60, %v997_v14 }
 0x23a   :  { %v984_v55 = vmax.f32 %v982_v10, %v983_v6  ;;  %v1005_v36 = vmax.f32 %v1003_v31, %v1004_v1  ;;  %v1013_v7 = vsel %vm903_vm0, %v7820_v4, -inf  ;;  %v7842_v46 = vadd.f32 %v7744_v50, %v50_v27 }
 0x23b   :  { %v7844_v47 = vpop.eup %6862  ;;  %v1194_v37 = vrot.slane %v1193_v24, 2  ;;  %v1201_v34 = vrot.slane %v1200_v62, 4  ;;  %v990_v35 = vrot.slane %v989_v39, 2  ;;  %v999_v51 = vrot.slane %v998_v15, 2 }
 0x23c   :  { %v7846_v45 = vpop.eup %6864  ;;  %v1207_v58 = vsel %vm903_vm0, %v7844_v47, 0.0  ;;  %v1064_v59 = vsub.f32 %v7733_v41, %v984_v55  ;;  %v1065_v60 = vsub.f32 %v7696_v61, %v984_v55  ;;  %v1006_v1 = vrot.slane %v1005_v36, 4  ;;  %v53_v61 = vld [vmem:[%s9724_s1 + $0xd8] sm:$0xff] }
 0x23d   :  { %v7852_v10 = vadd.f32 %v1194_v37, %v1193_v24  ;;  %v1202_v50 = vadd.f32 %v1201_v34, %v1200_v62  ;;  %v1208_v11 = vsel %vm903_vm0, %v7846_v45, 0.0  ;;  %v991_v12 = vmax.f32 %v989_v39, %v990_v35  ;;  %v52_v35 = vld [vmem:[%s9724_s1 + $0xd0] sm:$0xff] }
 0x23e   :  { %v1209_v3 = vadd.f32 %v1208_v11, %v1207_v58  ;;  %v1112_v14 = vmul.f32 1.442695, %v1064_v59  ;;  %v1114_v27 = vmul.f32 1.442695, %v1065_v60  ;;  %v1000_v23 = vmax.f32 %v998_v15, %v999_v51 }
 0x23f   :  { %v1203_v6 = vrot.slane %v1202_v50, 2  ;;  %v992_v31 = vrot.slane %v991_v12, 1  ;;  %v1007_v57 = vmax.f32 %v1005_v36, %v1006_v1  ;;  %v1012_v41 = vsel %vm903_vm0, %v7842_v46, -inf }
 0x240   :  { %v1210_v24 = vrot.slane %v1209_v3, 4  ;;  %6866 = vpow2.f32 %v1112_v14  ;;  %v1001_v34 = vrot.slane %v1000_v23, 1  ;;  %v1014_v62 = vmax.f32 %v1012_v41, %v1013_v7 }
 0x241   :  { %v7864_v39 = vadd.f32 %v1203_v6, %v1202_v50  ;;  %6868 = vpow2.f32 %v1114_v27  ;;  %v993_v51 = vmax.f32 %v991_v12, %v992_v31  ;;  %v1008_v15 = vrot.slane %v1007_v57, 2 }
 0x242   :  { %v1211_v55 = vadd.f32 %v1210_v24, %v1209_v3  ;;  %v1002_v36 = vmax.f32 %v1000_v23, %v1001_v34  ;;  %v1015_v37 = vrot.slane %v1014_v62, 4  ;;  %v7867_v58 = vadd.f32 %v7772_v13, %v53_v61  ;;  %v55_v3 = vld [vmem:[%s9724_s1 + $0xe8] sm:$0xff]  ;;  %v54_v13 = vld [vmem:[%s9724_s1 + $0xe0] sm:$0xff] }
 0x243   :  { %v1066_v59 = vsub.f32 %v7775_v19, %v993_v51  ;;  %v1067_v60 = vsub.f32 %v7742_v48, %v993_v51  ;;  %v1009_v7 = vmax.f32 %v1007_v57, %v1008_v15  ;;  %v7872_v1 = vadd.f32 %v7777_v17, %v52_v35  ;;  %v57_v15 = vld [vmem:[%s9724_s1 + $0xf8] sm:$0xff] }
 0x244   :  { %v1212_v11 = vrot.slane %v1211_v55, 2  ;;  %v1068_v50 = vsub.f32 %v7783_v52, %v1002_v36  ;;  %v1069_v12 = vsub.f32 %v7780_v54, %v1002_v36  ;;  %v1016_v14 = vmax.f32 %v1014_v62, %v1015_v37 }
 0x245   :  { %v1116_v19 = vmul.f32 1.442695, %v1066_v59  ;;  %v1118_v48 = vmul.f32 1.442695, %v1067_v60  ;;  %v1010_v57 = vrot.slane %v1009_v7, 1  ;;  %v1022_v17 = vsel %vm903_vm0, %v7867_v58, -inf }
 0x246   :  { %v7884_v27 = vadd.f32 %v1212_v11, %v1211_v55  ;;  %v1120_v52 = vmul.f32 1.442695, %v1068_v50  ;;  %v1122_v23 = vmul.f32 1.442695, %v1069_v12  ;;  %v1017_v54 = vrot.slane %v1016_v14, 2 }
 0x247   :  { %6870 = vpow2.f32 %v1116_v19  ;;  %v1011_v6 = vmax.f32 %v1009_v7, %v1010_v57  ;;  %v1021_v31 = vsel %vm903_vm0, %v7872_v1, -inf  ;;  %v7889_v41 = vadd.f32 %v7805_v26, %v55_v3 }
 0x248   :  { %6872 = vpow2.f32 %v1118_v48  ;;  %v1018_v61 = vmax.f32 %v1016_v14, %v1017_v54  ;;  %v1023_v24 = vmax.f32 %v1021_v31, %v1022_v17  ;;  %v7892_v34 = vadd.f32 %v7811_v53, %v54_v13 }
 0x249   :  { %6874 = vpow2.f32 %v1120_v52  ;;  %v1070_v62 = vsub.f32 %v7818_v9, %v1011_v6  ;;  %v1071_v35 = vsub.f32 %v7785_v22, %v1011_v6  ;;  %v1031_v51 = vsel %vm903_vm0, %v7889_v41, -inf  ;;  %v56_v9 = vld [vmem:[%s9724_s1 + $0xf0] sm:$0xff] }
 0x24a   :  { %v7901_v26 = vpop.eup %6866  ;;  %6876 = vpow2.f32 %v1122_v23  ;;  %v1019_v55 = vrot.slane %v1018_v61, 1  ;;  %v1024_v36 = vrot.slane %v1023_v24, 4  ;;  %v1030_v53 = vsel %vm903_vm0, %v7892_v34, -inf }
 0x24b   :  { %v7908_v22 = vpop.eup %6868  ;;  %v1216_v37 = vsel %vm903_vm0, %v7901_v26, 0.0  ;;  %v1124_v59 = vmul.f32 1.442695, %v1070_v62  ;;  %v1126_v60 = vmul.f32 1.442695, %v1071_v35  ;;  %v1032_v7 = vmax.f32 %v1030_v53, %v1031_v51 }
 0x24c   :  { %v1217_v11 = vsel %vm903_vm0, %v7908_v22, 0.0  ;;  %v1020_v50 = vmax.f32 %v1018_v61, %v1019_v55  ;;  %v1025_v12 = vmax.f32 %v1023_v24, %v1024_v36  ;;  %v7915_v14 = vadd.f32 %v7829_v18, %v57_v15 }
 0x24d   :  { %v1218_v3 = vadd.f32 %v1217_v11, %v1216_v37  ;;  %6878 = vpow2.f32 %v1124_v59  ;;  %v1033_v13 = vrot.slane %v1032_v7, 4  ;;  %v7918_v19 = vadd.f32 %v7837_v32, %v56_v9 }
 0x24e   :  { %6880 = vpow2.f32 %v1126_v60  ;;  %v1072_v48 = vsub.f32 %v7842_v46, %v1020_v50  ;;  %v1073_v57 = vsub.f32 %v7820_v4, %v1020_v50  ;;  %v1026_v17 = vrot.slane %v1025_v12, 2 }
 0x24f   :  { %v1219_v52 = vrot.slane %v1218_v3, 4  ;;  %v1034_v23 = vmax.f32 %v1032_v7, %v1033_v13  ;;  %v1040_v54 = vsel %vm903_vm0, %v7915_v14, -inf  ;;  %v1039_v18 = vsel %vm903_vm0, %v7918_v19, -inf }
 0x250   :  { %v1128_v6 = vmul.f32 1.442695, %v1072_v48  ;;  %v1130_v31 = vmul.f32 1.442695, %v1073_v57  ;;  %v1027_v61 = vmax.f32 %v1025_v12, %v1026_v17  ;;  %v1041_v24 = vmax.f32 %v1039_v18, %v1040_v54 }
 0x251   :  { %v7926_v32 = vpop.eup %6870  ;;  %v1220_v62 = vadd.f32 %v1219_v52, %v1218_v3  ;;  %v1035_v35 = vrot.slane %v1034_v23, 2  ;;  %v1151_v46 = vrot.slane %v7712_v28, 1  ;;  %v1160_v4 = vrot.slane %v7735_v42, 1 }
 0x252   :  { %v7930_v51 = vpop.eup %6872  ;;  %v1225_v15 = vsel %vm903_vm0, %v7926_v32, 0.0  ;;  %6882 = vpow2.f32 %v1128_v6  ;;  %v1028_v55 = vrot.slane %v1027_v61, 1  ;;  %v1042_v36 = vrot.slane %v1041_v24, 4 }
 0x253   :  { %v7934_v53 = vpop.eup %6874  ;;  %v1221_v9 = vrot.slane %v1220_v62, 2  ;;  %v1226_v37 = vsel %vm903_vm0, %v7930_v51, 0.0  ;;  %6884 = vpow2.f32 %v1130_v31  ;;  %v1036_v59 = vmax.f32 %v1034_v23, %v1035_v35 }
 0x254   :  { %v7938_v60 = vpop.eup %6876  ;;  %v1227_v7 = vadd.f32 %v1226_v37, %v1225_v15  ;;  %v1234_v11 = vsel %vm903_vm0, %v7934_v53, 0.0  ;;  %v1029_v50 = vmax.f32 %v1027_v61, %v1028_v55  ;;  %v1043_v12 = vmax.f32 %v1041_v24, %v1042_v36 }
 0x255   :  { %v7942_v3 = vadd.f32 %v1221_v9, %v1220_v62  ;;  %v1235_v13 = vsel %vm903_vm0, %v7938_v60, 0.0  ;;  %v1037_v48 = vrot.slane %v1036_v59, 1  ;;  %v1152_v57 = vadd.f32 %v1151_v46, %v7712_v28 }
 0x256   :  { %v1228_v17 = vrot.slane %v1227_v7, 4  ;;  %v1236_v52 = vadd.f32 %v1235_v13, %v1234_v11  ;;  %v1074_v23 = vsub.f32 %v7872_v1, %v1029_v50  ;;  %v1075_v54 = vsub.f32 %v7867_v58, %v1029_v50 }
 0x257   :  { %v7949_v18 = vpop.eup %6878  ;;  %v1038_v6 = vmax.f32 %v1036_v59, %v1037_v48  ;;  %v1044_v31 = vrot.slane %v1043_v12, 2  ;;  %6886 = vrcp.f32 %v1152_v57  ;;  %v1161_v61 = vadd.f32 %v1160_v4, %v7735_v42 }
 0x258   :  { %v7952_v24 = vpop.eup %6880  ;;  %v1229_v62 = vadd.f32 %v1228_v17, %v1227_v7  ;;  %v1237_v35 = vrot.slane %v1236_v52, 4  ;;  %v1243_v28 = vsel %vm903_vm0, %v7949_v18, 0.0  ;;  %v1132_v46 = vmul.f32 1.442695, %v1074_v23 }
 0x259   :  { %v1244_v1 = vsel %vm903_vm0, %v7952_v24, 0.0  ;;  %v1134_v15 = vmul.f32 1.442695, %v1075_v54  ;;  %v1076_v58 = vsub.f32 %v7892_v34, %v1038_v6  ;;  %v1077_v55 = vsub.f32 %v7889_v41, %v1038_v6 }
 0x25a   :  { %v1230_v36 = vrot.slane %v1229_v62, 2  ;;  %v1238_v9 = vadd.f32 %v1237_v35, %v1236_v52  ;;  %v1245_v37 = vadd.f32 %v1244_v1, %v1243_v28  ;;  %6888 = vpow2.f32 %v1132_v46 }
 0x25b   :  { %6890 = vpow2.f32 %v1134_v15  ;;  %v1136_v42 = vmul.f32 1.442695, %v1076_v58  ;;  %v1138_v4 = vmul.f32 1.442695, %v1077_v55  ;;  %v1045_v59 = vmax.f32 %v1043_v12, %v1044_v31 }
 0x25c   :  { %v7960_v7 = vpop.eup %6882  ;;  %v1231_v11 = vadd.f32 %v1230_v36, %v1229_v62  ;;  %v1239_v50 = vrot.slane %v1238_v9, 2  ;;  %v1246_v13 = vrot.slane %v1245_v37, 4  ;;  %6892 = vrcp.f32 %v1161_v61 }
 0x25d   :  { %v7962_v48 = vpop.eup %6884  ;;  %v1252_v34 = vsel %vm903_vm0, %v7960_v7, 0.0  ;;  %6894 = vpow2.f32 %v1136_v42  ;;  %v1046_v41 = vrot.slane %v1045_v59, 1  ;;  %v1169_v57 = vrot.slane %v7768_v5, 1 }
 0x25e   :  { %v7967_v17 = vadd.f32 %v1239_v50, %v1238_v9  ;;  %v1247_v52 = vadd.f32 %v1246_v13, %v1245_v37  ;;  %v1253_v12 = vsel %vm903_vm0, %v7962_v48, 0.0  ;;  %6896 = vpow2.f32 %v1138_v4 }
 0x25f   :  { %v1254_v23 = vadd.f32 %v1253_v12, %v1252_v34  ;;  %v1047_v54 = vmax.f32 %v1045_v59, %v1046_v41  ;;  %v1170_v6 = vadd.f32 %v1169_v57, %v7768_v5  ;;  %v1178_v31 = vrot.slane %v7807_v43, 1 }
 0x260   :  { %v1248_v61 = vrot.slane %v1247_v52, 2  ;;  %v1187_v62 = vrot.slane %v7831_v30, 1  ;;  %v1196_v35 = vrot.slane %v7852_v10, 1  ;;  %v1205_v28 = vrot.slane %v7864_v39, 1 }
 0x261   :  { %v6887_v46 = vpop.eup %6886  ;;  %v1255_v1 = vrot.slane %v1254_v23, 4  ;;  %v1078_v15 = vsub.f32 %v7918_v19, %v1047_v54  ;;  %v1079_v58 = vsub.f32 %v7915_v14, %v1047_v54  ;;  %6898 = vrcp.f32 %v1170_v6 }
 0x262   :  { %v1249_v55 = vadd.f32 %v1248_v61, %v1247_v52  ;;  %v1304_v36 = vmul.f32 %v6887_v46, %v7665_v16  ;;  %v1305_v5 = vmul.f32 %v6887_v46, %v7673_v21  ;;  %v1179_v9 = vadd.f32 %v1178_v31, %v7807_v43 }
 0x263   :  { %v1256_v37 = vadd.f32 %v1255_v1, %v1254_v23  ;;  %v1140_v42 = vmul.f32 1.442695, %v1078_v15  ;;  %v1142_v4 = vmul.f32 1.442695, %v1079_v58  ;;  %v1188_v59 = vadd.f32 %v1187_v62, %v7831_v30 }
 0x264   :  { %v7982_v50 = vpop.eup %6888  ;;  %5966 = vmatprep.mubr.msk.f32.mxu0 %vm903_vm0, %v1304_v36  ;;  %6900 = vrcp.f32 %v1179_v9  ;;  %v1197_v14 = vadd.f32 %v1196_v35, %v7852_v10  ;;  %v1206_v19 = vadd.f32 %v1205_v28, %v7864_v39  ;;  %v1214_v16 = vrot.slane %v7884_v27, 1 }
 0x265   :  { %v7988_v13 = vpop.eup %6890  ;;  %v1257_v21 = vrot.slane %v1256_v37, 2  ;;  %v1261_v43 = vsel %vm903_vm0, %v7982_v50, 0.0  ;;  %6902 = vpow2.f32 %v1140_v42  ;;  %5967 = vmatmul.mubr.msk.f32.vlgmr.msra.gmra.mrb[4].mxu0 %vm903_vm0, %v1305_v5  ;;  %v1223_v30 = vrot.slane %v7942_v3, 1 }
 0x266   :  { %v6893_v34 = vpop.eup %6892  ;;  %v1262_v41 = vsel %vm903_vm0, %v7988_v13, 0.0  ;;  %6904 = vpow2.f32 %v1142_v4  ;;  %v1215_v10 = vadd.f32 %v1214_v16, %v7884_v27  ;;  %v1232_v39 = vrot.slane %v1231_v11, 1 }
 0x267   :  { %v7997_v57 = vpop.eup %6894  ;;  %v1258_v52 = vadd.f32 %v1257_v21, %v1256_v37  ;;  %v1263_v12 = vadd.f32 %v1262_v41, %v1261_v43  ;;  %v1306_v23 = vmul.f32 %v6893_v34, %v7683_v40  ;;  %v1307_v54 = vmul.f32 %v6893_v34, %v7690_v44 }
 0x268   :  { %v8001_v6 = vpop.eup %6896  ;;  %v1270_v31 = vsel %vm903_vm0, %v7997_v57, 0.0  ;;  %6906 = vrcp.f32 %v1188_v59  ;;  %v1224_v61 = vadd.f32 %v1223_v30, %v7942_v3  ;;  %v1233_v62 = vadd.f32 %v1232_v39, %v1231_v11 }
 0x269   :  { %v1264_v35 = vrot.slane %v1263_v12, 4  ;;  %v1271_v27 = vsel %vm903_vm0, %v8001_v6, 0.0  ;;  %5969 = vmatprep.mubr.msk.f32.mxu0 %vm903_vm0, %v1306_v23  ;;  %6908 = vrcp.f32 %v1197_v14  ;;  %v1241_v40 = vrot.slane %v7967_v17, 1 }
 0x26a   :  { %v1272_v28 = vadd.f32 %v1271_v27, %v1270_v31  ;;  %5970 = vmatmul.mubr.msk.f32.gmra.mrb[6].mxu0 %vm903_vm0, %v1307_v54  ;;  %6910 = vrcp.f32 %v1206_v19  ;;  %v1250_v44 = vrot.slane %v1249_v55, 1  ;;  %v1259_v46 = vrot.slane %v1258_v52, 1 }
 0x26b   :  { %v6899_v1 = vpop.eup %6898  ;;  %v1265_v15 = vadd.f32 %v1264_v35, %v1263_v12  ;;  %6912 = vrcp.f32 %v1215_v10  ;;  %v1242_v3 = vadd.f32 %v1241_v40, %v7967_v17 }
 0x26c   :  { %v1273_v11 = vrot.slane %v1272_v28, 4  ;;  %v1308_v58 = vmul.f32 %v6899_v1, %v7700_v63  ;;  %v1309_v36 = vmul.f32 %v6899_v1, %v7706_v2  ;;  %6914 = vrcp.f32 %v1224_v61 }
 0x26d   :  { %v1266_v5 = vrot.slane %v1265_v15, 2  ;;  %6916 = vrcp.f32 %v1233_v62  ;;  %v1251_v9 = vadd.f32 %v1250_v44, %v1249_v55  ;;  %v1260_v37 = vadd.f32 %v1259_v46, %v1258_v52 }
 0x26e   :  { %v6901_v42 = vpop.eup %6900  ;;  %v1274_v4 = vadd.f32 %v1273_v11, %v1272_v28  ;;  %5972 = vmatprep.mubr.msk.f32.mxu0 %vm903_vm0, %v1308_v58  ;;  %6918 = vrcp.f32 %v1242_v3 }
 0x26f   :  { %v8015_v59 = vpop.eup %6902  ;;  %v1267_v14 = vadd.f32 %v1266_v5, %v1265_v15  ;;  %5973 = vmatmul.mubr.msk.f32.gmra.mrb[8].mxu0 %vm903_vm0, %v1309_v36  ;;  %v1310_v17 = vmul.f32 %v6901_v42, %v7723_v25  ;;  %v1311_v63 = vmul.f32 %v6901_v42, %v7728_v33  ;;  %6920 = vrcp.f32 %v1251_v9  ;;  %v5119_v5 = vld [vmem:[%s9726_s3 + $0x108] sm:$0xff] }
 0x270   :  { %v8020_v2 = vpop.eup %6904  ;;  %v1275_v19 = vrot.slane %v1274_v4, 2  ;;  %v1279_v55 = vsel %vm903_vm0, %v8015_v59, 0.0  ;;  %6922 = vrcp.f32 %v1260_v37 }
 0x271   :  { %v1280_v16 = vsel %vm903_vm0, %v8020_v2, 0.0  ;;  %5975 = vmatprep.mubr.msk.f32.mxu0 %vm903_vm0, %v1310_v17  ;;  %v1268_v21 = vrot.slane %v1267_v14, 1 }
 0x272   :  { %v6907_v43 = vpop.eup %6906  ;;  %v1276_v30 = vadd.f32 %v1275_v19, %v1274_v4  ;;  %v1281_v34 = vadd.f32 %v1280_v16, %v1279_v55 }
 0x273   :  { %v6909_v25 = vpop.eup %6908  ;;  %5976 = vmatmul.mubr.msk.f32.gmra.mrb[10].mxu0 %vm903_vm0, %v1311_v63  ;;  %v1312_v33 = vmul.f32 %v6907_v43, %v7746_v20  ;;  %v1313_v41 = vmul.f32 %v6907_v43, %v7753_v0  ;;  %v1269_v10 = vadd.f32 %v1268_v21, %v1267_v14 }
 0x274   :  { %v6911_v39 = vpop.eup %6910  ;;  %v1282_v52 = vrot.slane %v1281_v34, 4  ;;  %v1314_v12 = vmul.f32 %v6909_v25, %v7787_v29  ;;  %v1315_v23 = vmul.f32 %v6909_v25, %v7792_v49  ;;  %v1277_v54 = vrot.slane %v1276_v30, 1 }
 0x275   :  { %v6913_v31 = vpop.eup %6912  ;;  %5978 = vmatprep.mubr.msk.f32.mxu0 %vm903_vm0, %v1312_v33  ;;  %v1316_v61 = vmul.f32 %v6911_v39, %v7815_v38  ;;  %v1317_v62 = vmul.f32 %v6911_v39, %v7822_v8  ;;  %6924 = vrcp.f32 %v1269_v10 }
 0x276   :  { %v6915_v35 = vpop.eup %6914  ;;  %v1283_v20 = vadd.f32 %v1282_v52, %v1281_v34  ;;  %v1318_v0 = vmul.f32 %v6913_v31, %v7844_v47  ;;  %v1319_v27 = vmul.f32 %v6913_v31, %v7846_v45  ;;  %v1278_v40 = vadd.f32 %v1277_v54, %v1276_v30 }
 0x277   :  { %v6917_v28 = vpop.eup %6916  ;;  %5979 = vmatmul.mubr.msk.f32.gmra.mrb[12].mxu0 %vm903_vm0, %v1313_v41  ;;  %v1320_v29 = vmul.f32 %v6915_v35, %v7901_v26  ;;  %v1321_v49 = vmul.f32 %v6915_v35, %v7908_v22 }
 0x278   :  { %v6919_v44 = vpop.eup %6918  ;;  %v1284_v46 = vrot.slane %v1283_v20, 2  ;;  %5981 = vmatprep.mubr.msk.f32.mxu0 %vm903_vm0, %v1314_v12  ;;  %v1322_v38 = vmul.f32 %v6917_v28, %v7926_v32  ;;  %v1323_v8 = vmul.f32 %v6917_v28, %v7930_v51  ;;  %6926 = vrcp.f32 %v1278_v40 }
 0x279   :  { %v6921_v47 = vpop.eup %6920  ;;  %v1324_v45 = vmul.f32 %v6919_v44, %v7934_v53  ;;  %v1325_v1 = vmul.f32 %v6919_v44, %v7938_v60 }
 0x27a   :  { %v6923_v15 = vpop.eup %6922  ;;  %v1285_v3 = vadd.f32 %v1284_v46, %v1283_v20  ;;  %v1326_v26 = vmul.f32 %v6921_v47, %v7949_v18  ;;  %v1327_v22 = vmul.f32 %v6921_v47, %v7952_v24 }
 0x27b   :  { %5982 = vmatmul.mubr.msk.f32.gmra.mrb[14].mxu0 %vm903_vm0, %v1315_v23  ;;  %v1328_v11 = vmul.f32 %v6923_v15, %v7960_v7  ;;  %v1329_v32 = vmul.f32 %v6923_v15, %v7962_v48 }
 0x27c   :  { %5984 = vmatprep.mubr.msk.f32.mxu0 %vm903_vm0, %v1316_v61  ;;  %v1286_v51 = vrot.slane %v1285_v3, 1 }
 0x27e   :  { %v1287_v58 = vadd.f32 %v1286_v51, %v1285_v3 }
 0x27f   :  { %v6925_v36 = vpop.eup %6924  ;;  %5985 = vmatmul.mubr.msk.f32.gmra.mrb[16].mxu0 %vm903_vm0, %v1317_v62 }
 0x280   :  { %5987 = vmatprep.mubr.msk.f32.mxu0 %vm903_vm0, %v1318_v0  ;;  %v1330_v53 = vmul.f32 %v6925_v36, %v7982_v50  ;;  %v1331_v60 = vmul.f32 %v6925_v36, %v7988_v13  ;;  %6928 = vrcp.f32 %v1287_v58 }
 0x282   :  { %v6927_v18 = vpop.eup %6926 }
 0x283   :  { %5988 = vmatmul.mubr.msk.f32.gmra.mrb[18].mxu0 %vm903_vm0, %v1319_v27  ;;  %v1332_v24 = vmul.f32 %v6927_v18, %v7997_v57  ;;  %v1333_v7 = vmul.f32 %v6927_v18, %v8001_v6  ;;  %v8079_v57 = vld [vmem:[%s9725_s2 + $0x8] sm:$0xff]  ;;  %v5118_v6 = vld [vmem:[%s9726_s3 + $0x100] sm:$0xff] }
 0x284   :  { %5990 = vmatprep.mubr.msk.f32.mxu0 %vm903_vm0, %v1320_v29  ;;  %1757 = vmatprep.mubr.f32.mxu1 %v8079_v57  ;;  %v6574_v9 = vpack.c.bf16 %v5119_v5, %v5118_v6 }
 0x286   :  { %6575 = vmatprep.subr.bf16.mxu0 %v6574_v9 }
 0x287   :  { %5991 = vmatmul.mubr.msk.f32.gmra.mrb[20].mxu0 %vm903_vm0, %v1321_v49 }
 0x288   :  { %5993 = vmatprep.mubr.msk.f32.mxu0 %vm903_vm0, %v1322_v38  ;;  %6577 = vmatpush3.bf16.msra.mxu0 %v6574_v9 }
 0x28a   :  { %v6929_v48 = vpop.eup %6928 }
 0x28b   :  { %5994 = vmatmul.mubr.msk.f32.gmra.mrb[22].mxu0 %vm903_vm0, %v1323_v8  ;;  %v1334_v50 = vmul.f32 %v6929_v48, %v8015_v59  ;;  %v1335_v13 = vmul.f32 %v6929_v48, %v8020_v2  ;;  %v9751_v59 = vld [vmem:[#allocation9_spill] sm:$0xff] }
 0x28c   :  { %5996 = vmatprep.mubr.msk.f32.mxu0 %vm903_vm0, %v1324_v45 }
 0x28f   :  { %5997 = vmatmul.mubr.msk.f32.gmra.mrb[24].mxu0 %vm903_vm0, %v1325_v1 }
 0x290   :  { %5999 = vmatprep.mubr.msk.f32.mxu0 %vm903_vm0, %v1326_v26 }
 0x293   :  { %6000 = vmatmul.mubr.msk.f32.gmra.mrb[26].mxu0 %vm903_vm0, %v1327_v22 }
 0x294   :  { %6002 = vmatprep.mubr.msk.f32.mxu0 %vm903_vm0, %v1328_v11 }
 0x297   :  { %6003 = vmatmul.mubr.msk.f32.gmra.mrb[28].mxu0 %vm903_vm0, %v1329_v32 }
 0x298   :  { %6005 = vmatprep.mubr.msk.f32.mxu0 %vm903_vm0, %v1330_v53 }
 0x29b   :  { %6006 = vmatmul.mubr.msk.f32.gmra.mrb[30].mxu0 %vm903_vm0, %v1331_v60 }
 0x29c   :  { %6008 = vmatprep.mubr.msk.f32.mxu0 %vm903_vm0, %v1332_v24 }
 0x29f   :  { %6009 = vmatmul.mubr.msk.f32.gmra.mrb[32].mxu0 %vm903_vm0, %v1333_v7 }
 0x2a0   :  { %6011 = vmatprep.mubr.msk.f32.mxu0 %vm903_vm0, %v1334_v50 }
 0x2a3   :  { %6012 = vmatmul.mubr.msk.f32.gmra.mrb[34].mxu0 %vm903_vm0, %v1335_v13 }
 0x338   :  { %v5968_v37 = vpop.f32.mrb[4].mxu0 }
 0x339   :  { %v1658_v42 = vmul.f32 %v5968_v37, %v7489_v56  ;;  %v1498_v4 = vpop.f32.mrb[5].mxu0 }
 0x33a   :  { %v1657_v14 = vmul.f32 %v1498_v4, %v9751_v59 }
 0x33c   :  { %v6544_v17 = vpack.c.bf16 %v1658_v42, %v1657_v14 }
 0x33d   :  { %v5971_v63 = vpop.f32.mrb[6].mxu0 }
 0x33e   :  { %v1660_v2 = vmul.f32 %v5971_v63, %v7489_v56  ;;  %v1508_v19 = vpop.f32.mrb[7].mxu0 }
 0x33f   :  { %v1659_v55 = vmul.f32 %v1508_v19, %v9751_v59 }
 0x341   :  { %v6548_v16 = vpack.c.bf16 %v1660_v2, %v1659_v55 }
 0x342   :  { %v5974_v21 = vpop.f32.mrb[8].mxu0 }
 0x343   :  { %v1662_v43 = vmul.f32 %v5974_v21, %v7489_v56  ;;  %v1518_v30 = vpop.f32.mrb[9].mxu0 }
 0x344   :  { %v1661_v34 = vmul.f32 %v1518_v30, %v9751_v59 }
 0x346   :  { %v6552_v25 = vpack.c.bf16 %v1662_v43, %v1661_v34  ;;  %v5977_v33 = vpop.f32.mrb[10].mxu0 }
 0x347   :  { %v1664_v41 = vmul.f32 %v5977_v33, %v7489_v56  ;;  %v1528_v10 = vpop.f32.mrb[11].mxu0 }
 0x348   :  { %v1663_v39 = vmul.f32 %v1528_v10, %v9751_v59  ;;  %v5134_v10 = vld [vmem:[%s9726_s3 + $0x180] sm:$0xff] }
 0x34a   :  { %v6556_v52 = vpack.c.bf16 %v1664_v41, %v1663_v39  ;;  %v5980_v12 = vpop.f32.mrb[12].mxu0  ;;  %v5135_v39 = vld [vmem:[%s9726_s3 + $0x188] sm:$0xff] }
 0x34b   :  { %v1666_v23 = vmul.f32 %v5980_v12, %v7489_v56  ;;  %v1538_v54 = vpop.f32.mrb[13].mxu0 }
 0x34c   :  { %v1665_v31 = vmul.f32 %v1538_v54, %v9751_v59  ;;  %v61_v54 = vld [vmem:[%s9725_s2 + $0x18] sm:$0xff] }
 0x34e   :  { %v6560_v61 = vpack.c.bf16 %v1666_v23, %v1665_v31  ;;  %v5983_v62 = vpop.f32.mrb[14].mxu0  ;;  %v6606_v23 = vpack.c.bf16 %v5135_v39, %v5134_v10  ;;  %v5120_v31 = vld [vmem:[%s9726_s3 + $0x110] sm:$0xff] }
 0x34f   :  { %v1668_v35 = vmul.f32 %v5983_v62, %v7489_v56  ;;  %v1548_v20 = vpop.f32.mrb[15].mxu0  ;;  %v5136_v62 = vld [vmem:[%s9726_s3 + $0x190] sm:$0xff] }
 0x350   :  { %v1667_v0 = vmul.f32 %v1548_v20, %v9751_v59  ;;  %v5137_v20 = vld [vmem:[%s9726_s3 + $0x198] sm:$0xff] }
 0x352   :  { %v6564_v27 = vpack.c.bf16 %v1668_v35, %v1667_v0  ;;  %v5986_v40 = vpop.f32.mrb[16].mxu0  ;;  %v6610_v0 = vpack.c.bf16 %v5137_v20, %v5136_v62  ;;  %v5158_v20 = vld [vmem:[%s9728_s5 + $0xa0] sm:$0xff] }
 0x353   :  { %v8101_v28 = vmul.f32 %v5986_v40, %v7489_v56  ;;  %v1558_v29 = vpop.f32.mrb[17].mxu0  ;;  %v5123_v40 = vld [vmem:[%s9726_s3 + $0x128] sm:$0xff] }
 0x354   :  { %v1669_v49 = vmul.f32 %v1558_v29, %v9751_v59 }
 0x356   :  { %v6568_v44 = vpack.c.bf16 %v8101_v28, %v1669_v49  ;;  %v5989_v46 = vpop.f32.mrb[18].mxu0  ;;  %v5138_v28 = vld [vmem:[%s9726_s3 + $0x1a0] sm:$0xff]  ;;  %v5139_v49 = vld [vmem:[%s9726_s3 + $0x1a8] sm:$0xff] }
 0x357   :  { %v1672_v38 = vmul.f32 %v5989_v46, %v7489_v56  ;;  %v1568_v8 = vpop.f32.mrb[19].mxu0  ;;  %v5124_v46 = vld [vmem:[%s9726_s3 + $0x130] sm:$0xff] }
 0x358   :  { %v1671_v47 = vmul.f32 %v1568_v8, %v9751_v59  ;;  %v5140_v8 = vld [vmem:[%s9726_s3 + $0x1b0] sm:$0xff] }
 0x35a   :  { %v6572_v45 = vpack.c.bf16 %v1672_v38, %v1671_v47  ;;  %v5992_v1 = vpop.f32.mrb[20].mxu0  ;;  %v5125_v38 = vld [vmem:[%s9726_s3 + $0x138] sm:$0xff] }
 0x35b   :  { %v1674_v15 = vmul.f32 %v5992_v1, %v7489_v56  ;;  %v1578_v3 = vpop.f32.mrb[21].mxu0  ;;  %v6586_v47 = vpack.c.bf16 %v5125_v38, %v5124_v46  ;;  %v5164_v38 = vld [vmem:[%s9728_s5 + $0xd0] sm:$0xff] }
 0x35c   :  { %v1673_v26 = vmul.f32 %v1578_v3, %v9751_v59  ;;  %v5127_v3 = vld [vmem:[%s9726_s3 + $0x148] sm:$0xff] }
 0x35e   :  { %v6542_v22 = vpack.c.bf16 %v1674_v15, %v1673_v26  ;;  %v5995_v11 = vpop.f32.mrb[22].mxu0  ;;  %v5126_v15 = vld [vmem:[%s9726_s3 + $0x140] sm:$0xff] }
 0x35f   :  { %v1676_v32 = vmul.f32 %v5995_v11, %v7489_v56  ;;  %v1588_v51 = vpop.f32.mrb[23].mxu0  ;;  %v5142_v26 = vld [vmem:[%s9726_s3 + $0x1c0] sm:$0xff]  ;;  %v5143_v11 = vld [vmem:[%s9726_s3 + $0x1c8] sm:$0xff] }
 0x360   :  { %v1675_v58 = vmul.f32 %v1588_v51, %v9751_v59  ;;  %6543 = vmatprep.subr.bf16.mxu1 %v6542_v22  ;;  %v6590_v22 = vpack.c.bf16 %v5127_v3, %v5126_v15  ;;  %v5128_v51 = vld [vmem:[%s9726_s3 + $0x150] sm:$0xff] }
 0x361   :  { %6545 = vmatpush3.bf16.msra.mxu1 %v6544_v17  ;;  %v5168_v3 = vld [vmem:[%s9728_s5 + $0xf0] sm:$0xff] }
 0x362   :  { %v6546_v36 = vpack.c.bf16 %v1676_v32, %v1675_v58  ;;  %v5998_v53 = vpop.f32.mrb[24].mxu0  ;;  %v6622_v32 = vpack.c.bf16 %v5143_v11, %v5142_v26  ;;  %v5129_v58 = vld [vmem:[%s9726_s3 + $0x158] sm:$0xff] }
 0x363   :  { %v1678_v60 = vmul.f32 %v5998_v53, %v7489_v56  ;;  %v1598_v18 = vpop.f32.mrb[25].mxu0  ;;  %v6594_v53 = vpack.c.bf16 %v5129_v58, %v5128_v51  ;;  %v5169_v26 = vld [vmem:[%s9728_s5 + $0xf8] sm:$0xff] }
 0x364   :  { %v1677_v24 = vmul.f32 %v1598_v18, %v9751_v59  ;;  %6547 = vmatprep.subr.bf16.mxu1 %v6546_v36  ;;  %v5144_v36 = vld [vmem:[%s9726_s3 + $0x1d0] sm:$0xff]  ;;  %v5130_v18 = vld [vmem:[%s9726_s3 + $0x160] sm:$0xff]  ;;  %v5171_v11 = vld [vmem:[%s9727_s4 + $0x19] ss:$0 sm:$0xff] }
 0x365   :  { %6549 = vmatpush3.bf16.msra.mxu1 %v6548_v16 }
 0x366   :  { %v6550_v7 = vpack.c.bf16 %v1678_v60, %v1677_v24  ;;  %v6001_v48 = vpop.f32.mrb[26].mxu0  ;;  %v5145_v60 = vld [vmem:[%s9726_s3 + $0x1d8] sm:$0xff]  ;;  %v5131_v24 = vld [vmem:[%s9726_s3 + $0x168] sm:$0xff] }
 0x367   :  { %v1680_v50 = vmul.f32 %v6001_v48, %v7489_v56  ;;  %v1608_v13 = vpop.f32.mrb[27].mxu0  ;;  %v6598_v48 = vpack.c.bf16 %v5131_v24, %v5130_v18  ;;  %v9752_v18 = vld [vmem:[#allocation7_spill] sm:$0xff] }
 0x368   :  { %v1679_v6 = vmul.f32 %v1608_v13, %v9751_v59  ;;  %6551 = vmatprep.subr.bf16.mxu1 %v6550_v7  ;;  %v6626_v7 = vpack.c.bf16 %v5145_v60, %v5144_v36  ;;  %v5147_v13 = vld [vmem:[%s9726_s3 + $0x1e8] sm:$0xff] }
 0x369   :  { %6553 = vmatpush3.bf16.msra.mxu1 %v6552_v25 }
 0x36a   :  { %v6554_v5 = vpack.c.bf16 %v1680_v50, %v1679_v6  ;;  %v6004_v9 = vpop.f32.mrb[28].mxu0  ;;  %v5146_v50 = vld [vmem:[%s9726_s3 + $0x1e0] sm:$0xff]  ;;  %v5132_v6 = vld [vmem:[%s9726_s3 + $0x170] sm:$0xff] }
 0x36b   :  { %v1682_v37 = vmul.f32 %v6004_v9, %v7489_v56  ;;  %v1618_v42 = vpop.f32.mrb[29].mxu0  ;;  %v5133_v9 = vld [vmem:[%s9726_s3 + $0x178] sm:$0xff] }
 0x36c   :  { %v1681_v4 = vmul.f32 %v1618_v42, %v9751_v59  ;;  %6555 = vmatprep.subr.bf16.mxu1 %v6554_v5  ;;  %v6630_v5 = vpack.c.bf16 %v5147_v13, %v5146_v50  ;;  %v5148_v42 = vld [vmem:[%s9726_s3 + $0x1f0] sm:$0xff]  ;;  %v5170_v50 = vld [vmem:[%s9727_s4 + $0x18] ss:$0 sm:$0xff] }
 0x36d   :  { %6557 = vmatpush3.bf16.msra.mxu1 %v6556_v52 }
 0x36e   :  { %v6558_v14 = vpack.c.bf16 %v1682_v37, %v1681_v4  ;;  %v6007_v17 = vpop.f32.mrb[30].mxu0  ;;  %v6602_v37 = vpack.c.bf16 %v5133_v9, %v5132_v6  ;;  %v5149_v4 = vld [vmem:[%s9726_s3 + $0x1f8] sm:$0xff] }
 0x36f   :  { %v1684_v63 = vmul.f32 %v6007_v17, %v7489_v56  ;;  %v1628_v2 = vpop.f32.mrb[31].mxu0  ;;  %v5154_v17 = vld [vmem:[%s9728_s5 + $0x80] sm:$0xff] }
 0x370   :  { %v1683_v19 = vmul.f32 %v1628_v2, %v9751_v59  ;;  %6559 = vmatprep.subr.bf16.mxu1 %v6558_v14  ;;  %v6634_v14 = vpack.c.bf16 %v5149_v4, %v5148_v42  ;;  %v9755_v4 = vld [vmem:[#allocation8_spill] sm:$0xff] }
 0x371   :  { %6561 = vmatpush3.bf16.msra.mxu1 %v6560_v61  ;;  %v5121_v61 = vld [vmem:[%s9726_s3 + $0x118] sm:$0xff] }
 0x372   :  { %v6562_v55 = vpack.c.bf16 %v1684_v63, %v1683_v19  ;;  %v6010_v16 = vpop.f32.mrb[32].mxu0  ;;  %v6578_v35 = vpack.c.bf16 %v5121_v61, %v5120_v31  ;;  %v5155_v63 = vld [vmem:[%s9728_s5 + $0x88] sm:$0xff] }
 0x373   :  { %v1686_v21 = vmul.f32 %v6010_v16, %v7489_v56  ;;  %v1638_v43 = vpop.f32.mrb[33].mxu0  ;;  %v6638_v2 = vpack.c.bf16 %v5155_v63, %v5154_v17 }
 0x374   :  { %v1685_v30 = vmul.f32 %v1638_v43, %v9751_v59  ;;  %6563 = vmatprep.subr.bf16.mxu1 %v6562_v55  ;;  %6579 = vmatprep.subr.bf16.mxu0 %v6578_v35  ;;  %v5115_v55 = vld [vmem:[%s9727_s4 + $0xa] ss:$0 sm:$0xff] }
 0x375   :  { %6565 = vmatpush3.bf16.msra.mxu1 %v6564_v27  ;;  %6581 = vmatpush3.bf16.msra.mxu0 %v6578_v35  ;;  %v5122_v27 = vld [vmem:[%s9726_s3 + $0x120] sm:$0xff] }
 0x376   :  { %v6566_v34 = vpack.c.bf16 %v1686_v21, %v1685_v30  ;;  %v6013_v25 = vpop.f32.mrb[34].mxu0  ;;  %v6582_v29 = vpack.c.bf16 %v5123_v40, %v5122_v27  ;;  %v5160_v40 = vld [vmem:[%s9728_s5 + $0xb0] sm:$0xff] }
 0x377   :  { %v1688_v33 = vmul.f32 %v6013_v25, %v7489_v56  ;;  %v1648_v41 = vpop.f32.mrb[35].mxu0  ;;  %v58_v56 = vld [vmem:[%s9725_s2] sm:$0xff] }
 0x378   :  { %v1687_v52 = vmul.f32 %v1648_v41, %v9751_v59  ;;  %6567 = vmatprep.subr.bf16.mxu1 %v6566_v34  ;;  %v60_v59 = vld [vmem:[%s9725_s2 + $0x10] sm:$0xff]  ;;  %6583 = vmatprep.subr.bf16.mxu0 %v6582_v29 }
 0x379   :  { %6569 = vmatpush3.bf16.msra.mxu1 %v6568_v44  ;;  %v6614_v44 = vpack.c.bf16 %v5139_v49, %v5138_v28  ;;  %6585 = vmatpush3.bf16.msra.mxu0 %v6582_v29  ;;  %v5161_v28 = vld [vmem:[%s9728_s5 + $0xb8] sm:$0xff]  ;;  %v5162_v49 = vld [vmem:[%s9728_s5 + $0xc0] sm:$0xff] }
 0x37a   :  { %v6570_v12 = vpack.c.bf16 %v1688_v33, %v1687_v52  ;;  %6587 = vmatprep.subr.bf16.mxu0 %v6586_v47  ;;  %v6650_v29 = vpack.c.bf16 %v5161_v28, %v5160_v40 }
 0x37c   :  { %6571 = vmatprep.subr.bf16.mxu1 %v6570_v12 }
 0x37d   :  { %6573 = vmatpush3.bf16.msra.mxu1 %v6572_v45  ;;  %v5141_v45 = vld [vmem:[%s9726_s3 + $0x1b8] sm:$0xff]  ;;  %6589 = vmatpush3.bf16.msra.mxu0 %v6586_v47 }
 0x37e   :  { %6607 = vmatprep.subr.bf16.mxu1 %v6606_v23  ;;  %v6618_v1 = vpack.c.bf16 %v5141_v45, %v5140_v8  ;;  %6591 = vmatprep.subr.bf16.mxu0 %v6590_v22  ;;  %v5165_v8 = vld [vmem:[%s9728_s5 + $0xd8] sm:$0xff]  ;;  %v5166_v45 = vld [vmem:[%s9728_s5 + $0xe0] sm:$0xff] }
 0x37f   :  { %v6658_v47 = vpack.c.bf16 %v5165_v8, %v5164_v38 }
 0x380   :  { %1758 = vmatmul.mubr.f32.vlgmr.msra.gmra.mrb[34].mxu1 %v58_v56 }
 0x381   :  { %1762 = vmatprep.mubr.f32.mxu1 %v61_v54  ;;  %6609 = vmatpush3.bf16.msra.mxu1 %v6606_v23  ;;  %v5156_v54 = vld [vmem:[%s9728_s5 + $0x90] sm:$0xff] }
 0x382   :  { %6611 = vmatprep.subr.bf16.mxu1 %v6610_v0  ;;  %6593 = vmatpush3.bf16.msra.mxu0 %v6590_v22  ;;  %v6666_v22 = vpack.c.bf16 %v5169_v26, %v5168_v3 }
 0x383   :  { %6595 = vmatprep.subr.bf16.mxu0 %v6594_v53 }
 0x384   :  { %1763 = vmatmul.mubr.f32.gmra.mrb[36].mxu1 %v60_v59  ;;  %v5157_v59 = vld [vmem:[%s9728_s5 + $0x98] sm:$0xff] }
 0x385   :  { %6613 = vmatpush3.bf16.msra.mxu1 %v6610_v0  ;;  %v6642_v62 = vpack.c.bf16 %v5157_v59, %v5156_v54  ;;  %v5159_v0 = vld [vmem:[%s9728_s5 + $0xa8] sm:$0xff] }
 0x386   :  { %6615 = vmatprep.subr.bf16.mxu1 %v6614_v44  ;;  %6597 = vmatpush3.bf16.msra.mxu0 %v6594_v53  ;;  %v6646_v27 = vpack.c.bf16 %v5159_v0, %v5158_v20 }
 0x387   :  { %6599 = vmatprep.subr.bf16.mxu0 %v6598_v48 }
 0x389   :  { %6617 = vmatpush3.bf16.msra.mxu1 %v6614_v44  ;;  %v5163_v44 = vld [vmem:[%s9728_s5 + $0xc8] sm:$0xff] }
 0x38a   :  { %6619 = vmatprep.subr.bf16.mxu1 %v6618_v1  ;;  %6601 = vmatpush3.bf16.msra.mxu0 %v6598_v48  ;;  %v6654_v46 = vpack.c.bf16 %v5163_v44, %v5162_v49 }
 0x38b   :  { %6603 = vmatprep.subr.bf16.mxu0 %v6602_v37 }
 0x38d   :  { %6621 = vmatpush3.bf16.msra.mxu1 %v6618_v1  ;;  %v5167_v1 = vld [vmem:[%s9728_s5 + $0xe8] sm:$0xff] }
 0x38e   :  { %6623 = vmatprep.subr.bf16.mxu1 %v6622_v32  ;;  %6605 = vmatpush3.bf16.msra.mxu0 %v6602_v37  ;;  %v6662_v15 = vpack.c.bf16 %v5167_v1, %v5166_v45 }
 0x38f   :  { %6639 = vmatprep.subr.bf16.mxu0 %v6638_v2 }
 0x391   :  { %6625 = vmatpush3.bf16.msra.mxu1 %v6622_v32 }
 0x392   :  { %6627 = vmatprep.subr.bf16.mxu1 %v6626_v7 }
 0x395   :  { %6629 = vmatpush3.bf16.msra.mxu1 %v6626_v7 }
 0x396   :  { %6631 = vmatprep.subr.bf16.mxu1 %v6630_v5 }
 0x399   :  { %6633 = vmatpush3.bf16.msra.mxu1 %v6630_v5 }
 0x39a   :  { %6635 = vmatprep.subr.bf16.mxu1 %v6634_v14 }
 0x39d   :  { %6637 = vmatpush3.bf16.msra.mxu1 %v6634_v14 }
 0x453   :  { %v5463_v19 = vpop.f32.mrb[34].mxu1 }
 0x454   :  { %v5464_v16 = vpop.f32.mrb[35].mxu1 }
 0x455   :  { %v5465_v21 = vadd.f32 %v5464_v16, %v5463_v19 }
 0x457   :  { %v1760_v43 = vadd.f32 %v5465_v21, %v5115_v55  ;;  %v5466_v30 = vpop.f32.mrb[36].mxu1 }
 0x458   :  { %v5467_v34 = vpop.f32.mrb[37].mxu1 }
 0x459   :  { %v1770_v25 = vmin.f32 %v1760_v43, 0.0  ;;  %v5468_v33 = vadd.f32 %v5467_v34, %v5466_v30  ;;  %vm1768_vm1 = vcmp.gt.f32.partialorder %v1760_v43, 0.0 }
 0x45b   :  { %v1772_v41 = vmul.f32 1.442695, %v1770_v25  ;;  %v1765_v10 = vadd.f32 %v5468_v33, %v5115_v55 }
 0x45d   :  { %6930 = vpow2.f32 %v1772_v41  ;;  %v1771_v39 = vmin.f32 %v1765_v10, 0.0  ;;  %vm1769_vm2 = vcmp.gt.f32.partialorder %v1765_v10, 0.0 }
 0x45f   :  { %v1774_v52 = vmul.f32 1.442695, %v1771_v39 }
 0x461   :  { %6932 = vpow2.f32 %v1774_v52 }
 0x467   :  { %v6931_v12 = vpop.eup %6930 }
 0x468   :  { %v5116_v23 = vadd.f32 -1.0, %v6931_v12 }
 0x46a   :  { %v1778_v56 = vsel %vm1768_vm1, %v1760_v43, %v5116_v23 }
 0x46b   :  { %v6933_v31 = vpop.eup %6932  ;;  %6046 = vmatprep.mubr.f32.mxu0 %v1778_v56  ;;  %6081 = vmatprep.mubr.f32.mxu1 %v1778_v56 }
 0x46c   :  { %v5117_v61 = vadd.f32 -1.0, %v6933_v31 }
 0x46e   :  { %v1779_v35 = vsel %vm1769_vm2, %v1765_v10, %v5117_v61 }
 0x46f   :  { %6047 = vmatmul.mubr.f32.vlgmr.msra.gmra.mrb[36].mxu0 %v1779_v35  ;;  %6082 = vmatmul.mubr.f32.vlgmr.msra.gmra.mrb[38].mxu1 %v1779_v35 }
 0x470   :  { %6641 = vmatpush3.bf16.msra.mxu0 %v6638_v2 }
 0x471   :  { %6643 = vmatprep.subr.bf16.mxu0 %v6642_v62 }
 0x474   :  { %6645 = vmatpush3.bf16.msra.mxu0 %v6642_v62 }
 0x475   :  { %6647 = vmatprep.subr.bf16.mxu0 %v6646_v27 }
 0x478   :  { %6649 = vmatpush3.bf16.msra.mxu0 %v6646_v27 }
 0x479   :  { %6651 = vmatprep.subr.bf16.mxu0 %v6650_v29 }
 0x47c   :  { %6653 = vmatpush3.bf16.msra.mxu0 %v6650_v29 }
 0x47d   :  { %6655 = vmatprep.subr.bf16.mxu0 %v6654_v46 }
 0x480   :  { %6657 = vmatpush3.bf16.msra.mxu0 %v6654_v46 }
 0x481   :  { %6659 = vmatprep.subr.bf16.mxu0 %v6658_v47 }
 0x484   :  { %6661 = vmatpush3.bf16.msra.mxu0 %v6658_v47 }
 0x485   :  { %6663 = vmatprep.subr.bf16.mxu0 %v6662_v15 }
 0x488   :  { %6665 = vmatpush3.bf16.msra.mxu0 %v6662_v15 }
 0x489   :  { %6667 = vmatprep.subr.bf16.mxu0 %v6666_v22 }
 0x48c   :  { %6669 = vmatpush3.bf16.msra.mxu0 %v6666_v22 }
 0x542   :  { %v6048_v32 = vpop.f32.mrb[36].mxu0  ;;  %v6083_v51 = vpop.f32.mrb[38].mxu1 }
 0x543   :  { %v1906_v58 = vpop.f32.mrb[37].mxu0  ;;  %v1985_v36 = vpop.f32.mrb[39].mxu1  ;;  %v8283_v9 = vadd.f32 %v6048_v32, %v5170_v50  ;;  %v8301_v61 = vadd.f32 %v6083_v51, %v5171_v11 }
 0x544   :  { %v1986_v53 = vadd.f32 %v5171_v11, %v1985_v36  ;;  %v8285_v37 = vadd.f32 %v5170_v50, %v1906_v58 }
 0x545   :  { %9753 = vst [vmem:[#allocation9_spill] sm:$0xff] %v8283_v9  ;;  %v2052_v49 = vrot.slane %v8301_v61, %v9752_v18 }
 0x546   :  { %v1996_v60 = vcombine.high %v1986_v53, %v1986_v53  ;;  %v2003_v24 = vrot.slane %v1986_v53, %v9752_v18  ;;  %9754 = vst [vmem:[#allocation10_spill] sm:$0xff] %v8285_v37 }
 0x547   :  { %v2060_v3 = vcombine.high %v2052_v49, %v2052_v49  ;;  %v2068_v26 = vrot.slane %v2052_v49, %v9752_v18 }
 0x548   :  { %v2011_v7 = vcombine.high %v2003_v24, %v2003_v24  ;;  %v2019_v48 = vrot.slane %v2003_v24, %v9752_v18  ;;  %v2010_v13 = vrot.slane %v1996_v60, %v9752_v18 }
 0x549   :  { %v2129_v60 = vrot.slane %v2068_v26, %v9755_v4  ;;  %v2082_v24 = vrot.slane %v2060_v3, %v9752_v18 }
 0x54a   :  { %v2033_v6 = vrot.slane %v2011_v7, %v9752_v18  ;;  %v2041_v5 = vcombine.high %v2019_v48, %v2019_v48  ;;  %v2097_v14 = vrot.slane %v2019_v48, %v9755_v4  ;;  %v2012_v2 = vcombine.high %v2010_v13, %v2010_v13 }
 0x54b   :  { %v2026_v19 = vrot.slane %v2010_v13, %v9752_v18 }
 0x54c   :  { %v2043_v42 = vcombine.high %v2033_v6, %v2033_v6  ;;  %v2101_v17 = vrot.slane %v2033_v6, %v9755_v4  ;;  %v2105_v63 = vrot.slane %v2041_v5, %v9755_v4  ;;  %v2174_v55 = vadd.f32 %v2097_v14, %v8285_v37 }
 0x54d   :  { %v2175_v16 = vadd.f32 %v2097_v14, %v8283_v9  ;;  %v2040_v12 = vrot.slane %v2012_v2, %v9752_v18  ;;  %v2113_v31 = vrot.slane %v2026_v19, %v9755_v4  ;;  %v2042_v27 = vcombine.high %v2026_v19, %v2026_v19 }
 0x54e   :  { %v2176_v21 = vadd.f32 %v2101_v17, %v8285_v37  ;;  %v2177_v43 = vadd.f32 %v2101_v17, %v8283_v9  ;;  %v2178_v30 = vadd.f32 %v2105_v63, %v8285_v37  ;;  %v2109_v34 = vrot.slane %v2043_v42, %v9755_v4 }
 0x54f   :  { %vm2206_vm3 = vcmp.gt.f32.partialorder %v2174_v55, 0.0  ;;  %v2238_v25 = vmul.f32 0.2, %v2174_v55  ;;  %vm2207_vm4 = vcmp.gt.f32.partialorder %v2175_v16, 0.0  ;;  %v2239_v33 = vmul.f32 0.2, %v2175_v16 }
 0x550   :  { %vm2208_vm5 = vcmp.gt.f32.partialorder %v2176_v21, 0.0  ;;  %v2240_v41 = vmul.f32 0.2, %v2176_v21  ;;  %v2179_v52 = vadd.f32 %v2105_v63, %v8283_v9  ;;  %v2241_v56 = vmul.f32 0.2, %v2177_v43 }
 0x551   :  { %v2270_v10 = vsel %vm2206_vm3, %v2174_v55, %v2238_v25  ;;  %v2271_v39 = vsel %vm2207_vm4, %v2175_v16, %v2239_v33  ;;  %vm2209_vm6 = vcmp.gt.f32.partialorder %v2177_v43, 0.0  ;;  %v2242_v54 = vmul.f32 0.2, %v2178_v30 }
 0x552   :  { %6116 = vmatprep.mubr.f32.mxu0 %v2270_v10  ;;  %v2272_v23 = vsel %vm2208_vm5, %v2176_v21, %v2240_v41  ;;  %v2180_v59 = vadd.f32 %v2109_v34, %v8285_v37  ;;  %vm2210_vm7 = vcmp.gt.f32.partialorder %v2178_v30, 0.0  ;;  %v2243_v62 = vmul.f32 0.2, %v2179_v52 }
 0x553   :  { %6117 = vmatmul.mubr.f32.vlgmr.msra.gmra.mrb[38].mxu0 %v2271_v39  ;;  %v2273_v35 = vsel %vm2209_vm6, %v2177_v43, %v2241_v56  ;;  %vm2211_vm8 = vcmp.gt.f32.partialorder %v2179_v52, 0.0  ;;  %v2181_v20 = vadd.f32 %v2109_v34, %v8283_v9  ;;  %v2117_v0 = vrot.slane %v2040_v12, %v9755_v4 }
 0x554   :  { %6119 = vmatprep.mubr.f32.mxu0 %v2272_v23  ;;  %v2274_v40 = vsel %vm2210_vm7, %v2178_v30, %v2242_v54  ;;  %v2244_v28 = vmul.f32 0.2, %v2180_v59  ;;  %v2182_v29 = vadd.f32 %v2113_v31, %v8285_v37  ;;  %vm2212_vm9 = vcmp.gt.f32.partialorder %v2180_v59, 0.0 }
 0x555   :  { %v2275_v44 = vsel %vm2211_vm8, %v2179_v52, %v2243_v62  ;;  %vm2213_vm10 = vcmp.gt.f32.partialorder %v2181_v20, 0.0  ;;  %v2245_v46 = vmul.f32 0.2, %v2181_v20  ;;  %v2183_v38 = vadd.f32 %v2113_v31, %v8283_v9 }
 0x556   :  { %v2184_v8 = vadd.f32 %v2117_v0, %v8285_v37  ;;  %v2276_v47 = vsel %vm2212_vm9, %v2180_v59, %v2244_v28  ;;  %v2246_v45 = vmul.f32 0.2, %v2182_v29  ;;  %v2121_v1 = vrot.slane %v2042_v27, %v9755_v4 }
 0x557   :  { %6120 = vmatmul.mubr.f32.gmra.mrb[40].mxu0 %v2273_v35  ;;  %v2044_v15 = vcombine.high %v2040_v12, %v2040_v12  ;;  %vm2214_vm11 = vcmp.gt.f32.partialorder %v2182_v29, 0.0  ;;  %v2277_v22 = vsel %vm2213_vm10, %v2181_v20, %v2245_v46  ;;  %vm2215_vm12 = vcmp.gt.f32.partialorder %v2183_v38, 0.0 }
 0x558   :  { %6122 = vmatprep.mubr.f32.mxu0 %v2274_v40  ;;  %v2247_v11 = vmul.f32 0.2, %v2183_v38  ;;  %v2185_v32 = vadd.f32 %v2117_v0, %v8283_v9  ;;  %v2278_v51 = vsel %vm2214_vm11, %v2182_v29, %v2246_v45  ;;  %v2248_v58 = vmul.f32 0.2, %v2184_v8 }
 0x559   :  { %v2186_v36 = vadd.f32 %v2121_v1, %v8285_v37  ;;  %v2125_v53 = vrot.slane %v2044_v15, %v9755_v4  ;;  %vm2216_vm13 = vcmp.gt.f32.partialorder %v2184_v8, 0.0  ;;  %v2187_v50 = vadd.f32 %v2121_v1, %v8283_v9 }
 0x55a   :  { %v2279_v7 = vsel %vm2215_vm12, %v2183_v38, %v2247_v11  ;;  %v2249_v48 = vmul.f32 0.2, %v2185_v32  ;;  %v2280_v13 = vsel %vm2216_vm13, %v2184_v8, %v2248_v58  ;;  %vm2217_vm14 = vcmp.gt.f32.partialorder %v2185_v32, 0.0 }
 0x55b   :  { %6123 = vmatmul.mubr.f32.gmra.mrb[42].mxu0 %v2275_v44  ;;  %v2250_v6 = vmul.f32 0.2, %v2186_v36  ;;  %v2188_v5 = vadd.f32 %v2125_v53, %v8285_v37  ;;  %vm2218_vm15 = vcmp.gt.f32.partialorder %v2186_v36, 0.0  ;;  %v2045_v42 = vcombine.high %v8301_v61, %v8301_v61 }
 0x55c   :  { %6125 = vmatprep.mubr.f32.mxu0 %v2276_v47  ;;  %v2190_v14 = vadd.f32 %v2129_v60, %v8285_v37  ;;  %v2090_v17 = vcombine.high %v2068_v26, %v2068_v26  ;;  %v2281_v63 = vsel %vm2217_vm14, %v2185_v32, %v2249_v48  ;;  %v2251_v2 = vmul.f32 0.2, %v2187_v50 }
 0x55d   :  { %v2189_v19 = vadd.f32 %v2125_v53, %v8283_v9  ;;  %v2282_v55 = vsel %vm2218_vm15, %v2186_v36, %v2250_v6  ;;  %vm2219_vm1 = vcmp.gt.f32.partialorder %v2187_v50, 0.0  ;;  %v2252_v16 = vmul.f32 0.2, %v2188_v5 }
 0x55e   :  { %v2133_v21 = vrot.slane %v2082_v24, %v9755_v4  ;;  %vm2220_vm2 = vcmp.gt.f32.partialorder %v2188_v5, 0.0  ;;  %v2059_v43 = vrot.slane %v2045_v42, %v9752_v18  ;;  %v2092_v30 = vcombine.high %v2082_v24, %v2082_v24 }
 0x55f   :  { %6126 = vmatmul.mubr.f32.gmra.mrb[44].mxu0 %v2277_v22  ;;  %vm2222_vm3 = vcmp.gt.f32.partialorder %v2190_v14, 0.0  ;;  %v2283_v34 = vsel %vm2219_vm1, %v2187_v50, %v2251_v2  ;;  %v2253_v25 = vmul.f32 0.2, %v2189_v19  ;;  %v2254_v33 = vmul.f32 0.2, %v2190_v14 }
 0x560   :  { %6128 = vmatprep.mubr.f32.mxu0 %v2278_v51  ;;  %v2191_v41 = vadd.f32 %v2129_v60, %v8283_v9  ;;  %v2284_v10 = vsel %vm2220_vm2, %v2188_v5, %v2252_v16  ;;  %vm2221_vm4 = vcmp.gt.f32.partialorder %v2189_v19, 0.0  ;;  %v2192_v39 = vadd.f32 %v2133_v21, %v8285_v37 }
 0x561   :  { %v2137_v52 = vrot.slane %v2090_v17, %v9755_v4  ;;  %v2061_v12 = vcombine.high %v2059_v43, %v2059_v43  ;;  %v2075_v23 = vrot.slane %v2059_v43, %v9752_v18  ;;  %v2285_v56 = vsel %vm2221_vm4, %v2189_v19, %v2253_v25 }
 0x562   :  { %v2286_v54 = vsel %vm2222_vm3, %v2190_v14, %v2254_v33  ;;  %v2255_v59 = vmul.f32 0.2, %v2191_v41  ;;  %v2193_v31 = vadd.f32 %v2133_v21, %v8283_v9  ;;  %vm2223_vm5 = vcmp.gt.f32.partialorder %v2191_v41, 0.0 }
 0x563   :  { %6129 = vmatmul.mubr.f32.gmra.mrb[46].mxu0 %v2279_v7  ;;  %v2256_v61 = vmul.f32 0.2, %v2192_v39  ;;  %v2194_v62 = vadd.f32 %v2137_v52, %v8285_v37  ;;  %v2141_v35 = vrot.slane %v2092_v30, %v9755_v4  ;;  %vm2224_vm6 = vcmp.gt.f32.partialorder %v2192_v39, 0.0 }
 0x564   :  { %6131 = vmatprep.mubr.f32.mxu0 %v2280_v13  ;;  %v2089_v20 = vrot.slane %v2061_v12, %v9752_v18  ;;  %v2287_v0 = vsel %vm2223_vm5, %v2191_v41, %v2255_v59  ;;  %v2257_v27 = vmul.f32 0.2, %v2193_v31  ;;  %v2195_v40 = vadd.f32 %v2137_v52, %v8283_v9  ;;  %v5150_v41 = vld [vmem:[%s9727_s4 + $0x10] sm:$0xff] }
 0x565   :  { %v2145_v28 = vrot.slane %v2075_v23, %v9755_v4  ;;  %v2288_v29 = vsel %vm2224_vm6, %v2192_v39, %v2256_v61  ;;  %vm2225_vm7 = vcmp.gt.f32.partialorder %v2193_v31, 0.0  ;;  %v2258_v49 = vmul.f32 0.2, %v2194_v62  ;;  %6164 = vmatprep.subr.mxu1 %v5150_v41  ;;  %v7134_v39 = vld [vmem:[%s9724_s1 + $0x8] sm:$0xff]  ;;  %v7136_v61 = vld [vmem:[%s9724_s1 + $0x18] sm:$0xff] }
 0x566   :  { %v2196_v44 = vadd.f32 %v2141_v35, %v8285_v37  ;;  %vm2226_vm8 = vcmp.gt.f32.partialorder %v2194_v62, 0.0  ;;  %v2091_v46 = vcombine.high %v2075_v23, %v2075_v23  ;;  %v2289_v38 = vsel %vm2225_vm7, %v2193_v31, %v2257_v27  ;;  %6165 = vmatpush3.msra.mxu1 %v5150_v41  ;;  %v7135_v23 = vld [vmem:[%s9724_s1] sm:$0xff] }
 0x567   :  { %6132 = vmatmul.mubr.f32.gmra.mrb[48].mxu0 %v2281_v63  ;;  %v2259_v8 = vmul.f32 0.2, %v2195_v40  ;;  %v2197_v47 = vadd.f32 %v2141_v35, %v8283_v9  ;;  %v2198_v45 = vadd.f32 %v2145_v28, %v8285_v37  ;;  %v2290_v1 = vsel %vm2226_vm8, %v2194_v62, %v2258_v49 }
 0x568   :  { %6134 = vmatprep.mubr.f32.mxu0 %v2282_v55  ;;  %vm2227_vm9 = vcmp.gt.f32.partialorder %v2195_v40, 0.0  ;;  %v2260_v15 = vmul.f32 0.2, %v2196_v44  ;;  %v2149_v3 = vrot.slane %v2089_v20, %v9755_v4  ;;  %vm2228_vm10 = vcmp.gt.f32.partialorder %v2196_v44, 0.0 }
 0x569   :  { %v2199_v26 = vadd.f32 %v2145_v28, %v8283_v9  ;;  %v2291_v22 = vsel %vm2227_vm9, %v2195_v40, %v2259_v8  ;;  %vm2229_vm11 = vcmp.gt.f32.partialorder %v2197_v47, 0.0  ;;  %v2261_v11 = vmul.f32 0.2, %v2197_v47 }
 0x56a   :  { %v2262_v32 = vmul.f32 0.2, %v2198_v45  ;;  %v2292_v51 = vsel %vm2228_vm10, %v2196_v44, %v2260_v15  ;;  %v2200_v58 = vadd.f32 %v2149_v3, %v8285_v37  ;;  %v2153_v36 = vrot.slane %v2091_v46, %v9755_v4  ;;  %v7138_v46 = vld [vmem:[%s9724_s1 + $0x28] sm:$0xff] }
 0x56b   :  { %6135 = vmatmul.mubr.f32.gmra.mrb[50].mxu0 %v2283_v34  ;;  %v2093_v53 = vcombine.high %v2089_v20, %v2089_v20  ;;  %vm2230_vm12 = vcmp.gt.f32.partialorder %v2198_v45, 0.0  ;;  %v2293_v60 = vsel %vm2229_vm11, %v2197_v47, %v2261_v11  ;;  %vm2231_vm13 = vcmp.gt.f32.partialorder %v2199_v26, 0.0  ;;  %v7137_v20 = vld [vmem:[%s9724_s1 + $0x10] sm:$0xff]  ;;  %v7139_v47 = vld [vmem:[%s9724_s1 + $0x20] sm:$0xff] }
 0x56c   :  { %6137 = vmatprep.mubr.f32.mxu0 %v2284_v10  ;;  %v2263_v24 = vmul.f32 0.2, %v2199_v26  ;;  %v2201_v7 = vadd.f32 %v2149_v3, %v8283_v9  ;;  %v2294_v48 = vsel %vm2230_vm12, %v2198_v45, %v2262_v32  ;;  %v2264_v50 = vmul.f32 0.2, %v2200_v58 }
 0x56d   :  { %v2202_v13 = vadd.f32 %v2153_v36, %v8285_v37  ;;  %v2157_v6 = vrot.slane %v2093_v53, %v9755_v4  ;;  %vm2232_vm14 = vcmp.gt.f32.partialorder %v2200_v58, 0.0  ;;  %v2203_v14 = vadd.f32 %v2153_v36, %v8283_v9 }
 0x56e   :  { %v2295_v5 = vsel %vm2231_vm13, %v2199_v26, %v2263_v24  ;;  %v2265_v42 = vmul.f32 0.2, %v2201_v7  ;;  %v2296_v17 = vsel %vm2232_vm14, %v2200_v58, %v2264_v50  ;;  %vm2233_vm15 = vcmp.gt.f32.partialorder %v2201_v7, 0.0  ;;  %v7140_v58 = vld [vmem:[%s9724_s1 + $0x38] sm:$0xff] }
 0x56f   :  { %6138 = vmatmul.mubr.f32.gmra.mrb[52].mxu0 %v2285_v56  ;;  %v2266_v63 = vmul.f32 0.2, %v2202_v13  ;;  %v2204_v2 = vadd.f32 %v2157_v6, %v8285_v37  ;;  %vm2234_vm1 = vcmp.gt.f32.partialorder %v2202_v13, 0.0  ;;  %v2267_v55 = vmul.f32 0.2, %v2203_v14 }
 0x570   :  { %6140 = vmatprep.mubr.f32.mxu0 %v2286_v54  ;;  %v2297_v19 = vsel %vm2233_vm15, %v2201_v7, %v2265_v42  ;;  %v2205_v16 = vadd.f32 %v2157_v6, %v8283_v9  ;;  %vm2235_vm2 = vcmp.gt.f32.partialorder %v2203_v14, 0.0 }
 0x571   :  { %v2298_v21 = vsel %vm2234_vm1, %v2202_v13, %v2266_v63  ;;  %v2268_v43 = vmul.f32 0.2, %v2204_v2  ;;  %vm2236_vm3 = vcmp.gt.f32.partialorder %v2204_v2, 0.0  ;;  %v2299_v30 = vsel %vm2235_vm2, %v2203_v14, %v2267_v55 }
 0x572   :  { %v2269_v34 = vmul.f32 0.2, %v2205_v16  ;;  %vm2237_vm4 = vcmp.gt.f32.partialorder %v2205_v16, 0.0 }
 0x573   :  { %6141 = vmatmul.mubr.f32.gmra.mrb[54].mxu0 %v2287_v0  ;;  %v2300_v25 = vsel %vm2236_vm3, %v2204_v2, %v2268_v43 }
 0x574   :  { %6143 = vmatprep.mubr.f32.mxu0 %v2288_v29  ;;  %v2301_v33 = vsel %vm2237_vm4, %v2205_v16, %v2269_v34  ;;  %v7143_v16 = vld [vmem:[%s9724_s1 + $0x40] sm:$0xff] }
 0x577   :  { %6144 = vmatmul.mubr.f32.gmra.mrb[56].mxu0 %v2289_v38 }
 0x578   :  { %6146 = vmatprep.mubr.f32.mxu0 %v2290_v1 }
 0x57b   :  { %6147 = vmatmul.mubr.f32.gmra.mrb[58].mxu0 %v2291_v22 }
 0x57c   :  { %6149 = vmatprep.mubr.f32.mxu0 %v2292_v51 }
 0x57f   :  { %6150 = vmatmul.mubr.f32.gmra.mrb[60].mxu0 %v2293_v60  ;;  %v7141_v60 = vld [vmem:[%s9724_s1 + $0x30] sm:$0xff] }
 0x580   :  { %6152 = vmatprep.mubr.f32.mxu0 %v2294_v48 }
 0x583   :  { %6153 = vmatmul.mubr.f32.gmra.mrb[62].mxu0 %v2295_v5 }
 0x584   :  { %6155 = vmatprep.mubr.f32.mxu0 %v2296_v17 }
 0x587   :  { %6156 = vmatmul.mubr.f32.gmra.mrb[64].mxu0 %v2297_v19  ;;  %v7142_v19 = vld [vmem:[%s9724_s1 + $0x48] sm:$0xff] }
 0x588   :  { %6158 = vmatprep.mubr.f32.mxu0 %v2298_v21 }
 0x58b   :  { %6159 = vmatmul.mubr.f32.gmra.mrb[66].mxu0 %v2299_v30 }
 0x58c   :  { %6161 = vmatprep.mubr.f32.mxu0 %v2300_v25 }
 0x58f   :  { %6162 = vmatmul.mubr.f32.gmra.mrb[68].mxu0 %v2301_v33 }
 0x590   :  { %3380 = vmatprep.mubr.f32.mxu0 %v8079_v57 }
 0x626   :  { %v6118_v10 = vpop.f32.mrb[38].mxu0 }
 0x627   :  { %v2374_v52 = vadd.f32 %v7134_v39, %v6118_v10  ;;  %v2368_v12 = vpop.f32.mrb[39].mxu0 }
 0x628   :  { %v2369_v56 = vadd.f32 %v7135_v23, %v2368_v12 }
 0x629   :  { %v2528_v57 = vsel %vm903_vm0, %v2374_v52, -inf }
 0x62a   :  { %v2527_v54 = vsel %vm903_vm0, %v2369_v56, -inf  ;;  %v6121_v59 = vpop.f32.mrb[40].mxu0 }
 0x62b   :  { %v2529_v31 = vmax.f32 %v2527_v54, %v2528_v57  ;;  %v8363_v62 = vadd.f32 %v7136_v61, %v6121_v59  ;;  %v2378_v35 = vpop.f32.mrb[41].mxu0 }
 0x62c   :  { %v8368_v0 = vadd.f32 %v7137_v20, %v2378_v35  ;;  %v7145_v35 = vld [vmem:[%s9724_s1 + $0x50] sm:$0xff] }
 0x62d   :  { %v2530_v27 = vrot.slane %v2529_v31, 4  ;;  %v2537_v40 = vsel %vm903_vm0, %v8363_v62, -inf }
 0x62e   :  { %v2536_v28 = vsel %vm903_vm0, %v8368_v0, -inf  ;;  %v6124_v29 = vpop.f32.mrb[42].mxu0 }
 0x62f   :  { %v2531_v49 = vmax.f32 %v2529_v31, %v2530_v27  ;;  %v2538_v44 = vmax.f32 %v2536_v28, %v2537_v40  ;;  %v8377_v38 = vadd.f32 %v7138_v46, %v6124_v29  ;;  %v2388_v8 = vpop.f32.mrb[43].mxu0 }
 0x630   :  { %v8382_v45 = vadd.f32 %v7139_v47, %v2388_v8 }
 0x631   :  { %v2532_v1 = vrot.slane %v2531_v49, 2  ;;  %v2539_v15 = vrot.slane %v2538_v44, 4  ;;  %v2546_v3 = vsel %vm903_vm0, %v8377_v38, -inf }
 0x632   :  { %v2545_v26 = vsel %vm903_vm0, %v8382_v45, -inf  ;;  %v6127_v22 = vpop.f32.mrb[44].mxu0 }
 0x633   :  { %v2533_v11 = vmax.f32 %v2531_v49, %v2532_v1  ;;  %v2540_v32 = vmax.f32 %v2538_v44, %v2539_v15  ;;  %v2547_v51 = vmax.f32 %v2545_v26, %v2546_v3  ;;  %v8391_v36 = vadd.f32 %v7140_v58, %v6127_v22  ;;  %v2398_v53 = vpop.f32.mrb[45].mxu0  ;;  %v7147_v58 = vld [vmem:[%s9724_s1 + $0x60] sm:$0xff] }
 0x634   :  { %v8396_v24 = vadd.f32 %v7141_v60, %v2398_v53 }
 0x635   :  { %v2534_v7 = vrot.slane %v2533_v11, 1  ;;  %v2541_v48 = vrot.slane %v2540_v32, 2  ;;  %v2548_v50 = vrot.slane %v2547_v51, 4  ;;  %v2555_v13 = vsel %vm903_vm0, %v8391_v36, -inf }
 0x636   :  { %v2554_v6 = vsel %vm903_vm0, %v8396_v24, -inf  ;;  %v6130_v5 = vpop.f32.mrb[46].mxu0 }
 0x637   :  { %v2535_v42 = vmax.f32 %v2533_v11, %v2534_v7  ;;  %v2542_v14 = vmax.f32 %v2540_v32, %v2541_v48  ;;  %v2549_v17 = vmax.f32 %v2547_v51, %v2548_v50  ;;  %v2556_v63 = vmax.f32 %v2554_v6, %v2555_v13  ;;  %v2408_v2 = vpop.f32.mrb[47].mxu0 }
 0x638   :  { %v8405_v55 = vadd.f32 %v7142_v19, %v6130_v5  ;;  %v8410_v21 = vadd.f32 %v7143_v16, %v2408_v2  ;;  %v7148_v2 = vld [vmem:[%s9724_s1 + $0x78] sm:$0xff]  ;;  %v7149_v16 = vld [vmem:[%s9724_s1 + $0x70] sm:$0xff] }
 0x639   :  { %v2671_v43 = vsub.f32 %v2369_v56, %v2535_v42  ;;  %v2672_v30 = vsub.f32 %v2374_v52, %v2535_v42  ;;  %v2543_v34 = vrot.slane %v2542_v14, 1  ;;  %v2550_v25 = vrot.slane %v2549_v17, 2  ;;  %v7144_v52 = vld [vmem:[%s9724_s1 + $0x58] sm:$0xff] }
 0x63a   :  { %v2557_v33 = vrot.slane %v2556_v63, 4  ;;  %v2564_v41 = vsel %vm903_vm0, %v8405_v55, -inf  ;;  %v2563_v10 = vsel %vm903_vm0, %v8410_v21, -inf  ;;  %v6133_v39 = vpop.f32.mrb[48].mxu0 }
 0x63b   :  { %v2703_v12 = vmul.f32 1.442695, %v2671_v43  ;;  %v2705_v23 = vmul.f32 1.442695, %v2672_v30  ;;  %v2544_v57 = vmax.f32 %v2542_v14, %v2543_v34  ;;  %v2551_v54 = vmax.f32 %v2549_v17, %v2550_v25  ;;  %v2418_v59 = vpop.f32.mrb[49].mxu0 }
 0x63c   :  { %v2558_v31 = vmax.f32 %v2556_v63, %v2557_v33  ;;  %v2565_v61 = vmax.f32 %v2563_v10, %v2564_v41  ;;  %v8419_v56 = vadd.f32 %v7144_v52, %v6133_v39  ;;  %v8424_v20 = vadd.f32 %v7145_v35, %v2418_v59 }
 0x63d   :  { %6934 = vpow2.f32 %v2703_v12  ;;  %v2673_v27 = vsub.f32 %v8368_v0, %v2544_v57  ;;  %v2674_v40 = vsub.f32 %v8363_v62, %v2544_v57  ;;  %v2552_v28 = vrot.slane %v2551_v54, 1  ;;  %v7146_v62 = vld [vmem:[%s9724_s1 + $0x68] sm:$0xff] }
 0x63e   :  { %6936 = vpow2.f32 %v2705_v23  ;;  %v2559_v29 = vrot.slane %v2558_v31, 2  ;;  %v2566_v49 = vrot.slane %v2565_v61, 4  ;;  %v2573_v44 = vsel %vm903_vm0, %v8419_v56, -inf  ;;  %v6136_v46 = vpop.f32.mrb[50].mxu0 }
 0x63f   :  { %v2707_v8 = vmul.f32 1.442695, %v2673_v27  ;;  %v2709_v47 = vmul.f32 1.442695, %v2674_v40  ;;  %v2553_v1 = vmax.f32 %v2551_v54, %v2552_v28  ;;  %v2572_v15 = vsel %vm903_vm0, %v8424_v20, -inf  ;;  %v2428_v3 = vpop.f32.mrb[51].mxu0 }
 0x640   :  { %v2560_v26 = vmax.f32 %v2558_v31, %v2559_v29  ;;  %v2567_v22 = vmax.f32 %v2565_v61, %v2566_v49  ;;  %v2574_v0 = vmax.f32 %v2572_v15, %v2573_v44  ;;  %v8435_v11 = vadd.f32 %v7146_v62, %v6136_v46 }
 0x641   :  { %6938 = vpow2.f32 %v2707_v8  ;;  %v2675_v32 = vsub.f32 %v8382_v45, %v2553_v1  ;;  %v2676_v51 = vsub.f32 %v8377_v38, %v2553_v1  ;;  %v8442_v53 = vadd.f32 %v7147_v58, %v2428_v3 }
 0x642   :  { %6940 = vpow2.f32 %v2709_v47  ;;  %v2561_v60 = vrot.slane %v2560_v26, 1  ;;  %v2568_v7 = vrot.slane %v2567_v22, 2  ;;  %v2575_v48 = vrot.slane %v2574_v0, 4  ;;  %v6139_v50 = vpop.f32.mrb[52].mxu0 }
 0x643   :  { %v2711_v13 = vmul.f32 1.442695, %v2675_v32  ;;  %v2713_v6 = vmul.f32 1.442695, %v2676_v51  ;;  %v2582_v5 = vsel %vm903_vm0, %v8435_v11, -inf  ;;  %v2581_v45 = vsel %vm903_vm0, %v8442_v53, -inf }
 0x644   :  { %v2562_v38 = vmax.f32 %v2560_v26, %v2561_v60  ;;  %v2569_v42 = vmax.f32 %v2567_v22, %v2568_v7  ;;  %v2576_v14 = vmax.f32 %v2574_v0, %v2575_v48  ;;  %v2583_v17 = vmax.f32 %v2581_v45, %v2582_v5  ;;  %v2438_v63 = vpop.f32.mrb[53].mxu0  ;;  %v7150_v60 = vld [vmem:[%s9724_s1 + $0x88] sm:$0xff] }
 0x645   :  { %6942 = vpow2.f32 %v2711_v13  ;;  %v8451_v19 = vadd.f32 %v7148_v2, %v6139_v50  ;;  %v8456_v43 = vadd.f32 %v7149_v16, %v2438_v63 }
 0x646   :  { %6944 = vpow2.f32 %v2713_v6  ;;  %v2677_v30 = vsub.f32 %v8396_v24, %v2562_v38  ;;  %v2678_v34 = vsub.f32 %v8391_v36, %v2562_v38  ;;  %v2570_v25 = vrot.slane %v2569_v42, 1  ;;  %v6142_v33 = vpop.f32.mrb[54].mxu0 }
 0x647   :  { %v8460_v41 = vpop.eup %6934  ;;  %v2577_v10 = vrot.slane %v2576_v14, 2  ;;  %v2584_v39 = vrot.slane %v2583_v17, 4  ;;  %v2591_v12 = vsel %vm903_vm0, %v8451_v19, -inf  ;;  %v2590_v23 = vsel %vm903_vm0, %v8456_v43, -inf  ;;  %v8466_v57 = vpop.f32.mrb[55].mxu0 }
 0x648   :  { %v8468_v54 = vpop.eup %6936  ;;  %v2767_v24 = vsel %vm903_vm0, %v8460_v41, 0.0  ;;  %v2715_v36 = vmul.f32 1.442695, %v2677_v30  ;;  %v2717_v59 = vmul.f32 1.442695, %v2678_v34  ;;  %v2571_v31 = vmax.f32 %v2569_v42, %v2570_v25 }
 0x649   :  { %v2768_v61 = vsel %vm903_vm0, %v8468_v54, 0.0  ;;  %v2578_v52 = vmax.f32 %v2576_v14, %v2577_v10  ;;  %v2585_v35 = vmax.f32 %v2583_v17, %v2584_v39  ;;  %v2592_v27 = vmax.f32 %v2590_v23, %v2591_v12 }
 0x64a   :  { %v2769_v40 = vadd.f32 %v2768_v61, %v2767_v24  ;;  %6946 = vpow2.f32 %v2715_v36  ;;  %v2679_v28 = vsub.f32 %v8410_v21, %v2571_v31  ;;  %v2680_v29 = vsub.f32 %v8405_v55, %v2571_v31  ;;  %v8476_v49 = vpop.f32.mrb[56].mxu0 }
 0x64b   :  { %v8478_v44 = vpop.eup %6938  ;;  %6948 = vpow2.f32 %v2717_v59  ;;  %v2579_v46 = vrot.slane %v2578_v52, 1  ;;  %v2586_v8 = vrot.slane %v2585_v35, 2  ;;  %v2593_v47 = vrot.slane %v2592_v27, 4  ;;  %v8480_v1 = vpop.f32.mrb[57].mxu0 }
 0x64c   :  { %v8482_v15 = vpop.eup %6940  ;;  %v2770_v3 = vrot.slane %v2769_v40, 4  ;;  %v2776_v26 = vsel %vm903_vm0, %v8478_v44, 0.0  ;;  %v2719_v22 = vmul.f32 1.442695, %v2679_v28  ;;  %v2721_v21 = vmul.f32 1.442695, %v2680_v29 }
 0x64d   :  { %v2777_v55 = vsel %vm903_vm0, %v8482_v15, 0.0  ;;  %v2580_v0 = vmax.f32 %v2578_v52, %v2579_v46  ;;  %v2587_v62 = vmax.f32 %v2585_v35, %v2586_v8  ;;  %v2594_v32 = vmax.f32 %v2592_v27, %v2593_v47 }
 0x64e   :  { %v2771_v51 = vadd.f32 %v2770_v3, %v2769_v40  ;;  %v2778_v58 = vadd.f32 %v2777_v55, %v2776_v26  ;;  %6950 = vpow2.f32 %v2719_v22  ;;  %v8491_v7 = vadd.f32 %v7150_v60, %v6142_v33  ;;  %v8493_v48 = vpop.f32.mrb[58].mxu0  ;;  %v7152_v22 = vld [vmem:[%s9724_s1 + $0x98] sm:$0xff] }
 0x64f   :  { %v8495_v50 = vpop.eup %6942  ;;  %6952 = vpow2.f32 %v2721_v21  ;;  %v2681_v13 = vsub.f32 %v8424_v20, %v2580_v0  ;;  %v2682_v6 = vsub.f32 %v8419_v56, %v2580_v0  ;;  %v2588_v5 = vrot.slane %v2587_v62, 1  ;;  %v8499_v45 = vpop.f32.mrb[59].mxu0 }
 0x650   :  { %v8501_v38 = vpop.eup %6944  ;;  %v2772_v42 = vrot.slane %v2771_v51, 2  ;;  %v2779_v14 = vrot.slane %v2778_v58, 4  ;;  %v2785_v17 = vsel %vm903_vm0, %v8495_v50, 0.0  ;;  %v2595_v63 = vrot.slane %v2594_v32, 2 }
 0x651   :  { %v2786_v2 = vsel %vm903_vm0, %v8501_v38, 0.0  ;;  %v2723_v16 = vmul.f32 1.442695, %v2681_v13  ;;  %v2725_v30 = vmul.f32 1.442695, %v2682_v6  ;;  %v2589_v34 = vmax.f32 %v2587_v62, %v2588_v5 }
 0x652   :  { %v8507_v20 = vadd.f32 %v2772_v42, %v2771_v51  ;;  %v2780_v56 = vadd.f32 %v2779_v14, %v2778_v58  ;;  %v2787_v25 = vadd.f32 %v2786_v2, %v2785_v17  ;;  %v2596_v33 = vmax.f32 %v2594_v32, %v2595_v63  ;;  %v6151_v10 = vpop.f32.mrb[60].mxu0  ;;  %v7153_v2 = vld [vmem:[%s9724_s1 + $0x90] sm:$0xff] }
 0x653   :  { %6954 = vpow2.f32 %v2723_v16  ;;  %v2683_v39 = vsub.f32 %v8442_v53, %v2589_v34  ;;  %v2684_v12 = vsub.f32 %v8435_v11, %v2589_v34  ;;  %v2600_v23 = vsel %vm903_vm0, %v8491_v7, -inf  ;;  %v8513_v24 = vpop.f32.mrb[61].mxu0  ;;  %v7151_v11 = vld [vmem:[%s9724_s1 + $0x80] sm:$0xff]  ;;  %v7154_v34 = vld [vmem:[%s9724_s1 + $0xa8] sm:$0xff] }
 0x654   :  { %v8515_v36 = vpop.eup %6946  ;;  %v2781_v59 = vrot.slane %v2780_v56, 2  ;;  %v2788_v31 = vrot.slane %v2787_v25, 4  ;;  %6956 = vpow2.f32 %v2725_v30  ;;  %v2597_v61 = vrot.slane %v2596_v33, 1 }
 0x655   :  { %v8517_v52 = vpop.eup %6948  ;;  %v2794_v35 = vsel %vm903_vm0, %v8515_v36, 0.0  ;;  %v2727_v27 = vmul.f32 1.442695, %v2683_v39  ;;  %v2729_v53 = vmul.f32 1.442695, %v2684_v12  ;;  %v8525_v40 = vadd.f32 %v7151_v11, %v8466_v57 }
 0x656   :  { %v8527_v28 = vadd.f32 %v2781_v59, %v2780_v56  ;;  %v2789_v29 = vadd.f32 %v2788_v31, %v2787_v25  ;;  %v2795_v46 = vsel %vm903_vm0, %v8517_v52, 0.0  ;;  %v2598_v8 = vmax.f32 %v2596_v33, %v2597_v61  ;;  %v6154_v47 = vpop.f32.mrb[62].mxu0  ;;  %v7155_v25 = vld [vmem:[%s9724_s1 + $0xa0] sm:$0xff] }
 0x657   :  { %v2796_v3 = vadd.f32 %v2795_v46, %v2794_v35  ;;  %6958 = vpow2.f32 %v2727_v27  ;;  %v2599_v26 = vsel %vm903_vm0, %v8525_v40, -inf  ;;  %v8537_v57 = vadd.f32 %v7152_v22, %v8476_v49  ;;  %v8539_v21 = vpop.f32.mrb[63].mxu0 }
 0x658   :  { %v8541_v55 = vpop.eup %6950  ;;  %v2790_v0 = vrot.slane %v2789_v29, 2  ;;  %6960 = vpow2.f32 %v2729_v53  ;;  %v2685_v62 = vsub.f32 %v8456_v43, %v2598_v8  ;;  %v2686_v32 = vsub.f32 %v8451_v19, %v2598_v8 }
 0x659   :  { %v8545_v51 = vpop.eup %6952  ;;  %v2797_v58 = vrot.slane %v2796_v3, 4  ;;  %v2803_v60 = vsel %vm903_vm0, %v8541_v55, 0.0  ;;  %v2601_v13 = vmax.f32 %v2599_v26, %v2600_v23  ;;  %v2609_v49 = vsel %vm903_vm0, %v8537_v57, -inf }
 0x65a   :  { %v8551_v6 = vadd.f32 %v2790_v0, %v2789_v29  ;;  %v2804_v5 = vsel %vm903_vm0, %v8545_v51, 0.0  ;;  %v2731_v42 = vmul.f32 1.442695, %v2685_v62  ;;  %v2733_v14 = vmul.f32 1.442695, %v2686_v32  ;;  %v8555_v43 = vpop.f32.mrb[64].mxu0 }
 0x65b   :  { %v2798_v19 = vadd.f32 %v2797_v58, %v2796_v3  ;;  %v2805_v17 = vadd.f32 %v2804_v5, %v2803_v60  ;;  %v2602_v63 = vrot.slane %v2601_v13, 4  ;;  %v8561_v16 = vadd.f32 %v7153_v2, %v8480_v1  ;;  %v8563_v30 = vpop.f32.mrb[65].mxu0  ;;  %v7156_v1 = vld [vmem:[%s9724_s1 + $0xb8] sm:$0xff]  ;;  %v7157_v60 = vld [vmem:[%s9724_s1 + $0xb0] sm:$0xff]  ;;  %v7158_v5 = vld [vmem:[%s9724_s1 + $0xc8] sm:$0xff] }
 0x65c   :  { %6962 = vpow2.f32 %v2731_v42  ;;  %v8569_v56 = vadd.f32 %v7154_v34, %v8493_v48  ;;  %v8575_v33 = vadd.f32 %v7155_v25, %v8499_v45  ;;  %v8580_v39 = vadd.f32 %v7156_v1, %v6151_v10 }
 0x65d   :  { %v8582_v12 = vpop.eup %6954  ;;  %v2799_v23 = vrot.slane %v2798_v19, 2  ;;  %v2806_v59 = vrot.slane %v2805_v17, 4  ;;  %6964 = vpow2.f32 %v2733_v14  ;;  %v2603_v48 = vmax.f32 %v2601_v13, %v2602_v63 }
 0x65e   :  { %v8584_v31 = vpop.eup %6956  ;;  %v2812_v61 = vsel %vm903_vm0, %v8582_v12, 0.0  ;;  %v2608_v45 = vsel %vm903_vm0, %v8561_v16, -inf  ;;  %v2618_v35 = vsel %vm903_vm0, %v8569_v56, -inf  ;;  %v2617_v10 = vsel %vm903_vm0, %v8575_v33, -inf  ;;  %v8594_v27 = vpop.f32.mrb[66].mxu0 }
 0x65f   :  { %v8596_v53 = vadd.f32 %v2799_v23, %v2798_v19  ;;  %v2807_v11 = vadd.f32 %v2806_v59, %v2805_v17  ;;  %v2813_v29 = vsel %vm903_vm0, %v8584_v31, 0.0  ;;  %v2604_v46 = vrot.slane %v2603_v48, 2  ;;  %v8600_v8 = vpop.f32.mrb[67].mxu0 }
 0x660   :  { %v2814_v3 = vadd.f32 %v2813_v29, %v2812_v61  ;;  %v2610_v26 = vmax.f32 %v2608_v45, %v2609_v49  ;;  %v2619_v22 = vmax.f32 %v2617_v10, %v2618_v35  ;;  %v2627_v0 = vsel %vm903_vm0, %v8580_v39, -inf }
 0x661   :  { %v8604_v62 = vpop.eup %6958  ;;  %v2808_v32 = vrot.slane %v2807_v11, 2  ;;  %v2605_v58 = vmax.f32 %v2603_v48, %v2604_v46  ;;  %v8610_v13 = vadd.f32 %v7157_v60, %v8513_v24  ;;  %v8615_v49 = vadd.f32 %v7158_v5, %v6154_v47 }
 0x662   :  { %v8617_v42 = vpop.eup %6960  ;;  %v2815_v14 = vrot.slane %v2814_v3, 4  ;;  %v2821_v19 = vsel %vm903_vm0, %v8604_v62, 0.0  ;;  %v2611_v17 = vrot.slane %v2610_v26, 4  ;;  %v2620_v63 = vrot.slane %v2619_v22, 4  ;;  %v8621_v2 = vpop.f32.mrb[68].mxu0 }
 0x663   :  { %v8623_v34 = vadd.f32 %v2808_v32, %v2807_v11  ;;  %v2822_v24 = vsel %vm903_vm0, %v8617_v42, 0.0  ;;  %v2606_v25 = vrot.slane %v2605_v58, 1  ;;  %v2626_v47 = vsel %vm903_vm0, %v8610_v13, -inf  ;;  %v8629_v1 = vpop.f32.mrb[69].mxu0  ;;  %v7159_v11 = vld [vmem:[%s9724_s1 + $0xc0] sm:$0xff] }
 0x664   :  { %v2816_v23 = vadd.f32 %v2815_v14, %v2814_v3  ;;  %v2823_v59 = vadd.f32 %v2822_v24, %v2821_v19  ;;  %v2612_v48 = vmax.f32 %v2610_v26, %v2611_v17  ;;  %v2621_v61 = vmax.f32 %v2619_v22, %v2620_v63 }
 0x665   :  { %v2607_v45 = vmax.f32 %v2605_v58, %v2606_v25  ;;  %v2628_v35 = vmax.f32 %v2626_v47, %v2627_v0  ;;  %v2636_v10 = vsel %vm903_vm0, %v8615_v49, -inf  ;;  %v8637_v29 = vadd.f32 %v7159_v11, %v8539_v21 }
 0x666   :  { %v8639_v46 = vpop.eup %6962  ;;  %v2817_v32 = vrot.slane %v2816_v23, 2  ;;  %v2824_v60 = vrot.slane %v2823_v59, 4  ;;  %v2613_v3 = vrot.slane %v2612_v48, 2  ;;  %v2622_v5 = vrot.slane %v2621_v61, 2 }
 0x667   :  { %v8641_v26 = vpop.eup %6964  ;;  %v2830_v22 = vsel %vm903_vm0, %v8639_v46, 0.0  ;;  %v2687_v0 = vsub.f32 %v8525_v40, %v2607_v45  ;;  %v2688_v58 = vsub.f32 %v8491_v7, %v2607_v45  ;;  %v2629_v14 = vrot.slane %v2628_v35, 4 }
 0x668   :  { %v8647_v19 = vadd.f32 %v2817_v32, %v2816_v23  ;;  %v2825_v21 = vadd.f32 %v2824_v60, %v2823_v59  ;;  %v2831_v17 = vsel %vm903_vm0, %v8641_v26, 0.0  ;;  %v2614_v63 = vmax.f32 %v2612_v48, %v2613_v3 }
 0x669   :  { %v2832_v24 = vadd.f32 %v2831_v17, %v2830_v22  ;;  %v2735_v25 = vmul.f32 1.442695, %v2687_v0  ;;  %v2737_v47 = vmul.f32 1.442695, %v2688_v58  ;;  %v2623_v11 = vmax.f32 %v2621_v61, %v2622_v5  ;;  %v7160_v61 = vld [vmem:[%s9724_s1 + $0xd8] sm:$0xff] }
 0x66a   :  { %v2826_v4 = vrot.slane %v2825_v21, 2  ;;  %v2615_v18 = vrot.slane %v2614_v63, 1  ;;  %v2630_v37 = vmax.f32 %v2628_v35, %v2629_v14  ;;  %v2635_v40 = vsel %vm903_vm0, %v8637_v29, -inf }
 0x66b   :  { %v2833_v9 = vrot.slane %v2832_v24, 4  ;;  %6966 = vpow2.f32 %v2735_v25  ;;  %v2624_v7 = vrot.slane %v2623_v11, 1  ;;  %v2637_v23 = vmax.f32 %v2635_v40, %v2636_v10  ;;  %v7163_v40 = vld [vmem:[%s9724_s1 + $0xe0] sm:$0xff] }
 0x66c   :  { %v8653_v45 = vadd.f32 %v2826_v4, %v2825_v21  ;;  %6968 = vpow2.f32 %v2737_v47  ;;  %v2616_v59 = vmax.f32 %v2614_v63, %v2615_v18  ;;  %v2631_v32 = vrot.slane %v2630_v37, 2  ;;  %v7161_v18 = vld [vmem:[%s9724_s1 + $0xd0] sm:$0xff] }
 0x66d   :  { %v2834_v48 = vadd.f32 %v2833_v9, %v2832_v24  ;;  %v2625_v60 = vmax.f32 %v2623_v11, %v2624_v7  ;;  %v2638_v3 = vrot.slane %v2637_v23, 4  ;;  %v8659_v35 = vadd.f32 %v7160_v61, %v8555_v43 }
 0x66e   :  { %v2689_v5 = vsub.f32 %v8561_v16, %v2616_v59  ;;  %v2690_v22 = vsub.f32 %v8537_v57, %v2616_v59  ;;  %v2632_v10 = vmax.f32 %v2630_v37, %v2631_v32  ;;  %v8667_v9 = vadd.f32 %v7161_v18, %v8563_v30 }
 0x66f   :  { %v2835_v4 = vrot.slane %v2834_v48, 2  ;;  %v2691_v0 = vsub.f32 %v8575_v33, %v2625_v60  ;;  %v2692_v58 = vsub.f32 %v8569_v56, %v2625_v60  ;;  %v2639_v14 = vmax.f32 %v2637_v23, %v2638_v3  ;;  %v7162_v56 = vld [vmem:[%s9724_s1 + $0xe8] sm:$0xff] }
 0x670   :  { %v2739_v43 = vmul.f32 1.442695, %v2689_v5  ;;  %v2741_v21 = vmul.f32 1.442695, %v2690_v22  ;;  %v2633_v17 = vrot.slane %v2632_v10, 1  ;;  %v2645_v57 = vsel %vm903_vm0, %v8659_v35, -inf }
 0x671   :  { %v8673_v37 = vadd.f32 %v2835_v4, %v2834_v48  ;;  %v2743_v16 = vmul.f32 1.442695, %v2691_v0  ;;  %v2745_v63 = vmul.f32 1.442695, %v2692_v58  ;;  %v2640_v24 = vrot.slane %v2639_v14, 2  ;;  %v7164_v4 = vld [vmem:[%s9724_s1 + $0xf8] sm:$0xff] }
 0x672   :  { %6970 = vpow2.f32 %v2739_v43  ;;  %v2634_v30 = vmax.f32 %v2632_v10, %v2633_v17  ;;  %v2644_v25 = vsel %vm903_vm0, %v8667_v9, -inf  ;;  %v8681_v33 = vadd.f32 %v7162_v56, %v8594_v27  ;;  %v7165_v43 = vld [vmem:[%s9724_s1 + $0xf0] sm:$0xff] }
 0x673   :  { %6972 = vpow2.f32 %v2741_v21  ;;  %v2641_v47 = vmax.f32 %v2639_v14, %v2640_v24  ;;  %v2646_v11 = vmax.f32 %v2644_v25, %v2645_v57  ;;  %v8687_v7 = vadd.f32 %v7163_v40, %v8600_v8 }
 0x674   :  { %6974 = vpow2.f32 %v2743_v16  ;;  %v2693_v23 = vsub.f32 %v8610_v13, %v2634_v30  ;;  %v2694_v59 = vsub.f32 %v8580_v39, %v2634_v30  ;;  %v2654_v32 = vsel %vm903_vm0, %v8681_v33, -inf }
 0x675   :  { %v8693_v27 = vpop.eup %6966  ;;  %6976 = vpow2.f32 %v2745_v63  ;;  %v2642_v48 = vrot.slane %v2641_v47, 1  ;;  %v2647_v60 = vrot.slane %v2646_v11, 4  ;;  %v2653_v3 = vsel %vm903_vm0, %v8687_v7, -inf }
 0x676   :  { %v8697_v61 = vpop.eup %6968  ;;  %v2839_v8 = vsel %vm903_vm0, %v8693_v27, 0.0  ;;  %v2747_v5 = vmul.f32 1.442695, %v2693_v23  ;;  %v2749_v13 = vmul.f32 1.442695, %v2694_v59  ;;  %v2655_v22 = vmax.f32 %v2653_v3, %v2654_v32 }
 0x677   :  { %v2840_v39 = vsel %vm903_vm0, %v8697_v61, 0.0  ;;  %v2643_v10 = vmax.f32 %v2641_v47, %v2642_v48  ;;  %v2648_v18 = vmax.f32 %v2646_v11, %v2647_v60  ;;  %v8707_v0 = vadd.f32 %v7164_v4, %v8621_v2 }
 0x678   :  { %v2841_v58 = vadd.f32 %v2840_v39, %v2839_v8  ;;  %6978 = vpow2.f32 %v2747_v5  ;;  %v2656_v14 = vrot.slane %v2655_v22, 4  ;;  %v8713_v21 = vadd.f32 %v7165_v43, %v8629_v1 }
 0x679   :  { %6980 = vpow2.f32 %v2749_v13  ;;  %v2695_v17 = vsub.f32 %v8637_v29, %v2643_v10  ;;  %v2696_v57 = vsub.f32 %v8615_v49, %v2643_v10  ;;  %v2649_v16 = vrot.slane %v2648_v18, 2 }
 0x67a   :  { %v2842_v63 = vrot.slane %v2841_v58, 4  ;;  %v2657_v24 = vmax.f32 %v2655_v22, %v2656_v14  ;;  %v2663_v2 = vsel %vm903_vm0, %v8707_v0, -inf  ;;  %v2662_v30 = vsel %vm903_vm0, %v8713_v21, -inf }
 0x67b   :  { %v2751_v25 = vmul.f32 1.442695, %v2695_v17  ;;  %v2753_v56 = vmul.f32 1.442695, %v2696_v57  ;;  %v2650_v47 = vmax.f32 %v2648_v18, %v2649_v16  ;;  %v2664_v11 = vmax.f32 %v2662_v30, %v2663_v2 }
 0x67c   :  { %v8721_v1 = vpop.eup %6970  ;;  %v2843_v40 = vadd.f32 %v2842_v63, %v2841_v58  ;;  %v2658_v23 = vrot.slane %v2657_v24, 2  ;;  %v2774_v29 = vrot.slane %v8507_v20, 1  ;;  %v2783_v49 = vrot.slane %v8527_v28, 1 }
 0x67d   :  { %v8725_v59 = vpop.eup %6972  ;;  %v2848_v32 = vsel %vm903_vm0, %v8721_v1, 0.0  ;;  %6982 = vpow2.f32 %v2751_v25  ;;  %v2651_v48 = vrot.slane %v2650_v47, 1  ;;  %v2665_v60 = vrot.slane %v2664_v11, 4 }
 0x67e   :  { %v8729_v3 = vpop.eup %6974  ;;  %v2844_v8 = vrot.slane %v2843_v40, 2  ;;  %v2849_v5 = vsel %vm903_vm0, %v8725_v59, 0.0  ;;  %6984 = vpow2.f32 %v2753_v56  ;;  %v2659_v13 = vmax.f32 %v2657_v24, %v2658_v23 }
 0x67f   :  { %v8733_v22 = vpop.eup %6976  ;;  %v2850_v39 = vadd.f32 %v2849_v5, %v2848_v32  ;;  %v2857_v10 = vsel %vm903_vm0, %v8729_v3, 0.0  ;;  %v2652_v18 = vmax.f32 %v2650_v47, %v2651_v48  ;;  %v2666_v4 = vmax.f32 %v2664_v11, %v2665_v60 }
 0x680   :  { %v8737_v58 = vadd.f32 %v2844_v8, %v2843_v40  ;;  %v2858_v14 = vsel %vm903_vm0, %v8733_v22, 0.0  ;;  %v2660_v43 = vrot.slane %v2659_v13, 1  ;;  %v2775_v17 = vadd.f32 %v2774_v29, %v8507_v20 }
 0x681   :  { %v2851_v57 = vrot.slane %v2850_v39, 4  ;;  %v2859_v16 = vadd.f32 %v2858_v14, %v2857_v10  ;;  %v2697_v63 = vsub.f32 %v8667_v9, %v2652_v18  ;;  %v2698_v24 = vsub.f32 %v8659_v35, %v2652_v18 }
 0x682   :  { %v8744_v2 = vpop.eup %6978  ;;  %v2661_v30 = vmax.f32 %v2659_v13, %v2660_v43  ;;  %v2667_v25 = vrot.slane %v2666_v4, 2  ;;  %6986 = vrcp.f32 %v2775_v17  ;;  %v2784_v56 = vadd.f32 %v2783_v49, %v8527_v28 }
 0x683   :  { %v8747_v47 = vpop.eup %6980  ;;  %v2852_v11 = vadd.f32 %v2851_v57, %v2850_v39  ;;  %v2860_v40 = vrot.slane %v2859_v16, 4  ;;  %v2866_v20 = vsel %vm903_vm0, %v8744_v2, 0.0  ;;  %v2755_v23 = vmul.f32 1.442695, %v2697_v63 }
 0x684   :  { %v2867_v9 = vsel %vm903_vm0, %v8747_v47, 0.0  ;;  %v2757_v29 = vmul.f32 1.442695, %v2698_v24  ;;  %v2699_v35 = vsub.f32 %v8687_v7, %v2661_v30  ;;  %v2700_v32 = vsub.f32 %v8681_v33, %v2661_v30 }
 0x685   :  { %v2853_v48 = vrot.slane %v2852_v11, 2  ;;  %v2861_v60 = vadd.f32 %v2860_v40, %v2859_v16  ;;  %v2868_v8 = vadd.f32 %v2867_v9, %v2866_v20  ;;  %6988 = vpow2.f32 %v2755_v23 }
 0x686   :  { %6990 = vpow2.f32 %v2757_v29  ;;  %v2759_v28 = vmul.f32 1.442695, %v2699_v35  ;;  %v2761_v49 = vmul.f32 1.442695, %v2700_v32  ;;  %v2668_v5 = vmax.f32 %v2666_v4, %v2667_v25 }
 0x687   :  { %v8755_v13 = vpop.eup %6982  ;;  %v2854_v39 = vadd.f32 %v2853_v48, %v2852_v11  ;;  %v2862_v10 = vrot.slane %v2861_v60, 2  ;;  %v2869_v18 = vrot.slane %v2868_v8, 4  ;;  %6992 = vrcp.f32 %v2784_v56 }
 0x688   :  { %v8757_v14 = vpop.eup %6984  ;;  %v2875_v7 = vsel %vm903_vm0, %v8755_v13, 0.0  ;;  %6994 = vpow2.f32 %v2759_v28  ;;  %v2669_v33 = vrot.slane %v2668_v5, 1  ;;  %v2792_v43 = vrot.slane %v8551_v6, 1 }
 0x689   :  { %v8762_v17 = vadd.f32 %v2862_v10, %v2861_v60  ;;  %v2870_v57 = vadd.f32 %v2869_v18, %v2868_v8  ;;  %v2876_v4 = vsel %vm903_vm0, %v8757_v14, 0.0  ;;  %6996 = vpow2.f32 %v2761_v49 }
 0x68a   :  { %v2877_v16 = vadd.f32 %v2876_v4, %v2875_v7  ;;  %v2670_v63 = vmax.f32 %v2668_v5, %v2669_v33  ;;  %v2793_v24 = vadd.f32 %v2792_v43, %v8551_v6  ;;  %v2801_v30 = vrot.slane %v8596_v53, 1 }
 0x68b   :  { %v2871_v25 = vrot.slane %v2870_v57, 2  ;;  %v2810_v56 = vrot.slane %v8623_v34, 1  ;;  %v2819_v11 = vrot.slane %v8647_v19, 1  ;;  %v2828_v40 = vrot.slane %v8653_v45, 1 }
 0x68c   :  { %v6987_v20 = vpop.eup %6986  ;;  %v2878_v23 = vrot.slane %v2877_v16, 4  ;;  %v2701_v9 = vsub.f32 %v8713_v21, %v2670_v63  ;;  %v2702_v29 = vsub.f32 %v8707_v0, %v2670_v63  ;;  %6998 = vrcp.f32 %v2793_v24 }
 0x68d   :  { %v2872_v35 = vadd.f32 %v2871_v25, %v2870_v57  ;;  %v2927_v32 = vmul.f32 %v6987_v20, %v8460_v41  ;;  %v2928_v6 = vmul.f32 %v6987_v20, %v8468_v54  ;;  %v2802_v48 = vadd.f32 %v2801_v30, %v8596_v53 }
 0x68e   :  { %v2879_v60 = vadd.f32 %v2878_v23, %v2877_v16  ;;  %v2763_v8 = vmul.f32 1.442695, %v2701_v9  ;;  %v2765_v28 = vmul.f32 1.442695, %v2702_v29  ;;  %v2811_v49 = vadd.f32 %v2810_v56, %v8623_v34 }
 0x68f   :  { %v8777_v5 = vpop.eup %6988  ;;  %6166 = vmatprep.mubr.msk.f32.mxu1 %vm903_vm0, %v2927_v32  ;;  %7000 = vrcp.f32 %v2802_v48  ;;  %v2820_v0 = vadd.f32 %v2819_v11, %v8647_v19  ;;  %v2829_v21 = vadd.f32 %v2828_v40, %v8653_v45  ;;  %v2837_v41 = vrot.slane %v8673_v37, 1 }
 0x690   :  { %v8783_v10 = vpop.eup %6990  ;;  %v2880_v54 = vrot.slane %v2879_v60, 2  ;;  %v2884_v53 = vsel %vm903_vm0, %v8777_v5, 0.0  ;;  %7002 = vpow2.f32 %v2763_v8  ;;  %6167 = vmatmul.mubr.msk.f32.vlgmr.msra.gmra.mrb[40].mxu1 %vm903_vm0, %v2928_v6  ;;  %v2846_v34 = vrot.slane %v8737_v58, 1 }
 0x691   :  { %v6993_v18 = vpop.eup %6992  ;;  %v2885_v7 = vsel %vm903_vm0, %v8783_v10, 0.0  ;;  %7004 = vpow2.f32 %v2765_v28  ;;  %v2838_v19 = vadd.f32 %v2837_v41, %v8673_v37  ;;  %v2855_v45 = vrot.slane %v2854_v39, 1 }
 0x692   :  { %v8792_v33 = vpop.eup %6994  ;;  %v2881_v43 = vadd.f32 %v2880_v54, %v2879_v60  ;;  %v2886_v57 = vadd.f32 %v2885_v7, %v2884_v53  ;;  %v2929_v4 = vmul.f32 %v6993_v18, %v8478_v44  ;;  %v2930_v16 = vmul.f32 %v6993_v18, %v8482_v15 }
 0x693   :  { %v8796_v63 = vpop.eup %6996  ;;  %v2893_v24 = vsel %vm903_vm0, %v8792_v33, 0.0  ;;  %7006 = vrcp.f32 %v2811_v49  ;;  %v2847_v30 = vadd.f32 %v2846_v34, %v8737_v58  ;;  %v2856_v25 = vadd.f32 %v2855_v45, %v2854_v39 }
 0x694   :  { %v2887_v56 = vrot.slane %v2886_v57, 4  ;;  %v2894_v37 = vsel %vm903_vm0, %v8796_v63, 0.0  ;;  %6169 = vmatprep.mubr.msk.f32.mxu1 %vm903_vm0, %v2929_v4  ;;  %7008 = vrcp.f32 %v2820_v0  ;;  %v2864_v44 = vrot.slane %v8762_v17, 1 }
 0x695   :  { %v2895_v11 = vadd.f32 %v2894_v37, %v2893_v24  ;;  %6170 = vmatmul.mubr.msk.f32.gmra.mrb[42].mxu1 %vm903_vm0, %v2930_v16  ;;  %7010 = vrcp.f32 %v2829_v21  ;;  %v2873_v15 = vrot.slane %v2872_v35, 1  ;;  %v2882_v40 = vrot.slane %v2881_v43, 1 }
 0x696   :  { %v6999_v20 = vpop.eup %6998  ;;  %v2888_v23 = vadd.f32 %v2887_v56, %v2886_v57  ;;  %7012 = vrcp.f32 %v2838_v19  ;;  %v2865_v58 = vadd.f32 %v2864_v44, %v8762_v17 }
 0x697   :  { %v2896_v39 = vrot.slane %v2895_v11, 4  ;;  %v2931_v9 = vmul.f32 %v6999_v20, %v8495_v50  ;;  %v2932_v29 = vmul.f32 %v6999_v20, %v8501_v38  ;;  %7014 = vrcp.f32 %v2847_v30 }
 0x698   :  { %v2889_v32 = vrot.slane %v2888_v23, 2  ;;  %7016 = vrcp.f32 %v2856_v25  ;;  %v2874_v6 = vadd.f32 %v2873_v15, %v2872_v35  ;;  %v2883_v48 = vadd.f32 %v2882_v40, %v2881_v43 }
 0x699   :  { %v7001_v60 = vpop.eup %7000  ;;  %v2897_v8 = vadd.f32 %v2896_v39, %v2895_v11  ;;  %6172 = vmatprep.mubr.msk.f32.mxu1 %vm903_vm0, %v2931_v9  ;;  %7018 = vrcp.f32 %v2865_v58 }
 0x69a   :  { %v8810_v28 = vpop.eup %7002  ;;  %v2890_v49 = vadd.f32 %v2889_v32, %v2888_v23  ;;  %6173 = vmatmul.mubr.msk.f32.gmra.mrb[44].mxu1 %vm903_vm0, %v2932_v29  ;;  %v2933_v17 = vmul.f32 %v7001_v60, %v8515_v36  ;;  %v2934_v50 = vmul.f32 %v7001_v60, %v8517_v52  ;;  %7020 = vrcp.f32 %v2874_v6  ;;  %v9756_v6 = vld [vmem:[#allocation9_spill] sm:$0xff] }
 0x69b   :  { %v8815_v38 = vpop.eup %7004  ;;  %v2898_v0 = vrot.slane %v2897_v8, 2  ;;  %v2902_v35 = vsel %vm903_vm0, %v8810_v28, 0.0  ;;  %7022 = vrcp.f32 %v2883_v48 }
 0x69c   :  { %v2903_v21 = vsel %vm903_vm0, %v8815_v38, 0.0  ;;  %6175 = vmatprep.mubr.msk.f32.mxu1 %vm903_vm0, %v2933_v17  ;;  %v2891_v41 = vrot.slane %v2890_v49, 1 }
 0x69d   :  { %v7007_v54 = vpop.eup %7006  ;;  %v2899_v53 = vadd.f32 %v2898_v0, %v2897_v8  ;;  %v2904_v34 = vadd.f32 %v2903_v21, %v2902_v35  ;;  %v9757_v8 = vld [vmem:[#allocation10_spill] sm:$0xff] }
 0x69e   :  { %v7009_v36 = vpop.eup %7008  ;;  %6176 = vmatmul.mubr.msk.f32.gmra.mrb[46].mxu1 %vm903_vm0, %v2934_v50  ;;  %v2935_v52 = vmul.f32 %v7007_v54, %v8541_v55  ;;  %v2936_v18 = vmul.f32 %v7007_v54, %v8545_v51  ;;  %v2892_v7 = vadd.f32 %v2891_v41, %v2890_v49 }
 0x69f   :  { %v7011_v19 = vpop.eup %7010  ;;  %v2905_v45 = vrot.slane %v2904_v34, 4  ;;  %v2937_v43 = vmul.f32 %v7009_v36, %v8582_v12  ;;  %v2938_v57 = vmul.f32 %v7009_v36, %v8584_v31  ;;  %v2900_v4 = vrot.slane %v2899_v53, 1 }
 0x6a0   :  { %v7013_v16 = vpop.eup %7012  ;;  %6178 = vmatprep.mubr.msk.f32.mxu1 %vm903_vm0, %v2935_v52  ;;  %v2939_v24 = vmul.f32 %v7011_v19, %v8604_v62  ;;  %v2940_v30 = vmul.f32 %v7011_v19, %v8617_v42  ;;  %7024 = vrcp.f32 %v2892_v7 }
 0x6a1   :  { %v7015_v25 = vpop.eup %7014  ;;  %v2906_v55 = vadd.f32 %v2905_v45, %v2904_v34  ;;  %v2941_v51 = vmul.f32 %v7013_v16, %v8639_v46  ;;  %v2942_v56 = vmul.f32 %v7013_v16, %v8641_v26  ;;  %v2901_v37 = vadd.f32 %v2900_v4, %v2899_v53 }
 0x6a2   :  { %v7017_v44 = vpop.eup %7016  ;;  %6179 = vmatmul.mubr.msk.f32.gmra.mrb[48].mxu1 %vm903_vm0, %v2936_v18  ;;  %v2943_v12 = vmul.f32 %v7015_v25, %v8693_v27  ;;  %v2944_v31 = vmul.f32 %v7015_v25, %v8697_v61 }
 0x6a3   :  { %v7019_v11 = vpop.eup %7018  ;;  %v2907_v15 = vrot.slane %v2906_v55, 2  ;;  %6181 = vmatprep.mubr.msk.f32.mxu1 %vm903_vm0, %v2937_v43  ;;  %v2945_v62 = vmul.f32 %v7017_v44, %v8721_v1  ;;  %v2946_v42 = vmul.f32 %v7017_v44, %v8725_v59  ;;  %7026 = vrcp.f32 %v2901_v37 }
 0x6a4   :  { %v7021_v46 = vpop.eup %7020  ;;  %v2947_v26 = vmul.f32 %v7019_v11, %v8729_v3  ;;  %v2948_v40 = vmul.f32 %v7019_v11, %v8733_v22 }
 0x6a5   :  { %v7023_v20 = vpop.eup %7022  ;;  %v2908_v23 = vadd.f32 %v2907_v15, %v2906_v55  ;;  %v2949_v27 = vmul.f32 %v7021_v46, %v8744_v2  ;;  %v2950_v61 = vmul.f32 %v7021_v46, %v8747_v47 }
 0x6a6   :  { %6182 = vmatmul.mubr.msk.f32.gmra.mrb[50].mxu1 %vm903_vm0, %v2938_v57  ;;  %v2951_v58 = vmul.f32 %v7023_v20, %v8755_v13  ;;  %v2952_v1 = vmul.f32 %v7023_v20, %v8757_v14 }
 0x6a7   :  { %6184 = vmatprep.mubr.msk.f32.mxu1 %vm903_vm0, %v2939_v24  ;;  %v2909_v59 = vrot.slane %v2908_v23, 1 }
 0x6a9   :  { %v2910_v39 = vadd.f32 %v2909_v59, %v2908_v23 }
 0x6aa   :  { %v7025_v9 = vpop.eup %7024  ;;  %6185 = vmatmul.mubr.msk.f32.gmra.mrb[52].mxu1 %vm903_vm0, %v2940_v30 }
 0x6ab   :  { %6187 = vmatprep.mubr.msk.f32.mxu1 %vm903_vm0, %v2941_v51  ;;  %v2953_v3 = vmul.f32 %v7025_v9, %v8777_v5  ;;  %v2954_v22 = vmul.f32 %v7025_v9, %v8783_v10  ;;  %7028 = vrcp.f32 %v2910_v39 }
 0x6ad   :  { %v7027_v2 = vpop.eup %7026 }
 0x6ae   :  { %6188 = vmatmul.mubr.msk.f32.gmra.mrb[54].mxu1 %vm903_vm0, %v2942_v56  ;;  %v2955_v47 = vmul.f32 %v7027_v2, %v8792_v33  ;;  %v2956_v13 = vmul.f32 %v7027_v2, %v8796_v63  ;;  %v5207_v33 = vld [vmem:[%s9726_s3 + $0x200] sm:$0xff]  ;;  %v5208_v63 = vld [vmem:[%s9726_s3 + $0x208] sm:$0xff] }
 0x6af   :  { %6190 = vmatprep.mubr.msk.f32.mxu1 %vm903_vm0, %v2943_v12  ;;  %v6702_v29 = vpack.c.bf16 %v5208_v63, %v5207_v33 }
 0x6b1   :  { %6703 = vmatprep.subr.bf16.mxu1 %v6702_v29 }
 0x6b2   :  { %6191 = vmatmul.mubr.msk.f32.gmra.mrb[56].mxu1 %vm903_vm0, %v2944_v31 }
 0x6b3   :  { %6193 = vmatprep.mubr.msk.f32.mxu1 %vm903_vm0, %v2945_v62  ;;  %6705 = vmatpush3.bf16.msra.mxu1 %v6702_v29 }
 0x6b5   :  { %v7029_v14 = vpop.eup %7028 }
 0x6b6   :  { %6194 = vmatmul.mubr.msk.f32.gmra.mrb[58].mxu1 %vm903_vm0, %v2946_v42  ;;  %v2957_v5 = vmul.f32 %v7029_v14, %v8810_v28  ;;  %v2958_v10 = vmul.f32 %v7029_v14, %v8815_v38 }
 0x6b7   :  { %6196 = vmatprep.mubr.msk.f32.mxu1 %vm903_vm0, %v2947_v26 }
 0x6ba   :  { %6197 = vmatmul.mubr.msk.f32.gmra.mrb[60].mxu1 %vm903_vm0, %v2948_v40 }
 0x6bb   :  { %6199 = vmatprep.mubr.msk.f32.mxu1 %vm903_vm0, %v2949_v27 }
 0x6be   :  { %6200 = vmatmul.mubr.msk.f32.gmra.mrb[62].mxu1 %vm903_vm0, %v2950_v61 }
 0x6bf   :  { %6202 = vmatprep.mubr.msk.f32.mxu1 %vm903_vm0, %v2951_v58 }
 0x6c2   :  { %6203 = vmatmul.mubr.msk.f32.gmra.mrb[64].mxu1 %vm903_vm0, %v2952_v1 }
 0x6c3   :  { %6205 = vmatprep.mubr.msk.f32.mxu1 %vm903_vm0, %v2953_v3 }
 0x6c6   :  { %6206 = vmatmul.mubr.msk.f32.gmra.mrb[66].mxu1 %vm903_vm0, %v2954_v22 }
 0x6c7   :  { %6208 = vmatprep.mubr.msk.f32.mxu1 %vm903_vm0, %v2955_v47 }
 0x6ca   :  { %6209 = vmatmul.mubr.msk.f32.gmra.mrb[68].mxu1 %vm903_vm0, %v2956_v13 }
 0x6cb   :  { %6211 = vmatprep.mubr.msk.f32.mxu1 %vm903_vm0, %v2957_v5 }
 0x6ce   :  { %6212 = vmatmul.mubr.msk.f32.gmra.mrb[70].mxu1 %vm903_vm0, %v2958_v10 }
 0x763   :  { %v6168_v32 = vpop.f32.mrb[40].mxu1 }
 0x764   :  { %v3281_v48 = vmul.f32 %v6168_v32, %v9756_v6  ;;  %v3121_v60 = vpop.f32.mrb[41].mxu1 }
 0x765   :  { %v3280_v28 = vmul.f32 %v3121_v60, %v9757_v8 }
 0x767   :  { %v6672_v49 = vpack.c.bf16 %v3281_v48, %v3280_v28 }
 0x768   :  { %v6171_v17 = vpop.f32.mrb[42].mxu1 }
 0x769   :  { %v3283_v50 = vmul.f32 %v6171_v17, %v9756_v6  ;;  %v3131_v38 = vpop.f32.mrb[43].mxu1 }
 0x76a   :  { %v3282_v0 = vmul.f32 %v3131_v38, %v9757_v8 }
 0x76c   :  { %v6676_v35 = vpack.c.bf16 %v3283_v50, %v3282_v0 }
 0x76d   :  { %v6174_v21 = vpop.f32.mrb[44].mxu1 }
 0x76e   :  { %v3285_v41 = vmul.f32 %v6174_v21, %v9756_v6  ;;  %v3141_v54 = vpop.f32.mrb[45].mxu1 }
 0x76f   :  { %v3284_v53 = vmul.f32 %v3141_v54, %v9757_v8 }
 0x771   :  { %v6680_v34 = vpack.c.bf16 %v3285_v41, %v3284_v53  ;;  %v6177_v36 = vpop.f32.mrb[46].mxu1 }
 0x772   :  { %v3287_v52 = vmul.f32 %v6177_v36, %v9756_v6  ;;  %v3151_v18 = vpop.f32.mrb[47].mxu1 }
 0x773   :  { %v3286_v7 = vmul.f32 %v3151_v18, %v9757_v8  ;;  %v5224_v18 = vld [vmem:[%s9726_s3 + $0x288] sm:$0xff] }
 0x775   :  { %v6684_v19 = vpack.c.bf16 %v3287_v52, %v3286_v7  ;;  %v6180_v45 = vpop.f32.mrb[48].mxu1  ;;  %v5223_v52 = vld [vmem:[%s9726_s3 + $0x280] sm:$0xff] }
 0x776   :  { %v3289_v43 = vmul.f32 %v6180_v45, %v9756_v6  ;;  %v3161_v57 = vpop.f32.mrb[49].mxu1  ;;  %v6734_v45 = vpack.c.bf16 %v5224_v18, %v5223_v52 }
 0x777   :  { %v3288_v4 = vmul.f32 %v3161_v57, %v9757_v8  ;;  %v5209_v57 = vld [vmem:[%s9726_s3 + $0x210] sm:$0xff] }
 0x779   :  { %v6688_v16 = vpack.c.bf16 %v3289_v43, %v3288_v4  ;;  %v6183_v24 = vpop.f32.mrb[50].mxu1  ;;  %v7167_v43 = vld [vmem:[%s9725_s2 + $0x18] sm:$0xff] }
 0x77a   :  { %v3291_v30 = vmul.f32 %v6183_v24, %v9756_v6  ;;  %v3171_v25 = vpop.f32.mrb[51].mxu1  ;;  %v5210_v4 = vld [vmem:[%s9726_s3 + $0x218] sm:$0xff] }
 0x77b   :  { %v3290_v55 = vmul.f32 %v3171_v25, %v9757_v8  ;;  %v6706_v24 = vpack.c.bf16 %v5210_v4, %v5209_v57 }
 0x77d   :  { %v6692_v51 = vpack.c.bf16 %v3291_v30, %v3290_v55  ;;  %v6186_v56 = vpop.f32.mrb[52].mxu1  ;;  %v5226_v30 = vld [vmem:[%s9726_s3 + $0x298] sm:$0xff]  ;;  %6707 = vmatprep.subr.bf16.mxu1 %v6706_v24  ;;  %v5211_v55 = vld [vmem:[%s9726_s3 + $0x220] sm:$0xff] }
 0x77e   :  { %v8890_v37 = vmul.f32 %v6186_v56, %v9756_v6  ;;  %v3181_v44 = vpop.f32.mrb[53].mxu1  ;;  %6709 = vmatpush3.bf16.msra.mxu1 %v6706_v24  ;;  %v5227_v56 = vld [vmem:[%s9726_s3 + $0x2a0] sm:$0xff] }
 0x77f   :  { %v3292_v12 = vmul.f32 %v3181_v44, %v9757_v8  ;;  %v5228_v44 = vld [vmem:[%s9726_s3 + $0x2a8] sm:$0xff]  ;;  %v5247_v24 = vld [vmem:[%s9728_s5 + $0x120] sm:$0xff] }
 0x781   :  { %v6696_v31 = vpack.c.bf16 %v8890_v37, %v3292_v12  ;;  %v6189_v11 = vpop.f32.mrb[54].mxu1  ;;  %v6742_v12 = vpack.c.bf16 %v5228_v44, %v5227_v56  ;;  %v5252_v44 = vld [vmem:[%s9728_s5 + $0x148] sm:$0xff] }
 0x782   :  { %v3295_v15 = vmul.f32 %v6189_v11, %v9756_v6  ;;  %v3191_v62 = vpop.f32.mrb[55].mxu1  ;;  %v5214_v11 = vld [vmem:[%s9726_s3 + $0x238] sm:$0xff] }
 0x783   :  { %v3294_v42 = vmul.f32 %v3191_v62, %v9757_v8 }
 0x785   :  { %v6700_v46 = vpack.c.bf16 %v3295_v15, %v3294_v42  ;;  %v6192_v26 = vpop.f32.mrb[56].mxu1  ;;  %v5229_v15 = vld [vmem:[%s9726_s3 + $0x2b0] sm:$0xff]  ;;  %v5230_v42 = vld [vmem:[%s9726_s3 + $0x2b8] sm:$0xff] }
 0x786   :  { %v3297_v40 = vmul.f32 %v6192_v26, %v9756_v6  ;;  %v3201_v20 = vpop.f32.mrb[57].mxu1  ;;  %v5215_v26 = vld [vmem:[%s9726_s3 + $0x240] sm:$0xff] }
 0x787   :  { %v3296_v23 = vmul.f32 %v3201_v20, %v9757_v8  ;;  %v5231_v20 = vld [vmem:[%s9726_s3 + $0x2c0] sm:$0xff] }
 0x789   :  { %v6670_v27 = vpack.c.bf16 %v3297_v40, %v3296_v23  ;;  %v6195_v61 = vpop.f32.mrb[58].mxu1  ;;  %v5216_v40 = vld [vmem:[%s9726_s3 + $0x248] sm:$0xff] }
 0x78a   :  { %v3299_v58 = vmul.f32 %v6195_v61, %v9756_v6  ;;  %v3211_v1 = vpop.f32.mrb[59].mxu1  ;;  %v6718_v23 = vpack.c.bf16 %v5216_v40, %v5215_v26  ;;  %v5257_v26 = vld [vmem:[%s9728_s5 + $0x170] sm:$0xff]  ;;  %v5258_v40 = vld [vmem:[%s9728_s5 + $0x178] sm:$0xff] }
 0x78b   :  { %v3298_v59 = vmul.f32 %v3211_v1, %v9757_v8  ;;  %6671 = vmatprep.subr.bf16.mxu0 %v6670_v27  ;;  %v5232_v27 = vld [vmem:[%s9726_s3 + $0x2c8] sm:$0xff]  ;;  %v5218_v1 = vld [vmem:[%s9726_s3 + $0x258] sm:$0xff] }
 0x78c   :  { %6673 = vmatpush3.bf16.msra.mxu0 %v6672_v49  ;;  %v6750_v61 = vpack.c.bf16 %v5232_v27, %v5231_v20  ;;  %v6794_v20 = vpack.c.bf16 %v5258_v40, %v5257_v26 }
 0x78d   :  { %v6674_v39 = vpack.c.bf16 %v3299_v58, %v3298_v59  ;;  %v6198_v9 = vpop.f32.mrb[60].mxu1  ;;  %v5217_v58 = vld [vmem:[%s9726_s3 + $0x250] sm:$0xff] }
 0x78e   :  { %v3301_v3 = vmul.f32 %v6198_v9, %v9756_v6  ;;  %v3221_v22 = vpop.f32.mrb[61].mxu1  ;;  %v5233_v59 = vld [vmem:[%s9726_s3 + $0x2d0] sm:$0xff]  ;;  %v5234_v9 = vld [vmem:[%s9726_s3 + $0x2d8] sm:$0xff] }
 0x78f   :  { %v3300_v2 = vmul.f32 %v3221_v22, %v9757_v8  ;;  %6675 = vmatprep.subr.bf16.mxu0 %v6674_v39  ;;  %v6722_v39 = vpack.c.bf16 %v5218_v1, %v5217_v58  ;;  %v5220_v22 = vld [vmem:[%s9726_s3 + $0x268] sm:$0xff] }
 0x790   :  { %6677 = vmatpush3.bf16.msra.mxu0 %v6676_v35 }
 0x791   :  { %v6678_v47 = vpack.c.bf16 %v3301_v3, %v3300_v2  ;;  %v6201_v13 = vpop.f32.mrb[62].mxu1  ;;  %v5219_v3 = vld [vmem:[%s9726_s3 + $0x260] sm:$0xff]  ;;  %v6754_v2 = vpack.c.bf16 %v5234_v9, %v5233_v59 }
 0x792   :  { %v3303_v14 = vmul.f32 %v6201_v13, %v9756_v6  ;;  %v3231_v5 = vpop.f32.mrb[63].mxu1  ;;  %v5235_v13 = vld [vmem:[%s9726_s3 + $0x2e0] sm:$0xff] }
 0x793   :  { %v3302_v10 = vmul.f32 %v3231_v5, %v9757_v8  ;;  %6679 = vmatprep.subr.bf16.mxu0 %v6678_v47  ;;  %v6726_v47 = vpack.c.bf16 %v5220_v22, %v5219_v3  ;;  %v5221_v5 = vld [vmem:[%s9726_s3 + $0x270] sm:$0xff]  ;;  %v9758_v9 = vld [vmem:[#allocation7_spill] sm:$0xff] }
 0x794   :  { %6681 = vmatpush3.bf16.msra.mxu0 %v6680_v34 }
 0x795   :  { %v6682_v33 = vpack.c.bf16 %v3303_v14, %v3302_v10  ;;  %v6204_v63 = vpop.f32.mrb[64].mxu1  ;;  %v5236_v14 = vld [vmem:[%s9726_s3 + $0x2e8] sm:$0xff] }
 0x796   :  { %v3305_v29 = vmul.f32 %v6204_v63, %v9756_v6  ;;  %v3241_v32 = vpop.f32.mrb[65].mxu1  ;;  %v6758_v10 = vpack.c.bf16 %v5236_v14, %v5235_v13 }
 0x797   :  { %v3304_v48 = vmul.f32 %v3241_v32, %v9757_v8  ;;  %6683 = vmatprep.subr.bf16.mxu0 %v6682_v33  ;;  %v5222_v33 = vld [vmem:[%s9726_s3 + $0x278] sm:$0xff] }
 0x798   :  { %6685 = vmatpush3.bf16.msra.mxu0 %v6684_v19  ;;  %v6730_v63 = vpack.c.bf16 %v5222_v33, %v5221_v5  ;;  %v5238_v32 = vld [vmem:[%s9726_s3 + $0x2f8] sm:$0xff] }
 0x799   :  { %v6686_v60 = vpack.c.bf16 %v3305_v29, %v3304_v48  ;;  %v6207_v28 = vpop.f32.mrb[66].mxu1  ;;  %v5237_v29 = vld [vmem:[%s9726_s3 + $0x2f0] sm:$0xff] }
 0x79a   :  { %v3307_v49 = vmul.f32 %v6207_v28, %v9756_v6  ;;  %v3251_v17 = vpop.f32.mrb[67].mxu1  ;;  %v6762_v48 = vpack.c.bf16 %v5238_v32, %v5237_v29  ;;  %v5244_v28 = vld [vmem:[%s9728_s5 + $0x108] sm:$0xff] }
 0x79b   :  { %v3306_v50 = vmul.f32 %v3251_v17, %v9757_v8  ;;  %6687 = vmatprep.subr.bf16.mxu0 %v6686_v60  ;;  %v5243_v60 = vld [vmem:[%s9728_s5 + $0x100] sm:$0xff]  ;;  %v9761_v29 = vld [vmem:[#allocation8_spill] sm:$0xff] }
 0x79c   :  { %6689 = vmatpush3.bf16.msra.mxu0 %v6688_v16  ;;  %v5225_v16 = vld [vmem:[%s9726_s3 + $0x290] sm:$0xff] }
 0x79d   :  { %v6690_v38 = vpack.c.bf16 %v3307_v49, %v3306_v50  ;;  %v6210_v0 = vpop.f32.mrb[68].mxu1  ;;  %v6738_v25 = vpack.c.bf16 %v5226_v30, %v5225_v16  ;;  %v6766_v49 = vpack.c.bf16 %v5244_v28, %v5243_v60  ;;  %v5204_v50 = vld [vmem:[%s9727_s4 + $0x1a] ss:$0 sm:$0xff]  ;;  %v5248_v30 = vld [vmem:[%s9728_s5 + $0x128] sm:$0xff] }
 0x79e   :  { %v3309_v35 = vmul.f32 %v6210_v0, %v9756_v6  ;;  %v3261_v21 = vpop.f32.mrb[69].mxu1 }
 0x79f   :  { %v3308_v41 = vmul.f32 %v3261_v21, %v9757_v8  ;;  %6691 = vmatprep.subr.bf16.mxu0 %v6690_v38 }
 0x7a0   :  { %6693 = vmatpush3.bf16.msra.mxu0 %v6692_v51  ;;  %v5212_v51 = vld [vmem:[%s9726_s3 + $0x228] sm:$0xff] }
 0x7a1   :  { %v6694_v54 = vpack.c.bf16 %v3309_v35, %v3308_v41  ;;  %v6213_v53 = vpop.f32.mrb[70].mxu1  ;;  %v6710_v37 = vpack.c.bf16 %v5212_v51, %v5211_v55  ;;  %v5249_v55 = vld [vmem:[%s9728_s5 + $0x130] sm:$0xff]  ;;  %v5250_v51 = vld [vmem:[%s9728_s5 + $0x138] sm:$0xff] }
 0x7a2   :  { %v3311_v34 = vmul.f32 %v6213_v53, %v9756_v6  ;;  %v3271_v36 = vpop.f32.mrb[71].mxu1  ;;  %v7166_v6 = vld [vmem:[%s9725_s2] sm:$0xff]  ;;  %v6778_v56 = vpack.c.bf16 %v5250_v51, %v5249_v55 }
 0x7a3   :  { %v3310_v7 = vmul.f32 %v3271_v36, %v9757_v8  ;;  %6695 = vmatprep.subr.bf16.mxu0 %v6694_v54  ;;  %v7168_v8 = vld [vmem:[%s9725_s2 + $0x10] sm:$0xff]  ;;  %6711 = vmatprep.subr.bf16.mxu1 %v6710_v37 }
 0x7a4   :  { %6697 = vmatpush3.bf16.msra.mxu0 %v6696_v31  ;;  %6713 = vmatpush3.bf16.msra.mxu1 %v6710_v37  ;;  %v5213_v31 = vld [vmem:[%s9726_s3 + $0x230] sm:$0xff]  ;;  %v5251_v37 = vld [vmem:[%s9728_s5 + $0x140] sm:$0xff] }
 0x7a5   :  { %v6698_v19 = vpack.c.bf16 %v3311_v34, %v3310_v7  ;;  %v6714_v62 = vpack.c.bf16 %v5214_v11, %v5213_v31  ;;  %v5253_v31 = vld [vmem:[%s9728_s5 + $0x150] sm:$0xff]  ;;  %v5254_v11 = vld [vmem:[%s9728_s5 + $0x158] sm:$0xff] }
 0x7a7   :  { %6699 = vmatprep.subr.bf16.mxu0 %v6698_v19  ;;  %6715 = vmatprep.subr.bf16.mxu1 %v6714_v62 }
 0x7a8   :  { %6701 = vmatpush3.bf16.msra.mxu0 %v6700_v46  ;;  %v6746_v46 = vpack.c.bf16 %v5230_v42, %v5229_v15  ;;  %6717 = vmatpush3.bf16.msra.mxu1 %v6714_v62  ;;  %v6786_v15 = vpack.c.bf16 %v5254_v11, %v5253_v31  ;;  %v5255_v62 = vld [vmem:[%s9728_s5 + $0x160] sm:$0xff]  ;;  %v5256_v42 = vld [vmem:[%s9728_s5 + $0x168] sm:$0xff] }
 0x7a9   :  { %6735 = vmatprep.subr.bf16.mxu0 %v6734_v45  ;;  %6719 = vmatprep.subr.bf16.mxu1 %v6718_v23 }
 0x7ab   :  { %3381 = vmatmul.mubr.f32.vlgmr.msra.gmra.mrb[70].mxu0 %v7166_v6  ;;  %v5245_v6 = vld [vmem:[%s9728_s5 + $0x110] sm:$0xff] }
 0x7ac   :  { %3385 = vmatprep.mubr.f32.mxu0 %v7167_v43  ;;  %6737 = vmatpush3.bf16.msra.mxu0 %v6734_v45  ;;  %v5246_v43 = vld [vmem:[%s9728_s5 + $0x118] sm:$0xff] }
 0x7ad   :  { %6739 = vmatprep.subr.bf16.mxu0 %v6738_v25  ;;  %6721 = vmatpush3.bf16.msra.mxu1 %v6718_v23  ;;  %v6770_v4 = vpack.c.bf16 %v5246_v43, %v5245_v6  ;;  %v5260_v23 = vld [vmem:[%s9727_s4 + $0x29] ss:$0 sm:$0xff] }
 0x7ae   :  { %6723 = vmatprep.subr.bf16.mxu1 %v6722_v39 }
 0x7af   :  { %3386 = vmatmul.mubr.f32.gmra.mrb[72].mxu0 %v7168_v8 }
 0x7b0   :  { %6741 = vmatpush3.bf16.msra.mxu0 %v6738_v25  ;;  %v6774_v25 = vpack.c.bf16 %v5248_v30, %v5247_v24 }
 0x7b1   :  { %6743 = vmatprep.subr.bf16.mxu0 %v6742_v12  ;;  %6725 = vmatpush3.bf16.msra.mxu1 %v6722_v39 }
 0x7b2   :  { %6727 = vmatprep.subr.bf16.mxu1 %v6726_v47 }
 0x7b4   :  { %6745 = vmatpush3.bf16.msra.mxu0 %v6742_v12  ;;  %v6782_v12 = vpack.c.bf16 %v5252_v44, %v5251_v37 }
 0x7b5   :  { %6747 = vmatprep.subr.bf16.mxu0 %v6746_v46  ;;  %6729 = vmatpush3.bf16.msra.mxu1 %v6726_v47  ;;  %v5259_v47 = vld [vmem:[%s9727_s4 + $0x28] ss:$0 sm:$0xff] }
 0x7b6   :  { %6731 = vmatprep.subr.bf16.mxu1 %v6730_v63 }
 0x7b8   :  { %6749 = vmatpush3.bf16.msra.mxu0 %v6746_v46  ;;  %v6790_v46 = vpack.c.bf16 %v5256_v42, %v5255_v62 }
 0x7b9   :  { %6751 = vmatprep.subr.bf16.mxu0 %v6750_v61  ;;  %6733 = vmatpush3.bf16.msra.mxu1 %v6730_v63 }
 0x7ba   :  { %6767 = vmatprep.subr.bf16.mxu1 %v6766_v49 }
 0x7bc   :  { %6753 = vmatpush3.bf16.msra.mxu0 %v6750_v61 }
 0x7bd   :  { %6755 = vmatprep.subr.bf16.mxu0 %v6754_v2 }
 0x7c0   :  { %6757 = vmatpush3.bf16.msra.mxu0 %v6754_v2 }
 0x7c1   :  { %6759 = vmatprep.subr.bf16.mxu0 %v6758_v10 }
 0x7c4   :  { %6761 = vmatpush3.bf16.msra.mxu0 %v6758_v10 }
 0x7c5   :  { %6763 = vmatprep.subr.bf16.mxu0 %v6762_v48 }
 0x7c8   :  { %6765 = vmatpush3.bf16.msra.mxu0 %v6762_v48 }
 0x87e   :  { %v5618_v17 = vpop.f32.mrb[70].mxu0 }
 0x87f   :  { %v5619_v38 = vpop.f32.mrb[71].mxu0 }
 0x880   :  { %v5620_v0 = vadd.f32 %v5619_v38, %v5618_v17 }
 0x882   :  { %v3383_v35 = vadd.f32 %v5620_v0, %v5204_v50  ;;  %v5621_v21 = vpop.f32.mrb[72].mxu0 }
 0x883   :  { %v5622_v41 = vpop.f32.mrb[73].mxu0 }
 0x884   :  { %v3393_v54 = vmin.f32 %v3383_v35, 0.0  ;;  %v5623_v53 = vadd.f32 %v5622_v41, %v5621_v21  ;;  %vm3391_vm5 = vcmp.gt.f32.partialorder %v3383_v35, 0.0 }
 0x886   :  { %v3395_v34 = vmul.f32 1.442695, %v3393_v54  ;;  %v3388_v36 = vadd.f32 %v5623_v53, %v5204_v50 }
 0x888   :  { %7030 = vpow2.f32 %v3395_v34  ;;  %v3394_v52 = vmin.f32 %v3388_v36, 0.0  ;;  %vm3392_vm6 = vcmp.gt.f32.partialorder %v3388_v36, 0.0 }
 0x88a   :  { %v3397_v18 = vmul.f32 1.442695, %v3394_v52 }
 0x88c   :  { %7032 = vpow2.f32 %v3397_v18 }
 0x892   :  { %v7031_v7 = vpop.eup %7030 }
 0x893   :  { %v5205_v19 = vadd.f32 -1.0, %v7031_v7 }
 0x895   :  { %v3401_v45 = vsel %vm3391_vm5, %v3383_v35, %v5205_v19 }
 0x896   :  { %v7033_v8 = vpop.eup %7032  ;;  %6246 = vmatprep.mubr.f32.mxu1 %v3401_v45  ;;  %6281 = vmatprep.mubr.f32.mxu0 %v3401_v45 }
 0x897   :  { %v5206_v57 = vadd.f32 -1.0, %v7033_v8 }
 0x899   :  { %v3402_v16 = vsel %vm3392_vm6, %v3388_v36, %v5206_v57 }
 0x89a   :  { %6247 = vmatmul.mubr.f32.vlgmr.msra.gmra.mrb[72].mxu1 %v3402_v16  ;;  %6282 = vmatmul.mubr.f32.vlgmr.msra.gmra.mrb[74].mxu0 %v3402_v16 }
 0x89b   :  { %6769 = vmatpush3.bf16.msra.mxu1 %v6766_v49 }
 0x89c   :  { %6771 = vmatprep.subr.bf16.mxu1 %v6770_v4 }
 0x89f   :  { %6773 = vmatpush3.bf16.msra.mxu1 %v6770_v4 }
 0x8a0   :  { %6775 = vmatprep.subr.bf16.mxu1 %v6774_v25 }
 0x8a3   :  { %6777 = vmatpush3.bf16.msra.mxu1 %v6774_v25 }
 0x8a4   :  { %6779 = vmatprep.subr.bf16.mxu1 %v6778_v56 }
 0x8a7   :  { %6781 = vmatpush3.bf16.msra.mxu1 %v6778_v56 }
 0x8a8   :  { %6783 = vmatprep.subr.bf16.mxu1 %v6782_v12 }
 0x8ab   :  { %6785 = vmatpush3.bf16.msra.mxu1 %v6782_v12 }
 0x8ac   :  { %6787 = vmatprep.subr.bf16.mxu1 %v6786_v15 }
 0x8af   :  { %6789 = vmatpush3.bf16.msra.mxu1 %v6786_v15 }
 0x8b0   :  { %6791 = vmatprep.subr.bf16.mxu1 %v6790_v46 }
 0x8b3   :  { %6793 = vmatpush3.bf16.msra.mxu1 %v6790_v46 }
 0x8b4   :  { %6795 = vmatprep.subr.bf16.mxu1 %v6794_v20 }
 0x8b7   :  { %6797 = vmatpush3.bf16.msra.mxu1 %v6794_v20 }
 0x96d   :  { %v6248_v27 = vpop.f32.mrb[72].mxu1  ;;  %v6283_v61 = vpop.f32.mrb[74].mxu0 }
 0x96e   :  { %v3529_v58 = vpop.f32.mrb[73].mxu1  ;;  %v3608_v1 = vpop.f32.mrb[75].mxu0  ;;  %v9072_v10 = vadd.f32 %v6248_v27, %v5259_v47  ;;  %v9090_v8 = vadd.f32 %v6283_v61, %v5260_v23 }
 0x96f   :  { %v3609_v59 = vadd.f32 %v5260_v23, %v3608_v1  ;;  %v9074_v33 = vadd.f32 %v5259_v47, %v3529_v58 }
 0x970   :  { %9759 = vst [vmem:[#allocation9_spill] sm:$0xff] %v9072_v10  ;;  %v3675_v56 = vrot.slane %v9090_v8, %v9758_v9 }
 0x971   :  { %v3619_v39 = vcombine.high %v3609_v59, %v3609_v59  ;;  %v3626_v3 = vrot.slane %v3609_v59, %v9758_v9  ;;  %9760 = vst [vmem:[#allocation10_spill] sm:$0xff] %v9074_v33 }
 0x972   :  { %v3683_v46 = vcombine.high %v3675_v56, %v3675_v56  ;;  %v3691_v26 = vrot.slane %v3675_v56, %v9758_v9 }
 0x973   :  { %v3634_v22 = vcombine.high %v3626_v3, %v3626_v3  ;;  %v3642_v2 = vrot.slane %v3626_v3, %v9758_v9  ;;  %v3633_v13 = vrot.slane %v3619_v39, %v9758_v9 }
 0x974   :  { %v3752_v59 = vrot.slane %v3691_v26, %v9761_v29  ;;  %v3705_v39 = vrot.slane %v3683_v46, %v9758_v9 }
 0x975   :  { %v3656_v14 = vrot.slane %v3634_v22, %v9758_v9  ;;  %v3664_v5 = vcombine.high %v3642_v2, %v3642_v2  ;;  %v3720_v32 = vrot.slane %v3642_v2, %v9761_v29  ;;  %v3635_v28 = vcombine.high %v3633_v13, %v3633_v13 }
 0x976   :  { %v3649_v49 = vrot.slane %v3633_v13, %v9758_v9 }
 0x977   :  { %v3666_v63 = vcombine.high %v3656_v14, %v3656_v14  ;;  %v3724_v48 = vrot.slane %v3656_v14, %v9761_v29  ;;  %v3728_v60 = vrot.slane %v3664_v5, %v9761_v29  ;;  %v3797_v17 = vadd.f32 %v3720_v32, %v9074_v33 }
 0x978   :  { %v3798_v50 = vadd.f32 %v3720_v32, %v9072_v10  ;;  %v3663_v18 = vrot.slane %v3635_v28, %v9758_v9  ;;  %v3736_v43 = vrot.slane %v3649_v49, %v9761_v29  ;;  %v3665_v30 = vcombine.high %v3649_v49, %v3649_v49 }
 0x979   :  { %v3799_v38 = vadd.f32 %v3724_v48, %v9074_v33  ;;  %v3800_v0 = vadd.f32 %v3724_v48, %v9072_v10  ;;  %v3801_v35 = vadd.f32 %v3728_v60, %v9074_v33  ;;  %v3732_v21 = vrot.slane %v3666_v63, %v9761_v29 }
 0x97a   :  { %vm3829_vm7 = vcmp.gt.f32.partialorder %v3797_v17, 0.0  ;;  %v3861_v41 = vmul.f32 0.2, %v3797_v17  ;;  %vm3830_vm8 = vcmp.gt.f32.partialorder %v3798_v50, 0.0  ;;  %v3862_v54 = vmul.f32 0.2, %v3798_v50 }
 0x97b   :  { %vm3831_vm9 = vcmp.gt.f32.partialorder %v3799_v38, 0.0  ;;  %v3863_v53 = vmul.f32 0.2, %v3799_v38  ;;  %v3802_v52 = vadd.f32 %v3728_v60, %v9072_v10  ;;  %v3864_v19 = vmul.f32 0.2, %v3800_v0 }
 0x97c   :  { %v3893_v34 = vsel %vm3829_vm7, %v3797_v17, %v3861_v41  ;;  %v3894_v36 = vsel %vm3830_vm8, %v3798_v50, %v3862_v54  ;;  %vm3832_vm10 = vcmp.gt.f32.partialorder %v3800_v0, 0.0  ;;  %v3865_v45 = vmul.f32 0.2, %v3801_v35 }
 0x97d   :  { %6316 = vmatprep.mubr.f32.mxu1 %v3893_v34  ;;  %v3895_v7 = vsel %vm3831_vm9, %v3799_v38, %v3863_v53  ;;  %v3803_v6 = vadd.f32 %v3732_v21, %v9074_v33  ;;  %vm3833_vm11 = vcmp.gt.f32.partialorder %v3801_v35, 0.0  ;;  %v3866_v57 = vmul.f32 0.2, %v3802_v52 }
 0x97e   :  { %6317 = vmatmul.mubr.f32.vlgmr.msra.gmra.mrb[74].mxu1 %v3894_v36  ;;  %v3896_v4 = vsel %vm3832_vm10, %v3800_v0, %v3864_v19  ;;  %vm3834_vm12 = vcmp.gt.f32.partialorder %v3802_v52, 0.0  ;;  %v3804_v16 = vadd.f32 %v3732_v21, %v9072_v10  ;;  %v3740_v24 = vrot.slane %v3663_v18, %v9761_v29 }
 0x97f   :  { %6319 = vmatprep.mubr.f32.mxu1 %v3895_v7  ;;  %v3897_v25 = vsel %vm3833_vm11, %v3801_v35, %v3865_v45  ;;  %v3867_v55 = vmul.f32 0.2, %v3803_v6  ;;  %v3805_v51 = vadd.f32 %v3736_v43, %v9074_v33  ;;  %vm3835_vm13 = vcmp.gt.f32.partialorder %v3803_v6, 0.0 }
 0x980   :  { %v3898_v37 = vsel %vm3834_vm12, %v3802_v52, %v3866_v57  ;;  %vm3836_vm14 = vcmp.gt.f32.partialorder %v3804_v16, 0.0  ;;  %v3868_v44 = vmul.f32 0.2, %v3804_v16  ;;  %v3806_v12 = vadd.f32 %v3736_v43, %v9072_v10 }
 0x981   :  { %v3807_v31 = vadd.f32 %v3740_v24, %v9074_v33  ;;  %v3899_v11 = vsel %vm3835_vm13, %v3803_v6, %v3867_v55  ;;  %v3869_v15 = vmul.f32 0.2, %v3805_v51  ;;  %v3744_v62 = vrot.slane %v3665_v30, %v9761_v29 }
 0x982   :  { %6320 = vmatmul.mubr.f32.gmra.mrb[76].mxu1 %v3896_v4  ;;  %v3667_v42 = vcombine.high %v3663_v18, %v3663_v18  ;;  %vm3837_vm15 = vcmp.gt.f32.partialorder %v3805_v51, 0.0  ;;  %v3900_v40 = vsel %vm3836_vm14, %v3804_v16, %v3868_v44  ;;  %vm3838_vm1 = vcmp.gt.f32.partialorder %v3806_v12, 0.0 }
 0x983   :  { %6322 = vmatprep.mubr.f32.mxu1 %v3897_v25  ;;  %v3870_v20 = vmul.f32 0.2, %v3806_v12  ;;  %v3808_v23 = vadd.f32 %v3740_v24, %v9072_v10  ;;  %v3901_v27 = vsel %vm3837_vm15, %v3805_v51, %v3869_v15  ;;  %v3871_v61 = vmul.f32 0.2, %v3807_v31 }
 0x984   :  { %v3809_v58 = vadd.f32 %v3744_v62, %v9074_v33  ;;  %v3748_v1 = vrot.slane %v3667_v42, %v9761_v29  ;;  %vm3839_vm2 = vcmp.gt.f32.partialorder %v3807_v31, 0.0  ;;  %v3810_v2 = vadd.f32 %v3744_v62, %v9072_v10 }
 0x985   :  { %v3902_v3 = vsel %vm3838_vm1, %v3806_v12, %v3870_v20  ;;  %v3872_v22 = vmul.f32 0.2, %v3808_v23  ;;  %v3903_v47 = vsel %vm3839_vm2, %v3807_v31, %v3871_v61  ;;  %vm3840_vm3 = vcmp.gt.f32.partialorder %v3808_v23, 0.0 }
 0x986   :  { %6323 = vmatmul.mubr.f32.gmra.mrb[78].mxu1 %v3898_v37  ;;  %v3873_v13 = vmul.f32 0.2, %v3809_v58  ;;  %v3811_v14 = vadd.f32 %v3748_v1, %v9074_v33  ;;  %vm3841_vm4 = vcmp.gt.f32.partialorder %v3809_v58, 0.0  ;;  %v3668_v5 = vcombine.high %v9090_v8, %v9090_v8 }
 0x987   :  { %6325 = vmatprep.mubr.f32.mxu1 %v3899_v11  ;;  %v3813_v63 = vadd.f32 %v3752_v59, %v9074_v33  ;;  %v3713_v32 = vcombine.high %v3691_v26, %v3691_v26  ;;  %v3904_v48 = vsel %vm3840_vm3, %v3808_v23, %v3872_v22  ;;  %v3874_v60 = vmul.f32 0.2, %v3810_v2 }
 0x988   :  { %v3812_v28 = vadd.f32 %v3748_v1, %v9072_v10  ;;  %v3905_v49 = vsel %vm3841_vm4, %v3809_v58, %v3873_v13  ;;  %vm3842_vm5 = vcmp.gt.f32.partialorder %v3810_v2, 0.0  ;;  %v3875_v17 = vmul.f32 0.2, %v3811_v14 }
 0x989   :  { %v3756_v50 = vrot.slane %v3705_v39, %v9761_v29  ;;  %vm3843_vm6 = vcmp.gt.f32.partialorder %v3811_v14, 0.0  ;;  %v3682_v38 = vrot.slane %v3668_v5, %v9758_v9  ;;  %v3715_v0 = vcombine.high %v3705_v39, %v3705_v39 }
 0x98a   :  { %6326 = vmatmul.mubr.f32.gmra.mrb[80].mxu1 %v3900_v40  ;;  %vm3845_vm7 = vcmp.gt.f32.partialorder %v3813_v63, 0.0  ;;  %v3906_v35 = vsel %vm3842_vm5, %v3810_v2, %v3874_v60  ;;  %v3876_v21 = vmul.f32 0.2, %v3812_v28  ;;  %v3877_v41 = vmul.f32 0.2, %v3813_v63 }
 0x98b   :  { %6328 = vmatprep.mubr.f32.mxu1 %v3901_v27  ;;  %v3814_v54 = vadd.f32 %v3752_v59, %v9072_v10  ;;  %v3907_v53 = vsel %vm3843_vm6, %v3811_v14, %v3875_v17  ;;  %vm3844_vm8 = vcmp.gt.f32.partialorder %v3812_v28, 0.0  ;;  %v3815_v34 = vadd.f32 %v3756_v50, %v9074_v33 }
 0x98c   :  { %v3760_v36 = vrot.slane %v3713_v32, %v9761_v29  ;;  %v3684_v52 = vcombine.high %v3682_v38, %v3682_v38  ;;  %v3698_v18 = vrot.slane %v3682_v38, %v9758_v9  ;;  %v3908_v7 = vsel %vm3844_vm8, %v3812_v28, %v3876_v21  ;;  %v5239_v21 = vld [vmem:[%s9727_s4 + $0x20] sm:$0xff] }
 0x98d   :  { %v3909_v19 = vsel %vm3845_vm7, %v3813_v63, %v3877_v41  ;;  %v3878_v45 = vmul.f32 0.2, %v3814_v54  ;;  %v3816_v6 = vadd.f32 %v3756_v50, %v9072_v10  ;;  %vm3846_vm9 = vcmp.gt.f32.partialorder %v3814_v54, 0.0  ;;  %6364 = vmatprep.subr.mxu0 %v5239_v21 }
 0x98e   :  { %6329 = vmatmul.mubr.f32.gmra.mrb[82].mxu1 %v3902_v3  ;;  %v3879_v43 = vmul.f32 0.2, %v3815_v34  ;;  %v3817_v8 = vadd.f32 %v3760_v36, %v9074_v33  ;;  %v3764_v57 = vrot.slane %v3715_v0, %v9761_v29  ;;  %vm3847_vm10 = vcmp.gt.f32.partialorder %v3815_v34, 0.0  ;;  %6365 = vmatpush3.msra.mxu0 %v5239_v21 }
 0x98f   :  { %6331 = vmatprep.mubr.f32.mxu1 %v3903_v47  ;;  %v3712_v4 = vrot.slane %v3684_v52, %v9758_v9  ;;  %v3910_v16 = vsel %vm3846_vm9, %v3814_v54, %v3878_v45  ;;  %v3880_v24 = vmul.f32 0.2, %v3816_v6  ;;  %v3818_v30 = vadd.f32 %v3760_v36, %v9072_v10  ;;  %v7170_v54 = vld [vmem:[%s9724_s1 + $0x8] sm:$0xff]  ;;  %v7171_v36 = vld [vmem:[%s9724_s1] sm:$0xff] }
 0x990   :  { %v3768_v25 = vrot.slane %v3698_v18, %v9761_v29  ;;  %v3911_v55 = vsel %vm3847_vm10, %v3815_v34, %v3879_v43  ;;  %vm3848_vm11 = vcmp.gt.f32.partialorder %v3816_v6, 0.0  ;;  %v3881_v51 = vmul.f32 0.2, %v3817_v8 }
 0x991   :  { %v3819_v56 = vadd.f32 %v3764_v57, %v9074_v33  ;;  %vm3849_vm12 = vcmp.gt.f32.partialorder %v3817_v8, 0.0  ;;  %v3714_v37 = vcombine.high %v3698_v18, %v3698_v18  ;;  %v3912_v44 = vsel %vm3848_vm11, %v3816_v6, %v3880_v24  ;;  %v7172_v6 = vld [vmem:[%s9724_s1 + $0x18] sm:$0xff] }
 0x992   :  { %6332 = vmatmul.mubr.f32.gmra.mrb[84].mxu1 %v3904_v48  ;;  %v3882_v12 = vmul.f32 0.2, %v3818_v30  ;;  %v3820_v31 = vadd.f32 %v3764_v57, %v9072_v10  ;;  %v3821_v9 = vadd.f32 %v3768_v25, %v9074_v33  ;;  %v3913_v11 = vsel %vm3849_vm12, %v3817_v8, %v3881_v51  ;;  %v7173_v57 = vld [vmem:[%s9724_s1 + $0x10] sm:$0xff] }
 0x993   :  { %6334 = vmatprep.mubr.f32.mxu1 %v3905_v49  ;;  %vm3850_vm13 = vcmp.gt.f32.partialorder %v3818_v30, 0.0  ;;  %v3883_v15 = vmul.f32 0.2, %v3819_v56  ;;  %v3772_v62 = vrot.slane %v3712_v4, %v9761_v29  ;;  %vm3851_vm14 = vcmp.gt.f32.partialorder %v3819_v56, 0.0 }
 0x994   :  { %v3822_v42 = vadd.f32 %v3768_v25, %v9072_v10  ;;  %v3914_v46 = vsel %vm3850_vm13, %v3818_v30, %v3882_v12  ;;  %vm3852_vm15 = vcmp.gt.f32.partialorder %v3820_v31, 0.0  ;;  %v3884_v26 = vmul.f32 0.2, %v3820_v31  ;;  %v7175_v12 = vld [vmem:[%s9724_s1 + $0x20] sm:$0xff] }
 0x995   :  { %v3885_v40 = vmul.f32 0.2, %v3821_v9  ;;  %v3915_v20 = vsel %vm3851_vm14, %v3819_v56, %v3883_v15  ;;  %v3823_v23 = vadd.f32 %v3772_v62, %v9074_v33  ;;  %v3776_v27 = vrot.slane %v3714_v37, %v9761_v29  ;;  %v7174_v56 = vld [vmem:[%s9724_s1 + $0x28] sm:$0xff] }
 0x996   :  { %6335 = vmatmul.mubr.f32.gmra.mrb[86].mxu1 %v3906_v35  ;;  %v3716_v61 = vcombine.high %v3712_v4, %v3712_v4  ;;  %vm3853_vm1 = vcmp.gt.f32.partialorder %v3821_v9, 0.0  ;;  %v3916_v58 = vsel %vm3852_vm15, %v3820_v31, %v3884_v26  ;;  %vm3854_vm2 = vcmp.gt.f32.partialorder %v3822_v42, 0.0  ;;  %v7169_v35 = vld [vmem:[%s9725_s2 + $0x8] sm:$0xff] }
 0x997   :  { %6337 = vmatprep.mubr.f32.mxu1 %v3907_v53  ;;  %v3886_v1 = vmul.f32 0.2, %v3822_v42  ;;  %v3824_v59 = vadd.f32 %v3772_v62, %v9072_v10  ;;  %v3917_v39 = vsel %vm3853_vm1, %v3821_v9, %v3885_v40  ;;  %v3887_v3 = vmul.f32 0.2, %v3823_v23 }
 0x998   :  { %v3825_v22 = vadd.f32 %v3776_v27, %v9074_v33  ;;  %v3780_v2 = vrot.slane %v3716_v61, %v9761_v29  ;;  %vm3855_vm3 = vcmp.gt.f32.partialorder %v3823_v23, 0.0  ;;  %v3826_v14 = vadd.f32 %v3776_v27, %v9072_v10  ;;  %v7177_v61 = vld [vmem:[%s9724_s1 + $0x30] sm:$0xff] }
 0x999   :  { %v3918_v47 = vsel %vm3854_vm2, %v3822_v42, %v3886_v1  ;;  %v3888_v13 = vmul.f32 0.2, %v3824_v59  ;;  %v3919_v5 = vsel %vm3855_vm3, %v3823_v23, %v3887_v3  ;;  %vm3856_vm4 = vcmp.gt.f32.partialorder %v3824_v59, 0.0 }
 0x99a   :  { %6338 = vmatmul.mubr.f32.gmra.mrb[88].mxu1 %v3908_v7  ;;  %v3889_v63 = vmul.f32 0.2, %v3825_v22  ;;  %v3827_v32 = vadd.f32 %v3780_v2, %v9074_v33  ;;  %vm3857_vm5 = vcmp.gt.f32.partialorder %v3825_v22, 0.0  ;;  %v3890_v60 = vmul.f32 0.2, %v3826_v14 }
 0x99b   :  { %6340 = vmatprep.mubr.f32.mxu1 %v3909_v19  ;;  %v3920_v48 = vsel %vm3856_vm4, %v3824_v59, %v3888_v13  ;;  %v3828_v28 = vadd.f32 %v3780_v2, %v9072_v10  ;;  %vm3858_vm6 = vcmp.gt.f32.partialorder %v3826_v14, 0.0 }
 0x99c   :  { %v3921_v29 = vsel %vm3857_vm5, %v3825_v22, %v3889_v63  ;;  %v3891_v49 = vmul.f32 0.2, %v3827_v32  ;;  %vm3859_vm7 = vcmp.gt.f32.partialorder %v3827_v32, 0.0  ;;  %v3922_v17 = vsel %vm3858_vm6, %v3826_v14, %v3890_v60  ;;  %v7179_v60 = vld [vmem:[%s9724_s1 + $0x40] sm:$0xff] }
 0x99d   :  { %v3892_v50 = vmul.f32 0.2, %v3828_v28  ;;  %vm3860_vm8 = vcmp.gt.f32.partialorder %v3828_v28, 0.0 }
 0x99e   :  { %6341 = vmatmul.mubr.f32.gmra.mrb[90].mxu1 %v3910_v16  ;;  %v3923_v38 = vsel %vm3859_vm7, %v3827_v32, %v3891_v49  ;;  %v7178_v32 = vld [vmem:[%s9724_s1 + $0x48] sm:$0xff] }
 0x99f   :  { %6343 = vmatprep.mubr.f32.mxu1 %v3911_v55  ;;  %v3924_v0 = vsel %vm3860_vm8, %v3828_v28, %v3892_v50 }
 0x9a2   :  { %6344 = vmatmul.mubr.f32.gmra.mrb[92].mxu1 %v3912_v44 }
 0x9a3   :  { %6346 = vmatprep.mubr.f32.mxu1 %v3913_v11 }
 0x9a6   :  { %6347 = vmatmul.mubr.f32.gmra.mrb[94].mxu1 %v3914_v46 }
 0x9a7   :  { %6349 = vmatprep.mubr.f32.mxu1 %v3915_v20  ;;  %v7176_v20 = vld [vmem:[%s9724_s1 + $0x38] sm:$0xff] }
 0x9aa   :  { %6350 = vmatmul.mubr.f32.gmra.mrb[96].mxu1 %v3916_v58 }
 0x9ab   :  { %6352 = vmatprep.mubr.f32.mxu1 %v3917_v39 }
 0x9ae   :  { %6353 = vmatmul.mubr.f32.gmra.mrb[98].mxu1 %v3918_v47 }
 0x9af   :  { %6355 = vmatprep.mubr.f32.mxu1 %v3919_v5 }
 0x9b2   :  { %6356 = vmatmul.mubr.f32.gmra.mrb[100].mxu1 %v3920_v48 }
 0x9b3   :  { %6358 = vmatprep.mubr.f32.mxu1 %v3921_v29 }
 0x9b6   :  { %6359 = vmatmul.mubr.f32.gmra.mrb[102].mxu1 %v3922_v17 }
 0x9b7   :  { %6361 = vmatprep.mubr.f32.mxu1 %v3923_v38 }
 0x9ba   :  { %6362 = vmatmul.mubr.f32.gmra.mrb[104].mxu1 %v3924_v0 }
 0x9bb   :  { %5003 = vmatprep.mubr.f32.mxu1 %v7169_v35 }
 0xa51   :  { %v6318_v41 = vpop.f32.mrb[74].mxu1 }
 0xa52   :  { %v3997_v53 = vadd.f32 %v7170_v54, %v6318_v41  ;;  %v3991_v34 = vpop.f32.mrb[75].mxu1 }
 0xa53   :  { %v3992_v52 = vadd.f32 %v7171_v36, %v3991_v34 }
 0xa54   :  { %v4151_v18 = vsel %vm903_vm0, %v3997_v53, -inf }
 0xa55   :  { %v4150_v7 = vsel %vm903_vm0, %v3992_v52, -inf  ;;  %v6321_v19 = vpop.f32.mrb[76].mxu1 }
 0xa56   :  { %v4152_v45 = vmax.f32 %v4150_v7, %v4151_v18  ;;  %v9154_v43 = vadd.f32 %v7172_v6, %v6321_v19  ;;  %v4001_v8 = vpop.f32.mrb[77].mxu1 }
 0xa57   :  { %v9159_v4 = vadd.f32 %v7173_v57, %v4001_v8 }
 0xa58   :  { %v4153_v16 = vrot.slane %v4152_v45, 4  ;;  %v4160_v24 = vsel %vm903_vm0, %v9154_v43, -inf }
 0xa59   :  { %v4159_v30 = vsel %vm903_vm0, %v9159_v4, -inf  ;;  %v6324_v25 = vpop.f32.mrb[78].mxu1 }
 0xa5a   :  { %v4154_v55 = vmax.f32 %v4152_v45, %v4153_v16  ;;  %v4161_v51 = vmax.f32 %v4159_v30, %v4160_v24  ;;  %v9168_v37 = vadd.f32 %v7174_v56, %v6324_v25  ;;  %v4011_v44 = vpop.f32.mrb[79].mxu1  ;;  %v7181_v45 = vld [vmem:[%s9724_s1 + $0x50] sm:$0xff] }
 0xa5b   :  { %v9173_v31 = vadd.f32 %v7175_v12, %v4011_v44 }
 0xa5c   :  { %v4155_v9 = vrot.slane %v4154_v55, 2  ;;  %v4162_v11 = vrot.slane %v4161_v51, 4  ;;  %v4169_v15 = vsel %vm903_vm0, %v9168_v37, -inf }
 0xa5d   :  { %v4168_v62 = vsel %vm903_vm0, %v9173_v31, -inf  ;;  %v6327_v42 = vpop.f32.mrb[80].mxu1 }
 0xa5e   :  { %v4156_v46 = vmax.f32 %v4154_v55, %v4155_v9  ;;  %v4163_v26 = vmax.f32 %v4161_v51, %v4162_v11  ;;  %v4170_v40 = vmax.f32 %v4168_v62, %v4169_v15  ;;  %v9182_v23 = vadd.f32 %v7176_v20, %v6327_v42  ;;  %v4021_v27 = vpop.f32.mrb[81].mxu1 }
 0xa5f   :  { %v9187_v58 = vadd.f32 %v7177_v61, %v4021_v27 }
 0xa60   :  { %v4157_v1 = vrot.slane %v4156_v46, 1  ;;  %v4164_v59 = vrot.slane %v4163_v26, 2  ;;  %v4171_v39 = vrot.slane %v4170_v40, 4  ;;  %v4178_v3 = vsel %vm903_vm0, %v9182_v23, -inf }
 0xa61   :  { %v4177_v22 = vsel %vm903_vm0, %v9187_v58, -inf  ;;  %v6330_v2 = vpop.f32.mrb[82].mxu1 }
 0xa62   :  { %v4158_v47 = vmax.f32 %v4156_v46, %v4157_v1  ;;  %v4165_v13 = vmax.f32 %v4163_v26, %v4164_v59  ;;  %v4172_v14 = vmax.f32 %v4170_v40, %v4171_v39  ;;  %v4179_v5 = vmax.f32 %v4177_v22, %v4178_v3  ;;  %v4031_v63 = vpop.f32.mrb[83].mxu1  ;;  %v7183_v26 = vld [vmem:[%s9724_s1 + $0x60] sm:$0xff] }
 0xa63   :  { %v9196_v48 = vadd.f32 %v7178_v32, %v6330_v2  ;;  %v9201_v28 = vadd.f32 %v7179_v60, %v4031_v63  ;;  %v7185_v63 = vld [vmem:[%s9724_s1 + $0x70] sm:$0xff] }
 0xa64   :  { %v4294_v29 = vsub.f32 %v3992_v52, %v4158_v47  ;;  %v4295_v49 = vsub.f32 %v3997_v53, %v4158_v47  ;;  %v4166_v17 = vrot.slane %v4165_v13, 1  ;;  %v4173_v50 = vrot.slane %v4172_v14, 2  ;;  %v7180_v53 = vld [vmem:[%s9724_s1 + $0x58] sm:$0xff] }
 0xa65   :  { %v4180_v38 = vrot.slane %v4179_v5, 4  ;;  %v4187_v0 = vsel %vm903_vm0, %v9196_v48, -inf  ;;  %v4186_v35 = vsel %vm903_vm0, %v9201_v28, -inf  ;;  %v6333_v21 = vpop.f32.mrb[84].mxu1 }
 0xa66   :  { %v4326_v41 = vmul.f32 1.442695, %v4294_v29  ;;  %v4328_v54 = vmul.f32 1.442695, %v4295_v49  ;;  %v4167_v34 = vmax.f32 %v4165_v13, %v4166_v17  ;;  %v4174_v36 = vmax.f32 %v4172_v14, %v4173_v50  ;;  %v4041_v18 = vpop.f32.mrb[85].mxu1  ;;  %v7184_v14 = vld [vmem:[%s9724_s1 + $0x78] sm:$0xff] }
 0xa67   :  { %v4181_v7 = vmax.f32 %v4179_v5, %v4180_v38  ;;  %v4188_v19 = vmax.f32 %v4186_v35, %v4187_v0  ;;  %v9210_v52 = vadd.f32 %v7180_v53, %v6333_v21  ;;  %v9215_v6 = vadd.f32 %v7181_v45, %v4041_v18 }
 0xa68   :  { %7034 = vpow2.f32 %v4326_v41  ;;  %v4296_v8 = vsub.f32 %v9159_v4, %v4167_v34  ;;  %v4297_v57 = vsub.f32 %v9154_v43, %v4167_v34  ;;  %v4175_v16 = vrot.slane %v4174_v36, 1  ;;  %v7182_v43 = vld [vmem:[%s9724_s1 + $0x68] sm:$0xff] }
 0xa69   :  { %7036 = vpow2.f32 %v4328_v54  ;;  %v4182_v24 = vrot.slane %v4181_v7, 2  ;;  %v4189_v30 = vrot.slane %v4188_v19, 4  ;;  %v4196_v25 = vsel %vm903_vm0, %v9210_v52, -inf  ;;  %v6336_v55 = vpop.f32.mrb[86].mxu1 }
 0xa6a   :  { %v4330_v51 = vmul.f32 1.442695, %v4296_v8  ;;  %v4332_v56 = vmul.f32 1.442695, %v4297_v57  ;;  %v4176_v44 = vmax.f32 %v4174_v36, %v4175_v16  ;;  %v4195_v12 = vsel %vm903_vm0, %v9215_v6, -inf  ;;  %v4051_v9 = vpop.f32.mrb[87].mxu1 }
 0xa6b   :  { %v4183_v11 = vmax.f32 %v4181_v7, %v4182_v24  ;;  %v4190_v15 = vmax.f32 %v4188_v19, %v4189_v30  ;;  %v4197_v4 = vmax.f32 %v4195_v12, %v4196_v25  ;;  %v9226_v62 = vadd.f32 %v7182_v43, %v6336_v55 }
 0xa6c   :  { %7038 = vpow2.f32 %v4330_v51  ;;  %v4298_v42 = vsub.f32 %v9173_v31, %v4176_v44  ;;  %v4299_v46 = vsub.f32 %v9168_v37, %v4176_v44  ;;  %v9233_v40 = vadd.f32 %v7183_v26, %v4051_v9 }
 0xa6d   :  { %7040 = vpow2.f32 %v4332_v56  ;;  %v4184_v20 = vrot.slane %v4183_v11, 1  ;;  %v4191_v27 = vrot.slane %v4190_v15, 2  ;;  %v4198_v61 = vrot.slane %v4197_v4, 4  ;;  %v6339_v1 = vpop.f32.mrb[88].mxu1 }
 0xa6e   :  { %v4334_v59 = vmul.f32 1.442695, %v4298_v42  ;;  %v4336_v39 = vmul.f32 1.442695, %v4299_v46  ;;  %v4205_v3 = vsel %vm903_vm0, %v9226_v62, -inf  ;;  %v4204_v31 = vsel %vm903_vm0, %v9233_v40, -inf }
 0xa6f   :  { %v4185_v37 = vmax.f32 %v4183_v11, %v4184_v20  ;;  %v4192_v22 = vmax.f32 %v4190_v15, %v4191_v27  ;;  %v4199_v2 = vmax.f32 %v4197_v4, %v4198_v61  ;;  %v4206_v47 = vmax.f32 %v4204_v31, %v4205_v3  ;;  %v4061_v13 = vpop.f32.mrb[89].mxu1  ;;  %v7186_v46 = vld [vmem:[%s9724_s1 + $0x88] sm:$0xff] }
 0xa70   :  { %7042 = vpow2.f32 %v4334_v59  ;;  %v9242_v5 = vadd.f32 %v7184_v14, %v6339_v1  ;;  %v9247_v32 = vadd.f32 %v7185_v63, %v4061_v13 }
 0xa71   :  { %7044 = vpow2.f32 %v4336_v39  ;;  %v4300_v60 = vsub.f32 %v9187_v58, %v4185_v37  ;;  %v4301_v29 = vsub.f32 %v9182_v23, %v4185_v37  ;;  %v4193_v49 = vrot.slane %v4192_v22, 1  ;;  %v6342_v17 = vpop.f32.mrb[90].mxu1 }
 0xa72   :  { %v9251_v50 = vpop.eup %7034  ;;  %v4200_v38 = vrot.slane %v4199_v2, 2  ;;  %v4207_v0 = vrot.slane %v4206_v47, 4  ;;  %v4214_v35 = vsel %vm903_vm0, %v9242_v5, -inf  ;;  %v4213_v21 = vsel %vm903_vm0, %v9247_v32, -inf  ;;  %v9257_v41 = vpop.f32.mrb[91].mxu1 }
 0xa73   :  { %v9259_v54 = vpop.eup %7036  ;;  %v4390_v58 = vsel %vm903_vm0, %v9251_v50, 0.0  ;;  %v4338_v23 = vmul.f32 1.442695, %v4300_v60  ;;  %v4340_v34 = vmul.f32 1.442695, %v4301_v29  ;;  %v4194_v36 = vmax.f32 %v4192_v22, %v4193_v49 }
 0xa74   :  { %v4391_v18 = vsel %vm903_vm0, %v9259_v54, 0.0  ;;  %v4201_v7 = vmax.f32 %v4199_v2, %v4200_v38  ;;  %v4208_v19 = vmax.f32 %v4206_v47, %v4207_v0  ;;  %v4215_v53 = vmax.f32 %v4213_v21, %v4214_v35 }
 0xa75   :  { %v4392_v45 = vadd.f32 %v4391_v18, %v4390_v58  ;;  %7046 = vpow2.f32 %v4338_v23  ;;  %v4302_v8 = vsub.f32 %v9201_v28, %v4194_v36  ;;  %v4303_v57 = vsub.f32 %v9196_v48, %v4194_v36  ;;  %v9267_v16 = vpop.f32.mrb[92].mxu1 }
 0xa76   :  { %v9269_v24 = vpop.eup %7038  ;;  %7048 = vpow2.f32 %v4340_v34  ;;  %v4202_v30 = vrot.slane %v4201_v7, 1  ;;  %v4209_v25 = vrot.slane %v4208_v19, 2  ;;  %v4216_v55 = vrot.slane %v4215_v53, 4  ;;  %v9271_v51 = vpop.f32.mrb[93].mxu1 }
 0xa77   :  { %v9273_v56 = vpop.eup %7040  ;;  %v4393_v44 = vrot.slane %v4392_v45, 4  ;;  %v4399_v12 = vsel %vm903_vm0, %v9269_v24, 0.0  ;;  %v4342_v9 = vmul.f32 1.442695, %v4302_v8  ;;  %v4344_v28 = vmul.f32 1.442695, %v4303_v57 }
 0xa78   :  { %v4400_v48 = vsel %vm903_vm0, %v9273_v56, 0.0  ;;  %v4203_v11 = vmax.f32 %v4201_v7, %v4202_v30  ;;  %v4210_v15 = vmax.f32 %v4208_v19, %v4209_v25  ;;  %v4217_v4 = vmax.f32 %v4215_v53, %v4216_v55 }
 0xa79   :  { %v4394_v43 = vadd.f32 %v4393_v44, %v4392_v45  ;;  %v4401_v42 = vadd.f32 %v4400_v48, %v4399_v12  ;;  %7050 = vpow2.f32 %v4342_v9  ;;  %v9282_v26 = vadd.f32 %v7186_v46, %v6342_v17  ;;  %v9284_v20 = vpop.f32.mrb[94].mxu1  ;;  %v7188_v44 = vld [vmem:[%s9724_s1 + $0x98] sm:$0xff] }
 0xa7a   :  { %v9286_v27 = vpop.eup %7042  ;;  %7052 = vpow2.f32 %v4344_v28  ;;  %v4304_v61 = vsub.f32 %v9215_v6, %v4203_v11  ;;  %v4305_v1 = vsub.f32 %v9210_v52, %v4203_v11  ;;  %v4211_v59 = vrot.slane %v4210_v15, 1  ;;  %v9290_v39 = vpop.f32.mrb[95].mxu1 }
 0xa7b   :  { %v9292_v3 = vpop.eup %7044  ;;  %v4395_v31 = vrot.slane %v4394_v43, 2  ;;  %v4402_v37 = vrot.slane %v4401_v42, 4  ;;  %v4408_v22 = vsel %vm903_vm0, %v9286_v27, 0.0  ;;  %v4218_v2 = vrot.slane %v4217_v4, 2 }
 0xa7c   :  { %v4409_v47 = vsel %vm903_vm0, %v9292_v3, 0.0  ;;  %v4346_v13 = vmul.f32 1.442695, %v4304_v61  ;;  %v4348_v14 = vmul.f32 1.442695, %v4305_v1  ;;  %v4212_v63 = vmax.f32 %v4210_v15, %v4211_v59 }
 0xa7d   :  { %v9298_v6 = vadd.f32 %v4395_v31, %v4394_v43  ;;  %v4403_v52 = vadd.f32 %v4402_v37, %v4401_v42  ;;  %v4410_v60 = vadd.f32 %v4409_v47, %v4408_v22  ;;  %v4219_v29 = vmax.f32 %v4217_v4, %v4218_v2  ;;  %v6351_v49 = vpop.f32.mrb[96].mxu1  ;;  %v7189_v22 = vld [vmem:[%s9724_s1 + $0x90] sm:$0xff] }
 0xa7e   :  { %7054 = vpow2.f32 %v4346_v13  ;;  %v4306_v17 = vsub.f32 %v9233_v40, %v4212_v63  ;;  %v4307_v38 = vsub.f32 %v9226_v62, %v4212_v63  ;;  %v4223_v0 = vsel %vm903_vm0, %v9282_v26, -inf  ;;  %v9304_v35 = vpop.f32.mrb[97].mxu1  ;;  %v7187_v62 = vld [vmem:[%s9724_s1 + $0x80] sm:$0xff]  ;;  %v7190_v13 = vld [vmem:[%s9724_s1 + $0xa8] sm:$0xff] }
 0xa7f   :  { %v9306_v21 = vpop.eup %7046  ;;  %v4404_v58 = vrot.slane %v4403_v52, 2  ;;  %v4411_v23 = vrot.slane %v4410_v60, 4  ;;  %7056 = vpow2.f32 %v4348_v14  ;;  %v4220_v34 = vrot.slane %v4219_v29, 1  ;;  %v7191_v63 = vld [vmem:[%s9724_s1 + $0xa0] sm:$0xff] }
 0xa80   :  { %v9308_v36 = vpop.eup %7048  ;;  %v4417_v18 = vsel %vm903_vm0, %v9306_v21, 0.0  ;;  %v4350_v7 = vmul.f32 1.442695, %v4306_v17  ;;  %v4352_v40 = vmul.f32 1.442695, %v4307_v38  ;;  %v9316_v19 = vadd.f32 %v7187_v62, %v9257_v41 }
 0xa81   :  { %v9318_v53 = vadd.f32 %v4404_v58, %v4403_v52  ;;  %v4412_v45 = vadd.f32 %v4411_v23, %v4410_v60  ;;  %v4418_v8 = vsel %vm903_vm0, %v9308_v36, 0.0  ;;  %v4221_v57 = vmax.f32 %v4219_v29, %v4220_v34  ;;  %v6354_v30 = vpop.f32.mrb[98].mxu1 }
 0xa82   :  { %v4419_v25 = vadd.f32 %v4418_v8, %v4417_v18  ;;  %7058 = vpow2.f32 %v4350_v7  ;;  %v4222_v55 = vsel %vm903_vm0, %v9316_v19, -inf  ;;  %v9328_v41 = vadd.f32 %v7188_v44, %v9267_v16  ;;  %v9330_v12 = vpop.f32.mrb[99].mxu1 }
 0xa83   :  { %v9332_v9 = vpop.eup %7050  ;;  %v4413_v28 = vrot.slane %v4412_v45, 2  ;;  %7060 = vpow2.f32 %v4352_v40  ;;  %v4308_v48 = vsub.f32 %v9247_v32, %v4221_v57  ;;  %v4309_v11 = vsub.f32 %v9242_v5, %v4221_v57 }
 0xa84   :  { %v9336_v15 = vpop.eup %7052  ;;  %v4420_v4 = vrot.slane %v4419_v25, 4  ;;  %v4426_v43 = vsel %vm903_vm0, %v9332_v9, 0.0  ;;  %v4224_v42 = vmax.f32 %v4222_v55, %v4223_v0  ;;  %v4232_v16 = vsel %vm903_vm0, %v9328_v41, -inf }
 0xa85   :  { %v9342_v46 = vadd.f32 %v4413_v28, %v4412_v45  ;;  %v4427_v61 = vsel %vm903_vm0, %v9336_v15, 0.0  ;;  %v4354_v1 = vmul.f32 1.442695, %v4308_v48  ;;  %v4356_v59 = vmul.f32 1.442695, %v4309_v11  ;;  %v9346_v32 = vpop.f32.mrb[100].mxu1 }
 0xa86   :  { %v4421_v5 = vadd.f32 %v4420_v4, %v4419_v25  ;;  %v4428_v31 = vadd.f32 %v4427_v61, %v4426_v43  ;;  %v4225_v37 = vrot.slane %v4224_v42, 4  ;;  %v9352_v2 = vadd.f32 %v7189_v22, %v9271_v51  ;;  %v9354_v47 = vpop.f32.mrb[101].mxu1  ;;  %v7192_v51 = vld [vmem:[%s9724_s1 + $0xb8] sm:$0xff]  ;;  %v7193_v11 = vld [vmem:[%s9724_s1 + $0xb0] sm:$0xff]  ;;  %v7194_v43 = vld [vmem:[%s9724_s1 + $0xc8] sm:$0xff] }
 0xa87   :  { %7062 = vpow2.f32 %v4354_v1  ;;  %v9360_v14 = vadd.f32 %v7190_v13, %v9284_v20  ;;  %v9366_v52 = vadd.f32 %v7191_v63, %v9290_v39  ;;  %v9371_v60 = vadd.f32 %v7192_v51, %v6351_v49 }
 0xa88   :  { %v9373_v29 = vpop.eup %7054  ;;  %v4422_v17 = vrot.slane %v4421_v5, 2  ;;  %v4429_v38 = vrot.slane %v4428_v31, 4  ;;  %7064 = vpow2.f32 %v4356_v59  ;;  %v4226_v20 = vmax.f32 %v4224_v42, %v4225_v37 }
 0xa89   :  { %v9375_v0 = vpop.eup %7056  ;;  %v4435_v58 = vsel %vm903_vm0, %v9373_v29, 0.0  ;;  %v4231_v39 = vsel %vm903_vm0, %v9352_v2, -inf  ;;  %v4241_v23 = vsel %vm903_vm0, %v9360_v14, -inf  ;;  %v4240_v49 = vsel %vm903_vm0, %v9366_v52, -inf  ;;  %v9385_v34 = vpop.f32.mrb[102].mxu1 }
 0xa8a   :  { %v9387_v18 = vadd.f32 %v4422_v17, %v4421_v5  ;;  %v4430_v7 = vadd.f32 %v4429_v38, %v4428_v31  ;;  %v4436_v40 = vsel %vm903_vm0, %v9375_v0, 0.0  ;;  %v4227_v62 = vrot.slane %v4226_v20, 2  ;;  %v9391_v45 = vpop.f32.mrb[103].mxu1 }
 0xa8b   :  { %v4437_v8 = vadd.f32 %v4436_v40, %v4435_v58  ;;  %v4233_v57 = vmax.f32 %v4231_v39, %v4232_v16  ;;  %v4242_v25 = vmax.f32 %v4240_v49, %v4241_v23  ;;  %v4250_v55 = vsel %vm903_vm0, %v9371_v60, -inf  ;;  %v7195_v23 = vld [vmem:[%s9724_s1 + $0xc0] sm:$0xff] }
 0xa8c   :  { %v9395_v44 = vpop.eup %7058  ;;  %v4431_v28 = vrot.slane %v4430_v7, 2  ;;  %v4228_v48 = vmax.f32 %v4226_v20, %v4227_v62  ;;  %v9401_v4 = vadd.f32 %v7193_v11, %v9304_v35  ;;  %v9406_v42 = vadd.f32 %v7194_v43, %v6354_v30 }
 0xa8d   :  { %v9408_v16 = vpop.eup %7060  ;;  %v4438_v61 = vrot.slane %v4437_v8, 4  ;;  %v4444_v1 = vsel %vm903_vm0, %v9395_v44, 0.0  ;;  %v4234_v59 = vrot.slane %v4233_v57, 4  ;;  %v4243_v5 = vrot.slane %v4242_v25, 4  ;;  %v9412_v31 = vpop.f32.mrb[104].mxu1 }
 0xa8e   :  { %v9414_v37 = vadd.f32 %v4431_v28, %v4430_v7  ;;  %v4445_v35 = vsel %vm903_vm0, %v9408_v16, 0.0  ;;  %v4229_v22 = vrot.slane %v4228_v48, 1  ;;  %v4249_v30 = vsel %vm903_vm0, %v9401_v4, -inf  ;;  %v9420_v13 = vpop.f32.mrb[105].mxu1 }
 0xa8f   :  { %v4439_v63 = vadd.f32 %v4438_v61, %v4437_v8  ;;  %v4446_v51 = vadd.f32 %v4445_v35, %v4444_v1  ;;  %v4235_v17 = vmax.f32 %v4233_v57, %v4234_v59  ;;  %v4244_v38 = vmax.f32 %v4242_v25, %v4243_v5 }
 0xa90   :  { %v4230_v20 = vmax.f32 %v4228_v48, %v4229_v22  ;;  %v4251_v58 = vmax.f32 %v4249_v30, %v4250_v55  ;;  %v4259_v39 = vsel %vm903_vm0, %v9406_v42, -inf  ;;  %v9428_v49 = vadd.f32 %v7195_v23, %v9330_v12 }
 0xa91   :  { %v9430_v7 = vpop.eup %7062  ;;  %v4440_v40 = vrot.slane %v4439_v63, 2  ;;  %v4447_v62 = vrot.slane %v4446_v51, 4  ;;  %v4236_v8 = vrot.slane %v4235_v17, 2  ;;  %v4245_v28 = vrot.slane %v4244_v38, 2 }
 0xa92   :  { %v9432_v57 = vpop.eup %7064  ;;  %v4453_v25 = vsel %vm903_vm0, %v9430_v7, 0.0  ;;  %v4310_v55 = vsub.f32 %v9316_v19, %v4230_v20  ;;  %v4311_v48 = vsub.f32 %v9282_v26, %v4230_v20  ;;  %v4252_v11 = vrot.slane %v4251_v58, 4 }
 0xa93   :  { %v9438_v43 = vadd.f32 %v4440_v40, %v4439_v63  ;;  %v4448_v12 = vadd.f32 %v4447_v62, %v4446_v51  ;;  %v4454_v61 = vsel %vm903_vm0, %v9432_v57, 0.0  ;;  %v4237_v1 = vmax.f32 %v4235_v17, %v4236_v8 }
 0xa94   :  { %v4455_v59 = vadd.f32 %v4454_v61, %v4453_v25  ;;  %v4358_v5 = vmul.f32 1.442695, %v4310_v55  ;;  %v4360_v35 = vmul.f32 1.442695, %v4311_v48  ;;  %v4246_v22 = vmax.f32 %v4244_v38, %v4245_v28  ;;  %v7196_v38 = vld [vmem:[%s9724_s1 + $0xd8] sm:$0xff]  ;;  %v7197_v55 = vld [vmem:[%s9724_s1 + $0xd0] sm:$0xff] }
 0xa95   :  { %v4449_v30 = vrot.slane %v4448_v12, 2  ;;  %v4238_v23 = vrot.slane %v4237_v1, 1  ;;  %v4253_v33 = vmax.f32 %v4251_v58, %v4252_v11  ;;  %v4258_v19 = vsel %vm903_vm0, %v9428_v49, -inf }
 0xa96   :  { %v4456_v10 = vrot.slane %v4455_v59, 4  ;;  %7066 = vpow2.f32 %v4358_v5  ;;  %v4247_v26 = vrot.slane %v4246_v22, 1  ;;  %v4260_v63 = vmax.f32 %v4258_v19, %v4259_v39  ;;  %v7199_v19 = vld [vmem:[%s9724_s1 + $0xe0] sm:$0xff] }
 0xa97   :  { %v9444_v20 = vadd.f32 %v4449_v30, %v4448_v12  ;;  %7068 = vpow2.f32 %v4360_v35  ;;  %v4239_v51 = vmax.f32 %v4237_v1, %v4238_v23  ;;  %v4254_v40 = vrot.slane %v4253_v33, 2 }
 0xa98   :  { %v4457_v17 = vadd.f32 %v4456_v10, %v4455_v59  ;;  %v4248_v62 = vmax.f32 %v4246_v22, %v4247_v26  ;;  %v4261_v8 = vrot.slane %v4260_v63, 4  ;;  %v9450_v58 = vadd.f32 %v7196_v38, %v9346_v32 }
 0xa99   :  { %v4312_v28 = vsub.f32 %v9352_v2, %v4239_v51  ;;  %v4313_v25 = vsub.f32 %v9328_v41, %v4239_v51  ;;  %v4255_v39 = vmax.f32 %v4253_v33, %v4254_v40  ;;  %v9458_v10 = vadd.f32 %v7197_v55, %v9354_v47 }
 0xa9a   :  { %v4458_v48 = vrot.slane %v4457_v17, 2  ;;  %v4314_v11 = vsub.f32 %v9366_v52, %v4248_v62  ;;  %v4315_v12 = vsub.f32 %v9360_v14, %v4248_v62  ;;  %v4262_v61 = vmax.f32 %v4260_v63, %v4261_v8  ;;  %v7198_v14 = vld [vmem:[%s9724_s1 + $0xe8] sm:$0xff] }
 0xa9b   :  { %v4362_v32 = vmul.f32 1.442695, %v4312_v28  ;;  %v4364_v1 = vmul.f32 1.442695, %v4313_v25  ;;  %v4256_v59 = vrot.slane %v4255_v39, 1  ;;  %v4268_v41 = vsel %vm903_vm0, %v9450_v58, -inf }
 0xa9c   :  { %v9464_v33 = vadd.f32 %v4458_v48, %v4457_v17  ;;  %v4366_v2 = vmul.f32 1.442695, %v4314_v11  ;;  %v4368_v5 = vmul.f32 1.442695, %v4315_v12  ;;  %v4263_v35 = vrot.slane %v4262_v61, 2  ;;  %v7200_v48 = vld [vmem:[%s9724_s1 + $0xf8] sm:$0xff] }
 0xa9d   :  { %7070 = vpow2.f32 %v4362_v32  ;;  %v4257_v47 = vmax.f32 %v4255_v39, %v4256_v59  ;;  %v4267_v22 = vsel %vm903_vm0, %v9458_v10, -inf  ;;  %v9472_v52 = vadd.f32 %v7198_v14, %v9385_v34  ;;  %v7201_v32 = vld [vmem:[%s9724_s1 + $0xf0] sm:$0xff] }
 0xa9e   :  { %7072 = vpow2.f32 %v4364_v1  ;;  %v4264_v30 = vmax.f32 %v4262_v61, %v4263_v35  ;;  %v4269_v23 = vmax.f32 %v4267_v22, %v4268_v41  ;;  %v9478_v26 = vadd.f32 %v7199_v19, %v9391_v45 }
 0xa9f   :  { %7074 = vpow2.f32 %v4366_v2  ;;  %v4316_v63 = vsub.f32 %v9401_v4, %v4257_v47  ;;  %v4317_v51 = vsub.f32 %v9371_v60, %v4257_v47  ;;  %v4277_v40 = vsel %vm903_vm0, %v9472_v52, -inf }
 0xaa0   :  { %v9484_v34 = vpop.eup %7066  ;;  %7076 = vpow2.f32 %v4368_v5  ;;  %v4265_v17 = vrot.slane %v4264_v30, 1  ;;  %v4270_v62 = vrot.slane %v4269_v23, 4  ;;  %v4276_v8 = vsel %vm903_vm0, %v9478_v26, -inf }
 0xaa1   :  { %v9488_v38 = vpop.eup %7068  ;;  %v4462_v45 = vsel %vm903_vm0, %v9484_v34, 0.0  ;;  %v4370_v28 = vmul.f32 1.442695, %v4316_v63  ;;  %v4372_v4 = vmul.f32 1.442695, %v4317_v51  ;;  %v4278_v25 = vmax.f32 %v4276_v8, %v4277_v40 }
 0xaa2   :  { %v4463_v60 = vsel %vm903_vm0, %v9488_v38, 0.0  ;;  %v4266_v39 = vmax.f32 %v4264_v30, %v4265_v17  ;;  %v4271_v55 = vmax.f32 %v4269_v23, %v4270_v62  ;;  %v9498_v11 = vadd.f32 %v7200_v48, %v9412_v31 }
 0xaa3   :  { %v4464_v12 = vadd.f32 %v4463_v60, %v4462_v45  ;;  %7078 = vpow2.f32 %v4370_v28  ;;  %v4279_v61 = vrot.slane %v4278_v25, 4  ;;  %v9504_v1 = vadd.f32 %v7201_v32, %v9420_v13 }
 0xaa4   :  { %7080 = vpow2.f32 %v4372_v4  ;;  %v4318_v59 = vsub.f32 %v9428_v49, %v4266_v39  ;;  %v4319_v41 = vsub.f32 %v9406_v42, %v4266_v39  ;;  %v4272_v2 = vrot.slane %v4271_v55, 2 }
 0xaa5   :  { %v4465_v5 = vrot.slane %v4464_v12, 4  ;;  %v4280_v35 = vmax.f32 %v4278_v25, %v4279_v61  ;;  %v4286_v31 = vsel %vm903_vm0, %v9498_v11, -inf  ;;  %v4285_v47 = vsel %vm903_vm0, %v9504_v1, -inf }
 0xaa6   :  { %v4374_v22 = vmul.f32 1.442695, %v4318_v59  ;;  %v4376_v14 = vmul.f32 1.442695, %v4319_v41  ;;  %v4273_v30 = vmax.f32 %v4271_v55, %v4272_v2  ;;  %v4287_v23 = vmax.f32 %v4285_v47, %v4286_v31 }
 0xaa7   :  { %v9512_v13 = vpop.eup %7070  ;;  %v4466_v19 = vadd.f32 %v4465_v5, %v4464_v12  ;;  %v4281_v63 = vrot.slane %v4280_v35, 2  ;;  %v4397_v49 = vrot.slane %v9298_v6, 1  ;;  %v4406_v42 = vrot.slane %v9318_v53, 1 }
 0xaa8   :  { %v9516_v51 = vpop.eup %7072  ;;  %v4471_v40 = vsel %vm903_vm0, %v9512_v13, 0.0  ;;  %7082 = vpow2.f32 %v4374_v22  ;;  %v4274_v17 = vrot.slane %v4273_v30, 1  ;;  %v4288_v62 = vrot.slane %v4287_v23, 4 }
 0xaa9   :  { %v9520_v8 = vpop.eup %7074  ;;  %v4467_v45 = vrot.slane %v4466_v19, 2  ;;  %v4472_v28 = vsel %vm903_vm0, %v9516_v51, 0.0  ;;  %7084 = vpow2.f32 %v4376_v14  ;;  %v4282_v4 = vmax.f32 %v4280_v35, %v4281_v63 }
 0xaaa   :  { %v9524_v25 = vpop.eup %7076  ;;  %v4473_v60 = vadd.f32 %v4472_v28, %v4471_v40  ;;  %v4480_v39 = vsel %vm903_vm0, %v9520_v8, 0.0  ;;  %v4275_v55 = vmax.f32 %v4273_v30, %v4274_v17  ;;  %v4289_v48 = vmax.f32 %v4287_v23, %v4288_v62 }
 0xaab   :  { %v9528_v12 = vadd.f32 %v4467_v45, %v4466_v19  ;;  %v4481_v61 = vsel %vm903_vm0, %v9524_v25, 0.0  ;;  %v4283_v32 = vrot.slane %v4282_v4, 1  ;;  %v4398_v59 = vadd.f32 %v4397_v49, %v9298_v6 }
 0xaac   :  { %v4474_v41 = vrot.slane %v4473_v60, 4  ;;  %v4482_v2 = vadd.f32 %v4481_v61, %v4480_v39  ;;  %v4320_v5 = vsub.f32 %v9458_v10, %v4275_v55  ;;  %v4321_v35 = vsub.f32 %v9450_v58, %v4275_v55 }
 0xaad   :  { %v9535_v31 = vpop.eup %7078  ;;  %v4284_v47 = vmax.f32 %v4282_v4, %v4283_v32  ;;  %v4290_v22 = vrot.slane %v4289_v48, 2  ;;  %7086 = vrcp.f32 %v4398_v59  ;;  %v4407_v14 = vadd.f32 %v4406_v42, %v9318_v53 }
 0xaae   :  { %v9538_v30 = vpop.eup %7080  ;;  %v4475_v23 = vadd.f32 %v4474_v41, %v4473_v60  ;;  %v4483_v19 = vrot.slane %v4482_v2, 4  ;;  %v4489_v6 = vsel %vm903_vm0, %v9535_v31, 0.0  ;;  %v4378_v63 = vmul.f32 1.442695, %v4320_v5 }
 0xaaf   :  { %v4490_v10 = vsel %vm903_vm0, %v9538_v30, 0.0  ;;  %v4380_v49 = vmul.f32 1.442695, %v4321_v35  ;;  %v4322_v58 = vsub.f32 %v9478_v26, %v4284_v47  ;;  %v4323_v40 = vsub.f32 %v9472_v52, %v4284_v47 }
 0xab0   :  { %v4476_v17 = vrot.slane %v4475_v23, 2  ;;  %v4484_v62 = vadd.f32 %v4483_v19, %v4482_v2  ;;  %v4491_v45 = vadd.f32 %v4490_v10, %v4489_v6  ;;  %7088 = vpow2.f32 %v4378_v63 }
 0xab1   :  { %7090 = vpow2.f32 %v4380_v49  ;;  %v4382_v53 = vmul.f32 1.442695, %v4322_v58  ;;  %v4384_v42 = vmul.f32 1.442695, %v4323_v40  ;;  %v4291_v28 = vmax.f32 %v4289_v48, %v4290_v22 }
 0xab2   :  { %v9546_v4 = vpop.eup %7082  ;;  %v4477_v60 = vadd.f32 %v4476_v17, %v4475_v23  ;;  %v4485_v39 = vrot.slane %v4484_v62, 2  ;;  %v4492_v55 = vrot.slane %v4491_v45, 4  ;;  %7092 = vrcp.f32 %v4407_v14 }
 0xab3   :  { %v9548_v61 = vpop.eup %7084  ;;  %v4498_v26 = vsel %vm903_vm0, %v9546_v4, 0.0  ;;  %7094 = vpow2.f32 %v4382_v53  ;;  %v4292_v52 = vrot.slane %v4291_v28, 1  ;;  %v4415_v32 = vrot.slane %v9342_v46, 1 }
 0xab4   :  { %v9553_v59 = vadd.f32 %v4485_v39, %v4484_v62  ;;  %v4493_v41 = vadd.f32 %v4492_v55, %v4491_v45  ;;  %v4499_v48 = vsel %vm903_vm0, %v9548_v61, 0.0  ;;  %7096 = vpow2.f32 %v4384_v42 }
 0xab5   :  { %v4500_v2 = vadd.f32 %v4499_v48, %v4498_v26  ;;  %v4293_v5 = vmax.f32 %v4291_v28, %v4292_v52  ;;  %v4416_v35 = vadd.f32 %v4415_v32, %v9342_v46  ;;  %v4424_v47 = vrot.slane %v9387_v18, 1 }
 0xab6   :  { %v4494_v22 = vrot.slane %v4493_v41, 2  ;;  %v4433_v14 = vrot.slane %v9414_v37, 1  ;;  %v4442_v23 = vrot.slane %v9438_v43, 1  ;;  %v4451_v19 = vrot.slane %v9444_v20, 1 }
 0xab7   :  { %v7087_v6 = vpop.eup %7086  ;;  %v4501_v63 = vrot.slane %v4500_v2, 4  ;;  %v4324_v10 = vsub.f32 %v9504_v1, %v4293_v5  ;;  %v4325_v49 = vsub.f32 %v9498_v11, %v4293_v5  ;;  %7098 = vrcp.f32 %v4416_v35 }
 0xab8   :  { %v4495_v58 = vadd.f32 %v4494_v22, %v4493_v41  ;;  %v4550_v40 = vmul.f32 %v7087_v6, %v9251_v50  ;;  %v4551_v46 = vmul.f32 %v7087_v6, %v9259_v54  ;;  %v4425_v17 = vadd.f32 %v4424_v47, %v9387_v18 }
 0xab9   :  { %v4502_v62 = vadd.f32 %v4501_v63, %v4500_v2  ;;  %v4386_v45 = vmul.f32 1.442695, %v4324_v10  ;;  %v4388_v53 = vmul.f32 1.442695, %v4325_v49  ;;  %v4434_v42 = vadd.f32 %v4433_v14, %v9414_v37 }
 0xaba   :  { %v9568_v28 = vpop.eup %7088  ;;  %6366 = vmatprep.mubr.msk.f32.mxu0 %vm903_vm0, %v4550_v40  ;;  %7100 = vrcp.f32 %v4425_v17  ;;  %v4443_v11 = vadd.f32 %v4442_v23, %v9438_v43  ;;  %v4452_v1 = vadd.f32 %v4451_v19, %v9444_v20  ;;  %v4460_v50 = vrot.slane %v9464_v33, 1 }
 0xabb   :  { %v9574_v39 = vpop.eup %7090  ;;  %v4503_v54 = vrot.slane %v4502_v62, 2  ;;  %v4507_v18 = vsel %vm903_vm0, %v9568_v28, 0.0  ;;  %7102 = vpow2.f32 %v4386_v45  ;;  %6367 = vmatmul.mubr.msk.f32.vlgmr.msra.gmra.mrb[76].mxu0 %vm903_vm0, %v4551_v46  ;;  %v4469_v37 = vrot.slane %v9528_v12, 1 }
 0xabc   :  { %v7093_v55 = vpop.eup %7092  ;;  %v4508_v26 = vsel %vm903_vm0, %v9574_v39, 0.0  ;;  %7104 = vpow2.f32 %v4388_v53  ;;  %v4461_v43 = vadd.f32 %v4460_v50, %v9464_v33  ;;  %v4478_v20 = vrot.slane %v4477_v60, 1 }
 0xabd   :  { %v9583_v52 = vpop.eup %7094  ;;  %v4504_v32 = vadd.f32 %v4503_v54, %v4502_v62  ;;  %v4509_v41 = vadd.f32 %v4508_v26, %v4507_v18  ;;  %v4552_v48 = vmul.f32 %v7093_v55, %v9269_v24  ;;  %v4553_v2 = vmul.f32 %v7093_v55, %v9273_v56 }
 0xabe   :  { %v9587_v5 = vpop.eup %7096  ;;  %v4516_v35 = vsel %vm903_vm0, %v9583_v52, 0.0  ;;  %7106 = vrcp.f32 %v4434_v42  ;;  %v4470_v47 = vadd.f32 %v4469_v37, %v9528_v12  ;;  %v4479_v22 = vadd.f32 %v4478_v20, %v4477_v60 }
 0xabf   :  { %v4510_v14 = vrot.slane %v4509_v41, 4  ;;  %v4517_v33 = vsel %vm903_vm0, %v9587_v5, 0.0  ;;  %6369 = vmatprep.mubr.msk.f32.mxu0 %vm903_vm0, %v4552_v48  ;;  %7108 = vrcp.f32 %v4443_v11  ;;  %v4487_v24 = vrot.slane %v9553_v59, 1 }
 0xac0   :  { %v4518_v23 = vadd.f32 %v4517_v33, %v4516_v35  ;;  %6370 = vmatmul.mubr.msk.f32.gmra.mrb[78].mxu0 %vm903_vm0, %v4553_v2  ;;  %7110 = vrcp.f32 %v4452_v1  ;;  %v4496_v56 = vrot.slane %v4495_v58, 1  ;;  %v4505_v19 = vrot.slane %v4504_v32, 1 }
 0xac1   :  { %v7099_v6 = vpop.eup %7098  ;;  %v4511_v63 = vadd.f32 %v4510_v14, %v4509_v41  ;;  %7112 = vrcp.f32 %v4461_v43  ;;  %v4488_v12 = vadd.f32 %v4487_v24, %v9553_v59 }
 0xac2   :  { %v4519_v60 = vrot.slane %v4518_v23, 4  ;;  %v4554_v10 = vmul.f32 %v7099_v6, %v9286_v27  ;;  %v4555_v49 = vmul.f32 %v7099_v6, %v9292_v3  ;;  %7114 = vrcp.f32 %v4470_v47 }
 0xac3   :  { %v4512_v40 = vrot.slane %v4511_v63, 2  ;;  %7116 = vrcp.f32 %v4479_v22  ;;  %v4497_v46 = vadd.f32 %v4496_v56, %v4495_v58  ;;  %v4506_v17 = vadd.f32 %v4505_v19, %v4504_v32 }
 0xac4   :  { %v7101_v62 = vpop.eup %7100  ;;  %v4520_v45 = vadd.f32 %v4519_v60, %v4518_v23  ;;  %6372 = vmatprep.mubr.msk.f32.mxu0 %vm903_vm0, %v4554_v10  ;;  %7118 = vrcp.f32 %v4488_v12 }
 0xac5   :  { %v9601_v53 = vpop.eup %7102  ;;  %v4513_v42 = vadd.f32 %v4512_v40, %v4511_v63  ;;  %6373 = vmatmul.mubr.msk.f32.gmra.mrb[80].mxu0 %vm903_vm0, %v4555_v49  ;;  %v4556_v59 = vmul.f32 %v7101_v62, %v9306_v21  ;;  %v4557_v27 = vmul.f32 %v7101_v62, %v9308_v36  ;;  %7120 = vrcp.f32 %v4497_v46  ;;  %v9763_v46 = vld [vmem:[#allocation10_spill] sm:$0xff] }
 0xac6   :  { %v9606_v3 = vpop.eup %7104  ;;  %v4521_v11 = vrot.slane %v4520_v45, 2  ;;  %v4525_v58 = vsel %vm903_vm0, %v9601_v53, 0.0  ;;  %7122 = vrcp.f32 %v4506_v17 }
 0xac7   :  { %v4526_v1 = vsel %vm903_vm0, %v9606_v3, 0.0  ;;  %6375 = vmatprep.mubr.msk.f32.mxu0 %vm903_vm0, %v4556_v59  ;;  %v4514_v50 = vrot.slane %v4513_v42, 1 }
 0xac8   :  { %v7107_v54 = vpop.eup %7106  ;;  %v4522_v18 = vadd.f32 %v4521_v11, %v4520_v45  ;;  %v4527_v37 = vadd.f32 %v4526_v1, %v4525_v58 }
 0xac9   :  { %v7109_v21 = vpop.eup %7108  ;;  %6376 = vmatmul.mubr.msk.f32.gmra.mrb[82].mxu0 %vm903_vm0, %v4557_v27  ;;  %v4558_v36 = vmul.f32 %v7107_v54, %v9332_v9  ;;  %v4559_v55 = vmul.f32 %v7107_v54, %v9336_v15  ;;  %v4515_v26 = vadd.f32 %v4514_v50, %v4513_v42 }
 0xaca   :  { %v7111_v43 = vpop.eup %7110  ;;  %v4528_v20 = vrot.slane %v4527_v37, 4  ;;  %v4560_v32 = vmul.f32 %v7109_v21, %v9373_v29  ;;  %v4561_v41 = vmul.f32 %v7109_v21, %v9375_v0  ;;  %v4523_v48 = vrot.slane %v4522_v18, 1 }
 0xacb   :  { %v7113_v2 = vpop.eup %7112  ;;  %6378 = vmatprep.mubr.msk.f32.mxu0 %vm903_vm0, %v4558_v36  ;;  %v4562_v35 = vmul.f32 %v7111_v43, %v9395_v44  ;;  %v4563_v47 = vmul.f32 %v7111_v43, %v9408_v16  ;;  %7124 = vrcp.f32 %v4515_v26 }
 0xacc   :  { %v7115_v22 = vpop.eup %7114  ;;  %v4529_v9 = vadd.f32 %v4528_v20, %v4527_v37  ;;  %v4564_v15 = vmul.f32 %v7113_v2, %v9430_v7  ;;  %v4565_v14 = vmul.f32 %v7113_v2, %v9432_v57  ;;  %v4524_v33 = vadd.f32 %v4523_v48, %v4522_v18 }
 0xacd   :  { %v7117_v24 = vpop.eup %7116  ;;  %6379 = vmatmul.mubr.msk.f32.gmra.mrb[84].mxu0 %vm903_vm0, %v4559_v55  ;;  %v4566_v29 = vmul.f32 %v7115_v22, %v9484_v34  ;;  %v4567_v0 = vmul.f32 %v7115_v22, %v9488_v38 }
 0xace   :  { %v7119_v23 = vpop.eup %7118  ;;  %v4530_v56 = vrot.slane %v4529_v9, 2  ;;  %6381 = vmatprep.mubr.msk.f32.mxu0 %vm903_vm0, %v4560_v32  ;;  %v4568_v44 = vmul.f32 %v7117_v24, %v9512_v13  ;;  %v4569_v16 = vmul.f32 %v7117_v24, %v9516_v51  ;;  %7126 = vrcp.f32 %v4524_v33 }
 0xacf   :  { %v7121_v7 = vpop.eup %7120  ;;  %v4570_v57 = vmul.f32 %v7119_v23, %v9520_v8  ;;  %v4571_v19 = vmul.f32 %v7119_v23, %v9524_v25 }
 0xad0   :  { %v7123_v6 = vpop.eup %7122  ;;  %v4531_v63 = vadd.f32 %v4530_v56, %v4529_v9  ;;  %v4572_v34 = vmul.f32 %v7121_v7, %v9535_v31  ;;  %v4573_v38 = vmul.f32 %v7121_v7, %v9538_v30 }
 0xad1   :  { %6382 = vmatmul.mubr.msk.f32.gmra.mrb[86].mxu0 %vm903_vm0, %v4561_v41  ;;  %v4574_v12 = vmul.f32 %v7123_v6, %v9546_v4  ;;  %v4575_v13 = vmul.f32 %v7123_v6, %v9548_v61 }
 0xad2   :  { %6384 = vmatprep.mubr.msk.f32.mxu0 %vm903_vm0, %v4562_v35  ;;  %v4532_v51 = vrot.slane %v4531_v63, 1 }
 0xad4   :  { %v4533_v60 = vadd.f32 %v4532_v51, %v4531_v63 }
 0xad5   :  { %v7125_v10 = vpop.eup %7124  ;;  %6385 = vmatmul.mubr.msk.f32.gmra.mrb[88].mxu0 %vm903_vm0, %v4563_v47 }
 0xad6   :  { %6387 = vmatprep.mubr.msk.f32.mxu0 %vm903_vm0, %v4564_v15  ;;  %v4576_v8 = vmul.f32 %v7125_v10, %v9568_v28  ;;  %v4577_v25 = vmul.f32 %v7125_v10, %v9574_v39  ;;  %7128 = vrcp.f32 %v4533_v60 }
 0xad8   :  { %v7127_v31 = vpop.eup %7126 }
 0xad9   :  { %6388 = vmatmul.mubr.msk.f32.gmra.mrb[90].mxu0 %vm903_vm0, %v4565_v14  ;;  %v4578_v30 = vmul.f32 %v7127_v31, %v9583_v52  ;;  %v4579_v4 = vmul.f32 %v7127_v31, %v9587_v5  ;;  %v9762_v5 = vld [vmem:[#allocation9_spill] sm:$0xff] }
 0xada   :  { %6390 = vmatprep.mubr.msk.f32.mxu0 %vm903_vm0, %v4566_v29 }
 0xadd   :  { %6391 = vmatmul.mubr.msk.f32.gmra.mrb[92].mxu0 %vm903_vm0, %v4567_v0 }
 0xade   :  { %6393 = vmatprep.mubr.msk.f32.mxu0 %vm903_vm0, %v4568_v44 }
 0xae0   :  { %v7129_v61 = vpop.eup %7128 }
 0xae1   :  { %6394 = vmatmul.mubr.msk.f32.gmra.mrb[94].mxu0 %vm903_vm0, %v4569_v16  ;;  %v4580_v28 = vmul.f32 %v7129_v61, %v9601_v53  ;;  %v4581_v39 = vmul.f32 %v7129_v61, %v9606_v3 }
 0xae2   :  { %6396 = vmatprep.mubr.msk.f32.mxu0 %vm903_vm0, %v4570_v57 }
 0xae5   :  { %6397 = vmatmul.mubr.msk.f32.gmra.mrb[96].mxu0 %vm903_vm0, %v4571_v19 }
 0xae6   :  { %6399 = vmatprep.mubr.msk.f32.mxu0 %vm903_vm0, %v4572_v34 }
 0xae9   :  { %6400 = vmatmul.mubr.msk.f32.gmra.mrb[98].mxu0 %vm903_vm0, %v4573_v38 }
 0xaea   :  { %6402 = vmatprep.mubr.msk.f32.mxu0 %vm903_vm0, %v4574_v12 }
 0xaed   :  { %6403 = vmatmul.mubr.msk.f32.gmra.mrb[100].mxu0 %vm903_vm0, %v4575_v13 }
 0xaee   :  { %6405 = vmatprep.mubr.msk.f32.mxu0 %vm903_vm0, %v4576_v8 }
 0xaf1   :  { %6406 = vmatmul.mubr.msk.f32.gmra.mrb[102].mxu0 %vm903_vm0, %v4577_v25 }
 0xaf2   :  { %6408 = vmatprep.mubr.msk.f32.mxu0 %vm903_vm0, %v4578_v30 }
 0xaf5   :  { %6409 = vmatmul.mubr.msk.f32.gmra.mrb[104].mxu0 %vm903_vm0, %v4579_v4 }
 0xaf6   :  { %6411 = vmatprep.mubr.msk.f32.mxu0 %vm903_vm0, %v4580_v28 }
 0xaf9   :  { %6412 = vmatmul.mubr.msk.f32.gmra.mrb[106].mxu0 %vm903_vm0, %v4581_v39 }
 0xb8e   :  { %v6368_v52 = vpop.f32.mrb[76].mxu0 }
 0xb8f   :  { %v4904_v49 = vmul.f32 %v6368_v52, %v9762_v5  ;;  %v4744_v40 = vpop.f32.mrb[77].mxu0 }
 0xb90   :  { %v4903_v17 = vmul.f32 %v4744_v40, %v9763_v46 }
 0xb92   :  { %v6800_v62 = vpack.c.bf16 %v4904_v49, %v4903_v17 }
 0xb93   :  { %v6371_v45 = vpop.f32.mrb[78].mxu0 }
 0xb94   :  { %v4906_v53 = vmul.f32 %v6371_v45, %v9762_v5  ;;  %v4754_v42 = vpop.f32.mrb[79].mxu0 }
 0xb95   :  { %v4905_v59 = vmul.f32 %v4754_v42, %v9763_v46 }
 0xb97   :  { %v6804_v27 = vpack.c.bf16 %v4906_v53, %v4905_v59 }
 0xb98   :  { %v6374_v3 = vpop.f32.mrb[80].mxu0 }
 0xb99   :  { %v4908_v11 = vmul.f32 %v6374_v3, %v9762_v5  ;;  %v4764_v58 = vpop.f32.mrb[81].mxu0 }
 0xb9a   :  { %v4907_v1 = vmul.f32 %v4764_v58, %v9763_v46 }
 0xb9c   :  { %v6808_v50 = vpack.c.bf16 %v4908_v11, %v4907_v1  ;;  %v6377_v54 = vpop.f32.mrb[82].mxu0 }
 0xb9d   :  { %v4910_v18 = vmul.f32 %v6377_v54, %v9762_v5  ;;  %v4774_v37 = vpop.f32.mrb[83].mxu0 }
 0xb9e   :  { %v4909_v21 = vmul.f32 %v4774_v37, %v9763_v46 }
 0xba0   :  { %v6812_v36 = vpack.c.bf16 %v4910_v18, %v4909_v21  ;;  %v6380_v55 = vpop.f32.mrb[84].mxu0  ;;  %v7202_v21 = vld [vmem:[%s9725_s2] sm:$0xff] }
 0xba1   :  { %v4912_v26 = vmul.f32 %v6380_v55, %v9762_v5  ;;  %v4784_v43 = vpop.f32.mrb[85].mxu0  ;;  %v5293_v55 = vld [vmem:[%s9727_s4 + $0x2a] ss:$0 sm:$0xff] }
 0xba2   :  { %v4911_v20 = vmul.f32 %v4784_v43, %v9763_v46 }
 0xba4   :  { %v6816_v32 = vpack.c.bf16 %v4912_v26, %v4911_v20  ;;  %v6383_v41 = vpop.f32.mrb[86].mxu0 }
 0xba5   :  { %v4914_v48 = vmul.f32 %v6383_v41, %v9762_v5  ;;  %v4794_v2 = vpop.f32.mrb[87].mxu0 }
 0xba6   :  { %v4913_v35 = vmul.f32 %v4794_v2, %v9763_v46 }
 0xba8   :  { %v6820_v47 = vpack.c.bf16 %v4914_v48, %v4913_v35  ;;  %v6386_v22 = vpop.f32.mrb[88].mxu0 }
 0xba9   :  { %v4916_v9 = vmul.f32 %v6386_v22, %v9762_v5  ;;  %v4804_v15 = vpop.f32.mrb[89].mxu0 }
 0xbaa   :  { %v4915_v14 = vmul.f32 %v4804_v15, %v9763_v46  ;;  %v5064_v15 = vld [vmem:[%s9727_s4 + $0xb] ss:$0 sm:$0xff]  ;;  %s7205_s4 = scalar_lea.vmem %s5038_s0, 256 }
 0xbab   :  { %p7206_p0 = scmp.ne.s32.totalorder %s5038_s0, %s7205_s4  ;;  %p7211_p2 = scmp.lt.s32.totalorder %s7205_s4, %s7205_s4 }
 0xbac   :  { %v6824_v33 = vpack.c.bf16 %v4916_v9, %v4915_v14  ;;  %v6389_v24 = vpop.f32.mrb[90].mxu0 }
 0xbad   :  { %v4918_v29 = vmul.f32 %v6389_v24, %v9762_v5  ;;  %v4814_v0 = vpop.f32.mrb[91].mxu0  ;;  %v9764_v24 = vld [vmem:[#allocation6_spill] sm:$0xff]  ;;  %p7212_p3 = por %p7211_p2, %p7210_p1 }
 0xbae   :  { %v4917_v23 = vmul.f32 %v4814_v0, %v9763_v46 }
 0xbaf   :  { %p7213_p4 = pnand %p7212_p3, %p7206_p0 }
 0xbb0   :  { %v6828_v56 = vpack.c.bf16 %v4918_v29, %v4917_v23  ;;  %v6392_v44 = vpop.f32.mrb[92].mxu0  ;;  %v151_v29 = vadd.f32 %v5064_v15, %v9764_v24 }
 0xbb1   :  { %v4920_v16 = vmul.f32 %v6392_v44, %v9762_v5  ;;  %v4824_v7 = vpop.f32.mrb[93].mxu0 }
 0xbb2   :  { %v4919_v57 = vmul.f32 %v4824_v7, %v9763_v46 }
 0xbb4   :  { %v6798_v19 = vpack.c.bf16 %v4920_v16, %v4919_v57  ;;  %v6395_v6 = vpop.f32.mrb[94].mxu0  ;;  %v9765_v16 = vld [vmem:[#allocation5_spill] sm:$0xff] }
 0xbb5   :  { %v4922_v63 = vmul.f32 %v6395_v6, %v9762_v5  ;;  %v4834_v34 = vpop.f32.mrb[95].mxu0  ;;  %v156_v7 = vadd.f32 %v9765_v16, %v5064_v15 }
 0xbb6   :  { %v4921_v38 = vmul.f32 %v4834_v34, %v9763_v46  ;;  %6799 = vmatprep.subr.bf16.mxu1 %v6798_v19 }
 0xbb7   :  { %6801 = vmatpush3.bf16.msra.mxu1 %v6800_v62 }
 0xbb8   :  { %v6802_v12 = vpack.c.bf16 %v4922_v63, %v4921_v38  ;;  %v6398_v13 = vpop.f32.mrb[96].mxu0 }
 0xbb9   :  { %v4924_v51 = vmul.f32 %v6398_v13, %v9762_v5  ;;  %v4844_v60 = vpop.f32.mrb[97].mxu0 }
 0xbba   :  { %v4923_v10 = vmul.f32 %v4844_v60, %v9763_v46  ;;  %6803 = vmatprep.subr.bf16.mxu1 %v6802_v12 }
 0xbbb   :  { %6805 = vmatpush3.bf16.msra.mxu1 %v6804_v27 }
 0xbbc   :  { %v6806_v8 = vpack.c.bf16 %v4924_v51, %v4923_v10  ;;  %v6401_v25 = vpop.f32.mrb[98].mxu0 }
 0xbbd   :  { %v4926_v31 = vmul.f32 %v6401_v25, %v9762_v5  ;;  %v4854_v30 = vpop.f32.mrb[99].mxu0 }
 0xbbe   :  { %v4925_v4 = vmul.f32 %v4854_v30, %v9763_v46  ;;  %6807 = vmatprep.subr.bf16.mxu1 %v6806_v8 }
 0xbbf   :  { %6809 = vmatpush3.bf16.msra.mxu1 %v6808_v50 }
 0xbc0   :  { %v6810_v61 = vpack.c.bf16 %v4926_v31, %v4925_v4  ;;  %v6404_v28 = vpop.f32.mrb[100].mxu0 }
 0xbc1   :  { %v4928_v39 = vmul.f32 %v6404_v28, %v9762_v5  ;;  %v4864_v52 = vpop.f32.mrb[101].mxu0 }
 0xbc2   :  { %v4927_v49 = vmul.f32 %v4864_v52, %v9763_v46  ;;  %6811 = vmatprep.subr.bf16.mxu1 %v6810_v61 }
 0xbc3   :  { %6813 = vmatpush3.bf16.msra.mxu1 %v6812_v36  ;;  %v7203_v36 = vld [vmem:[%s9725_s2 + $0x18] sm:$0xff] }
 0xbc4   :  { %v6814_v40 = vpack.c.bf16 %v4928_v39, %v4927_v49  ;;  %v6407_v17 = vpop.f32.mrb[102].mxu0 }
 0xbc5   :  { %v4930_v62 = vmul.f32 %v6407_v17, %v9762_v5  ;;  %v4874_v45 = vpop.f32.mrb[103].mxu0 }
 0xbc6   :  { %v4929_v53 = vmul.f32 %v4874_v45, %v9763_v46  ;;  %6815 = vmatprep.subr.bf16.mxu1 %v6814_v40 }
 0xbc7   :  { %6817 = vmatpush3.bf16.msra.mxu1 %v6816_v32 }
 0xbc8   :  { %v6818_v42 = vpack.c.bf16 %v4930_v62, %v4929_v53  ;;  %v6410_v59 = vpop.f32.mrb[104].mxu0 }
 0xbc9   :  { %v4932_v27 = vmul.f32 %v6410_v59, %v9762_v5  ;;  %v4884_v3 = vpop.f32.mrb[105].mxu0 }
 0xbca   :  { %v4931_v11 = vmul.f32 %v4884_v3, %v9763_v46  ;;  %6819 = vmatprep.subr.bf16.mxu1 %v6818_v42 }
 0xbcb   :  { %6821 = vmatpush3.bf16.msra.mxu1 %v6820_v47 }
 0xbcc   :  { %v6822_v58 = vpack.c.bf16 %v4932_v27, %v4931_v11  ;;  %v6413_v1 = vpop.f32.mrb[106].mxu0 }
 0xbcd   :  { %v4934_v50 = vmul.f32 %v6413_v1, %v9762_v5  ;;  %v4894_v54 = vpop.f32.mrb[107].mxu0  ;;  %v7204_v5 = vld [vmem:[%s9725_s2 + $0x10] sm:$0xff] }
 0xbce   :  { %v4933_v18 = vmul.f32 %v4894_v54, %v9763_v46  ;;  %6823 = vmatprep.subr.bf16.mxu1 %v6822_v58 }
 0xbcf   :  { %6825 = vmatpush3.bf16.msra.mxu1 %v6824_v33 }
 0xbd0   :  { %v6826_v37 = vpack.c.bf16 %v4934_v50, %v4933_v18 }
 0xbd2   :  { %6827 = vmatprep.subr.bf16.mxu1 %v6826_v37 }
 0xbd3   :  { %6829 = vmatpush3.bf16.msra.mxu1 %v6828_v56 }
 0xbd6   :  { %5004 = vmatmul.mubr.f32.vlgmr.msra.gmra.mrb[106].mxu1 %v7202_v21 }
 0xbd7   :  { %5008 = vmatprep.mubr.f32.mxu1 %v7203_v36 }
 0xbda   :  { %5009 = vmatmul.mubr.f32.gmra.mrb[108].mxu1 %v7204_v5 }
 0xca9   :  { %v5773_v46 = vpop.f32.mrb[106].mxu1 }
 0xcaa   :  { %v5774_v26 = vpop.f32.mrb[107].mxu1 }
 0xcab   :  { %v5775_v43 = vadd.f32 %v5774_v26, %v5773_v46 }
 0xcad   :  { %v5006_v20 = vadd.f32 %v5775_v43, %v5293_v55  ;;  %v5776_v32 = vpop.f32.mrb[108].mxu1 }
 0xcae   :  { %v5777_v41 = vpop.f32.mrb[109].mxu1 }
 0xcaf   :  { %v5016_v48 = vmin.f32 %v5006_v20, 0.0  ;;  %v5778_v2 = vadd.f32 %v5777_v41, %v5776_v32  ;;  %vm5014_vm0 = vcmp.gt.f32.partialorder %v5006_v20, 0.0 }
 0xcb1   :  { %v5018_v35 = vmul.f32 1.442695, %v5016_v48  ;;  %v5011_v47 = vadd.f32 %v5778_v2, %v5293_v55 }
 0xcb3   :  { %7130 = vpow2.f32 %v5018_v35  ;;  %v5017_v22 = vmin.f32 %v5011_v47, 0.0  ;;  %vm5015_vm9 = vcmp.gt.f32.partialorder %v5011_v47, 0.0 }
 0xcb5   :  { %v5020_v9 = vmul.f32 1.442695, %v5017_v22 }
 0xcb7   :  { %7132 = vpow2.f32 %v5020_v9 }
 0xcbd   :  { %v7131_v14 = vpop.eup %7130 }
 0xcbe   :  { %v5294_v33 = vadd.f32 -1.0, %v7131_v14 }
 0xcc0   :  { %v5024_v0 = vsel %vm5014_vm0, %v5006_v20, %v5294_v33 }
 0xcc1   :  { %v7133_v23 = vpop.eup %7132  ;;  %v5026_v56 = vadd.f32 %v5024_v0, %v151_v29 }
 0xcc2   :  { %v5295_v44 = vadd.f32 -1.0, %v7133_v23 }
 0xcc3   :  { %v5028_v57 = vmax.f32 %v5026_v56, 0.0 }
 0xcc4   :  { %v5025_v19 = vsel %vm5015_vm9, %v5011_v47, %v5295_v44 }
 0xcc5   :  { %5030 = vst [vmem:[#allocation2] sm:$0xff] %v5028_v57  ;;  %v5027_v6 = vadd.f32 %v5025_v19, %v156_v7 }
 0xcc7   :  { %v5029_v63 = vmax.f32 %v5027_v6, 0.0 }
 0xcc9   :  { %5031 = vst [vmem:[#allocation2 + $0x8] sm:$0xff] %v5029_v63 }
 0xcca   :  { %7216 = shalt.err (!%p7213_p4)
}
 0xccb   :  { %s7217_s30 = scalar_lea.hbm %s9729_s6, 256 }
 0xccc   :  { %p7218_p5 = scmp.ne.s32.totalorder %s9729_s6, %s7217_s30  ;;  %p7221_p6 = scmp.lt.u32.totalorder %s7217_s30, %s9729_s6 }
 0xcce   :  { %p7223_p7 = pnand %p7221_p6, %p7218_p5 }
 0xcd0   :  { %7226 = shalt.err (!%p7223_p7)
}
 0xcd1   :  { %s7231_s11 = smov 128   ;;  %s7232_s12 = smov 8  }
 0xcd2   :  { %5043 = dma.vmem_to_hbm [thread:$0]  %s5038_s0, 256, %s9729_s6, [#allocation3], %s7231_s11, %s7231_s11, %s7232_s12  }
 0xcd3   :  { %7227 = dma.done.wait [#allocation3], 256  }
 0xcd4   :  { %7228 = vsyncadd [#allocation3], 4294967040 }
 0xcd5   :  { %5047 = vsyncpa [#allocation3], 1 }

</bundles_post_ra>
